<compile_context>
chip_gen: v7x
topology: tpu7x:2x2x1
jax: 0.10.0
libtpu: 0.0.40
codegen_flags: <defaults>
</compile_context>

<pallas_src>
import math
import jax
import jax.numpy as jnp
from jax.experimental import pallas as pl
from jax.experimental.pallas import tpu as pltpu

HEADS, DIM_HEAD = 4, 32
VMEM_LIMIT = 48 * 1024 * 1024      # < 64 MiB so it is valid on v7x as well


def _compiler_params(semantics):
    return pltpu.CompilerParams(dimension_semantics=semantics,
                                vmem_limit_bytes=VMEM_LIMIT)


def _pick_tile(n, cap, cands):
    """Largest tile <= cap dividing n (full extent if n <= cap)."""
    if n <= cap:
        return n
    for c in cands:
        if c <= cap and n % c == 0:
            return c
    return n   # fallback: one full-extent block


# ----------------------------------------------------------------------------
# Tiled matmul kernel (bf16 MXU operands, f32 accumulate, fused bias/epilogue)
# ----------------------------------------------------------------------------

def _make_mm_kernel(a_act):
    def kernel(a_ref, b_ref, bias_ref, o_ref, acc_ref):
        @pl.when(pl.program_id(2) == 0)
        def _():
            acc_ref[...] = jnp.zeros_like(acc_ref)

        a = a_ref[...].astype(jnp.float32)
        if a_act == 'silu':
            a = a * jax.nn.sigmoid(a)
        acc_ref[...] += jnp.dot(a.astype(jnp.bfloat16), b_ref[...],
                                preferred_element_type=jnp.float32)

        @pl.when(pl.program_id(2) == pl.num_programs(2) - 1)
        def _():
            o_ref[...] = (acc_ref[...] + bias_ref[...]).astype(o_ref.dtype)
    return kernel


def pallas_matmul(a, b, bias=None, a_act='none'):
    """a [M,K] @ b [K,N] (+ bias[N]); bf16 operands on the MXU, f32 accumulate."""
    M, K = a.shape
    _, N = b.shape
    tm = _pick_tile(M, 512, (512, 256, 128, 64, 32, 16, 8))
    tn = _pick_tile(N, 1024, (512, 256, 128))
    tk = _pick_tile(K, 1024, (512, 256, 128))
    bias2 = bias if bias is not None else jnp.zeros((N,), jnp.float32)
    bias2 = bias2.reshape(1, N).astype(jnp.float32)
    out = pl.pallas_call(
        _make_mm_kernel(a_act),
        out_shape=jax.ShapeDtypeStruct((M, N), jnp.float32),
        grid=(M // tm, N // tn, K // tk),
        in_specs=[pl.BlockSpec((tm, tk), lambda m, n, k: (m, k)),
                  pl.BlockSpec((tk, tn), lambda m, n, k: (k, n)),
                  pl.BlockSpec((1, tn), lambda m, n, k: (0, n))],
        out_specs=pl.BlockSpec((tm, tn), lambda m, n, k: (m, n)),
        scratch_shapes=[pltpu.VMEM((tm, tn), jnp.float32)],
        compiler_params=_compiler_params(("parallel", "parallel", "arbitrary")),
    )(a, b.astype(jnp.bfloat16), bias2)
    return out


# ----------------------------------------------------------------------------
# Direct stride-1 3D conv kernel (no im2col), fused bias + (scale-shift-)SiLU
# ----------------------------------------------------------------------------

def _make_conv_kernel(kh, kw, Wp, HoWp, act):
    taps = [(j, k) for j in range(kh) for k in range(kw)]

    def body(x_ref, w_ref, b_ref, sc_ref, sh_ref, o_ref, acc_ref):
        @pl.when(pl.program_id(2) == 0)
        def _():
            acc_ref[...] = jnp.zeros_like(acc_ref)

        acc = acc_ref[...]
        for (j, k) in taps:
            s = j * Wp + k
            xs = x_ref[0, 0, pl.ds(s, HoWp), :].astype(jnp.bfloat16)
            acc = acc + jnp.dot(xs, w_ref[0, j * kw + k],
                                preferred_element_type=jnp.float32)
        acc_ref[...] = acc

        @pl.when(pl.program_id(2) == pl.num_programs(2) - 1)
        def _():
            r = acc + b_ref[0]
            if act == 'ss_silu':
                r = r * (sc_ref[0] + 1.0) + sh_ref[0]
            if act in ('silu', 'ss_silu'):
                r = r * jax.nn.sigmoid(r)
            o_ref[0, 0] = r.astype(o_ref.dtype)

    if act == 'ss_silu':
        return body

    def body_nosc(x_ref, w_ref, b_ref, o_ref, acc_ref):
        return body(x_ref, w_ref, b_ref, None, None, o_ref, acc_ref)
    return body_nosc


def conv3d_same(x, w, b, act='none', scale=None, shift=None):
    """nn.Conv3d, stride 1, 'same' padding.  x channels-last, w torch layout."""
    B, D, H, W, Cin = x.shape
    Cout, _, kd, kh, kw = w.shape
    if kd == 1:                       # 1x1x1 conv == plain (tiled) matmul
        out = pallas_matmul(x.reshape(B * D * H * W, Cin),
                            w.reshape(Cout, Cin).T, b)
        return out.reshape(B, D, H, W, Cout)

    p = kd // 2
    xp = jnp.pad(x, ((0, 0), (p, p), (p, p), (p, p), (0, 0)))
    Dp, Hp, Wp = D + 2 * p, H + 2 * p, W + 2 * p
    SLP = Hp * Wp + (kw - 1)
    xf = jnp.pad(xp.reshape(B, Dp, Hp * Wp, Cin),
                 ((0, 0), (0, 0), (0, kw - 1), (0, 0)))
    HoWp = H * Wp
    wk = jnp.transpose(w, (2, 3, 4, 1, 0)).reshape(kd, kh * kw, Cin, Cout)
    wk = wk.astype(jnp.bfloat16)
    bias = b if b is not None else jnp.zeros((Cout,), jnp.float32)
    bias = bias.reshape(1, 1, Cout).astype(jnp.float32)

    in_specs = [
        pl.BlockSpec((1, 1, SLP, Cin), lambda bb, dd, ii: (bb, dd + ii, 0, 0)),
        pl.BlockSpec((1, kh * kw, Cin, Cout), lambda bb, dd, ii: (ii, 0, 0, 0)),
        pl.BlockSpec((1, 1, Cout), lambda bb, dd, ii: (0, 0, 0)),
    ]
    args = [xf, wk, bias]
    if act == 'ss_silu':
        in_specs += [pl.BlockSpec((1, 1, Cout), lambda bb, dd, ii: (bb, 0, 0)),
                     pl.BlockSpec((1, 1, Cout), lambda bb, dd, ii: (bb, 0, 0))]
        args += [scale.reshape(B, 1, Cout).astype(jnp.float32),
                 shift.reshape(B, 1, Cout).astype(jnp.float32)]

    out = pl.pallas_call(
        _make_conv_kernel(kh, kw, Wp, HoWp, act),
        out_shape=jax.ShapeDtypeStruct((B, D, HoWp, Cout), jnp.float32),
        grid=(B, D, kd),
        in_specs=in_specs,
        out_specs=pl.BlockSpec((1, 1, HoWp, Cout),
                               lambda bb, dd, ii: (bb, dd, 0, 0)),
        scratch_shapes=[pltpu.VMEM((HoWp, Cout), jnp.float32)],
        compiler_params=_compiler_params(("parallel", "parallel", "arbitrary")),
    )(*args)
    return out.reshape(B, D, H, Wp, Cout)[:, :, :, :W, :]


def conv3d_stride2(x, w, b):
    """4x4x4 / stride-2 / pad-1 Downsample conv.
    # TODO(synk): replace this XLA im2col fallback with a direct strided Pallas
    # conv; the matmul itself already runs tiled/bf16 in Pallas."""
    B, D, H, W, Cin = x.shape
    Cout, _, kd, kh, kw = w.shape
    xp = jnp.pad(x, ((0, 0), (1, 1), (1, 1), (1, 1), (0, 0)))
    Do, Ho, Wo = D // 2, H // 2, W // 2
    pats = []
    for i in range(kd):
        for j in range(kh):
            for k in range(kw):
                pats.append(xp[:, i:i + 2 * Do - 1:2,
                               j:j + 2 * Ho - 1:2,
                               k:k + 2 * Wo - 1:2, :])
    a = jnp.stack(pats, axis=-2).reshape(B * Do * Ho * Wo, kd * kh * kw * Cin)
    wf = jnp.transpose(w, (2, 3, 4, 1, 0)).reshape(kd * kh * kw * Cin, Cout)
    out = pallas_matmul(a, wf, b)
    return out.reshape(B, Do, Ho, Wo, Cout)


# ----------------------------------------------------------------------------
# Channel LayerNorm (gamma only, biased variance, two-pass)
# ----------------------------------------------------------------------------

def _make_ln_kernel(c, eps):
    inv_c = 1.0 / c

    def kernel(x_ref, g_ref, o_ref):
        x = x_ref[...]
        mean = jnp.sum(x, axis=-1, keepdims=True) * inv_c
        xc = x - mean
        var = jnp.sum(xc * xc, axis=-1, keepdims=True) * inv_c
        o_ref[...] = xc * jax.lax.rsqrt(var + eps) * g_ref[...]
    return kernel


def pallas_channel_layernorm(x, g, eps=1e-5):
    shp = x.shape
    C = shp[-1]
    M = math.prod(shp[:-1])
    tm = _pick_tile(M, 1024, (1024, 512, 256, 128, 64, 32, 16, 8))
    out = pl.pallas_call(
        _make_ln_kernel(float(C), eps),
        out_shape=jax.ShapeDtypeStruct((M, C), jnp.float32),
        grid=(M // tm,),
        in_specs=[pl.BlockSpec((tm, C), lambda i: (i, 0)),
                  pl.BlockSpec((1, C), lambda i: (0, 0))],
        out_specs=pl.BlockSpec((tm, C), lambda i: (i, 0)),
        compiler_params=_compiler_params(("parallel",)),
    )(x.reshape(M, C), g.reshape(1, C).astype(jnp.float32))
    return out.reshape(shp)


# ----------------------------------------------------------------------------
# Fused attention kernels (one pallas_call per attention layer)
# ----------------------------------------------------------------------------

def _make_full_attn_kernel(scale):
    # TODO(synk): holds the n x n score block in VMEM per head; switch to a
    # flash-style KV-tiled online softmax once n (=D*H*W at the mid block)
    # grows beyond a few thousand.
    def kernel(qkv_ref, o_ref):
        q = qkv_ref[0, 0].astype(jnp.bfloat16)
        k = qkv_ref[1, 0].astype(jnp.bfloat16)
        v = qkv_ref[2, 0].astype(jnp.bfloat16)
        s = jax.lax.dot_general(q, k, (((1,), (1,)), ((), ())),
                                preferred_element_type=jnp.float32) * scale
        m = jnp.max(s, axis=-1, keepdims=True)
        e = jnp.exp(s - m)
        p = e * pl.reciprocal(jnp.sum(e, axis=-1, keepdims=True), approx=True)
        o = jnp.dot(p.astype(jnp.bfloat16), v, preferred_element_type=jnp.float32)
        o_ref[0] = o.astype(o_ref.dtype)
    return kernel


def _make_linear_attn_kernel(scale, inv_n):
    def kernel(q_ref, kv_ref, o_ref):
        q = q_ref[0].astype(jnp.float32)        # [n, dh]
        k = kv_ref[0, 0].astype(jnp.float32)    # [dh, n]
        v = kv_ref[1, 0].astype(jnp.float32)    # [dh, n]
        qm = jnp.max(q, axis=-1, keepdims=True)
        qe = jnp.exp(q - qm)
        qs = qe * (pl.reciprocal(jnp.sum(qe, axis=-1, keepdims=True),
                                 approx=True) * scale)
        km = jnp.max(k, axis=-1, keepdims=True)
        ke = jnp.exp(k - km)
        ks = ke * pl.reciprocal(jnp.sum(ke, axis=-1, keepdims=True), approx=True)
        vs = v * inv_n
        ctx = jax.lax.dot_general(ks.astype(jnp.bfloat16), vs.astype(jnp.bfloat16),
                                  (((1,), (1,)), ((), ())),
                                  preferred_element_type=jnp.float32)  # [dh, dh]
        o = jnp.dot(qs.astype(jnp.bfloat16), ctx.astype(jnp.bfloat16),
                    preferred_element_type=jnp.float32)                # [n, dh]
        o_ref[0] = o.astype(o_ref.dtype)
    return kernel


def _qkv_proj(p, x_flat):
    hidden = HEADS * DIM_HEAD
    wq = p['qkv_w'].reshape(3 * hidden, -1).T   # [dim, 3*hidden]
    return pallas_matmul(x_flat, wq, None)


def full_attention(p, x):
    B, D, H, W, C = x.shape
    n = D * H * W
    hidden = HEADS * DIM_HEAD
    qkv = _qkv_proj(p, x.reshape(B * n, C)).reshape(B, n, 3, HEADS, DIM_HEAD)
    qkv = jnp.transpose(qkv, (2, 0, 3, 1, 4)).reshape(3, B * HEADS, n, DIM_HEAD)
    out = pl.pallas_call(
        _make_full_attn_kernel(DIM_HEAD ** -0.5),
        out_shape=jax.ShapeDtypeStruct((B * HEADS, n, DIM_HEAD), jnp.float32),
        grid=(B * HEADS,),
        in_specs=[pl.BlockSpec((3, 1, n, DIM_HEAD), lambda g: (0, g, 0, 0))],
        out_specs=pl.BlockSpec((1, n, DIM_HEAD), lambda g: (g, 0, 0)),
        compiler_params=_compiler_params(("parallel",)),
    )(qkv)
    out = jnp.transpose(out.reshape(B, HEADS, n, DIM_HEAD), (0, 2, 1, 3))
    out = pallas_matmul(out.reshape(B * n, hidden),
                        p['out_w'].reshape(C, hidden).T, p['out_b'])
    return out.reshape(B, D, H, W, C)


def linear_attention(p, x):
    B, D, H, W, C = x.shape
    n = D * H * W
    hidden = HEADS * DIM_HEAD
    qkv = _qkv_proj(p, x.reshape(B * n, C)).reshape(B, n, 3, HEADS, DIM_HEAD)
    q = jnp.transpose(qkv[:, :, 0], (0, 2, 1, 3)).reshape(B * HEADS, n, DIM_HEAD)
    kv = jnp.transpose(qkv[:, :, 1:], (2, 0, 3, 4, 1)).reshape(
        2, B * HEADS, DIM_HEAD, n)
    out = pl.pallas_call(
        _make_linear_attn_kernel(DIM_HEAD ** -0.5, 1.0 / n),
        out_shape=jax.ShapeDtypeStruct((B * HEADS, n, DIM_HEAD), jnp.float32),
        grid=(B * HEADS,),
        in_specs=[pl.BlockSpec((1, n, DIM_HEAD), lambda g: (g, 0, 0)),
                  pl.BlockSpec((2, 1, DIM_HEAD, n), lambda g: (0, g, 0, 0))],
        out_specs=pl.BlockSpec((1, n, DIM_HEAD), lambda g: (g, 0, 0)),
        compiler_params=_compiler_params(("parallel",)),
    )(q, kv)
    out = jnp.transpose(out.reshape(B, HEADS, n, DIM_HEAD), (0, 2, 1, 3))
    out = pallas_matmul(out.reshape(B * n, hidden),
                        p['out_w'].reshape(C, hidden).T, p['out_b'])
    # TODO(synk): fuse this LayerNorm3D (and the PreNorm LN) into the adjacent
    # 1x1 matmul kernels' load/store paths.
    out = pallas_channel_layernorm(out, p['out_ln_g'])
    return out.reshape(B, D, H, W, C)


def res_prenorm_linattn(p, x):
    return linear_attention(p, pallas_channel_layernorm(x, p['norm_g'])) + x


def res_prenorm_attn(p, x):
    return full_attention(p, pallas_channel_layernorm(x, p['norm_g'])) + x


# ----------------------------------------------------------------------------
# Layers built from the kernels
# ----------------------------------------------------------------------------

def upsample_nearest2(x):
    B, D, H, W, C = x.shape
    x = jnp.broadcast_to(x[:, :, None, :, None, :, None, :],
                         (B, D, 2, H, 2, W, 2, C))
    return x.reshape(B, 2 * D, 2 * H, 2 * W, C)


def resblock(p, x, t):
    """ResBlock3D: Block(conv3, scale-shift, SiLU) -> Block(conv3, SiLU) + res."""
    B = x.shape[0]
    dim_out = p['conv1_w'].shape[0]
    te = pallas_matmul(t, p['mlp_w'], p['mlp_b'], a_act='silu')  # SiLU fused
    te = jnp.broadcast_to(te, (B, 2 * dim_out))
    scale, shift = te[:, :dim_out], te[:, dim_out:]
    h = conv3d_same(x, p['conv1_w'], p['conv1_b'], act='ss_silu',
                    scale=scale, shift=shift)
    h = conv3d_same(h, p['conv2_w'], p['conv2_b'], act='silu')
    res = conv3d_same(x, p['res_w'], p['res_b']) if 'res_w' in p else x
    return h + res


# ----------------------------------------------------------------------------
# Deterministic parameter initialization (synthetic, PyTorch-default-like)
# ----------------------------------------------------------------------------

class KeyGen:
    def __init__(self, seed=0):
        self.key = jax.random.PRNGKey(seed)

    def __call__(self):
        self.key, sub = jax.random.split(self.key)
        return sub


def _conv_params(key, cin, cout, k, bias=True):
    kw_, kb_ = jax.random.split(key)
    s = 1.0 / math.sqrt(cin * k * k * k)
    w = jax.random.uniform(kw_, (cout, cin, k, k, k), jnp.float32, -s, s)
    b = jax.random.uniform(kb_, (cout,), jnp.float32, -s, s) if bias else None
    return w, b


def _linear_params(key, n_in, n_out):
    kw_, kb_ = jax.random.split(key)
    s = 1.0 / math.sqrt(n_in)
    w = jax.random.uniform(kw_, (n_in, n_out), jnp.float32, -s, s)
    b = jax.random.uniform(kb_, (n_out,), jnp.float32, -s, s)
    return w, b


def init_resblock(kg, dim_in, dim_out, time_dim):
    p = {}
    p['mlp_w'], p['mlp_b'] = _linear_params(kg(), time_dim, dim_out * 2)
    p['conv1_w'], p['conv1_b'] = _conv_params(kg(), dim_in, dim_out, 3)
    p['conv2_w'], p['conv2_b'] = _conv_params(kg(), dim_out, dim_out, 3)
    if dim_in != dim_out:
        p['res_w'], p['res_b'] = _conv_params(kg(), dim_in, dim_out, 1)
    return p


def init_linattn(kg, dim):
    hidden = HEADS * DIM_HEAD
    p = {'norm_g': jnp.ones((dim,), jnp.float32)}
    p['qkv_w'], _ = _conv_params(kg(), dim, hidden * 3, 1, bias=False)
    p['out_w'], p['out_b'] = _conv_params(kg(), hidden, dim, 1)
    p['out_ln_g'] = jnp.ones((dim,), jnp.float32)
    return p


def init_attn(kg, dim):
    hidden = HEADS * DIM_HEAD
    p = {'norm_g': jnp.ones((dim,), jnp.float32)}
    p['qkv_w'], _ = _conv_params(kg(), dim, hidden * 3, 1, bias=False)
    p['out_w'], p['out_b'] = _conv_params(kg(), hidden, dim, 1)
    return p


def init_conditional_unet(seed, in_nc, out_nc, nf, depth):
    kg = KeyGen(seed)
    time_dim = nf * 4
    P = {'depth': depth, 'nf': nf, 'time_dim': time_dim}
    P['init_conv_w'], P['init_conv_b'] = _conv_params(kg(), in_nc * 2, nf, 7)
    P['time_lin1_w'], P['time_lin1_b'] = _linear_params(kg(), nf, time_dim)
    P['time_lin2_w'], P['time_lin2_b'] = _linear_params(kg(), time_dim, time_dim)
    downs, ups = [], []
    for i in range(depth):
        dim_in = nf * (2 ** i)
        dim_out = nf * (2 ** (i + 1))
        d = {'b1': init_resblock(kg, dim_in, dim_in, time_dim),
             'b2': init_resblock(kg, dim_in, dim_in, time_dim),
             'attn': init_linattn(kg, dim_in)}
        if i != depth - 1:
            d['down_w'], d['down_b'] = _conv_params(kg(), dim_in, dim_out, 4)
            d['down_stride'] = 2
        else:
            d['down_w'], d['down_b'] = _conv_params(kg(), dim_in, dim_out, 3)
            d['down_stride'] = 1
        downs.append(d)
        u = {'b1': init_resblock(kg, dim_out + dim_in, dim_out, time_dim),
             'b2': init_resblock(kg, dim_out + dim_in, dim_out, time_dim),
             'attn': init_linattn(kg, dim_out),
             'up_mode': 'upsample' if i != 0 else 'conv'}
        u['up_w'], u['up_b'] = _conv_params(kg(), dim_out, dim_in, 3)
        ups.insert(0, u)
    P['downs'], P['ups'] = downs, ups
    mid_dim = nf * (2 ** depth)
    P['mid_block1'] = init_resblock(kg, mid_dim, mid_dim, time_dim)
    P['mid_attn'] = init_attn(kg, mid_dim)
    P['mid_block2'] = init_resblock(kg, mid_dim, mid_dim, time_dim)
    P['final_res'] = init_resblock(kg, nf * 2, nf, time_dim)
    P['final_conv_w'], P['final_conv_b'] = _conv_params(kg(), nf, out_nc, 3)
    return P


# ----------------------------------------------------------------------------
# Forward pass (ConditionalUNet.forward)
# ----------------------------------------------------------------------------

def conditional_unet_forward(P, xt, cond, time):
    depth, nf = P['depth'], P['nf']
    B, C, D0, H0, W0 = xt.shape
    if not isinstance(time, jnp.ndarray):
        time = jnp.array([float(time)], jnp.float32)
    time = time.astype(jnp.float32).reshape(-1)

    x = xt - cond
    x = jnp.concatenate([x, cond], axis=1)               # NCDHW, 2*in_nc ch
    x = jnp.transpose(x, (0, 2, 3, 4, 1))                # -> channels-last

    # check_image_size: reflect-pad D,H,W up to multiple of 2**depth
    s = 2 ** depth
    pd, ph, pw = (s - D0 % s) % s, (s - H0 % s) % s, (s - W0 % s) % s
    if pd or ph or pw:
        x = jnp.pad(x, ((0, 0), (0, pd), (0, ph), (0, pw), (0, 0)), mode='reflect')

    x = conv3d_same(x, P['init_conv_w'], P['init_conv_b'])     # 7x7x7
    x_init = x

    # time MLP: SinusoidalPosEmb(nf) -> Linear -> GELU -> Linear
    half = nf // 2
    emb_c = math.log(10000.0) / (half - 1)
    freqs = jnp.exp(-emb_c * jnp.arange(half, dtype=jnp.float32))
    e = time[:, None] * freqs[None, :]
    t = jnp.concatenate([jnp.sin(e), jnp.cos(e)], axis=-1)
    t = pallas_matmul(t, P['time_lin1_w'], P['time_lin1_b'])
    t = jax.nn.gelu(t, approximate=False)  # TODO(synk): exact-erf GELU on tiny [B,4nf] tensor kept in plain JAX
    t = pallas_matmul(t, P['time_lin2_w'], P['time_lin2_b'])

    hs = []
    for d in P['downs']:
        x = resblock(d['b1'], x, t)
        hs.append(x)
        x = resblock(d['b2'], x, t)
        x = res_prenorm_linattn(d['attn'], x)
        hs.append(x)
        if d['down_stride'] == 2:
            x = conv3d_stride2(x, d['down_w'], d['down_b'])
        else:
            x = conv3d_same(x, d['down_w'], d['down_b'])

    x = resblock(P['mid_block1'], x, t)
    x = res_prenorm_attn(P['mid_attn'], x)
    x = resblock(P['mid_block2'], x, t)

    for u in P['ups']:
        x = jnp.concatenate([x, hs.pop()], axis=-1)
        x = resblock(u['b1'], x, t)
        x = jnp.concatenate([x, hs.pop()], axis=-1)
        x = resblock(u['b2'], x, t)
        x = res_prenorm_linattn(u['attn'], x)
        if u['up_mode'] == 'upsample':
            x = upsample_nearest2(x)
            x = conv3d_same(x, u['up_w'], u['up_b'])
        else:
            x = conv3d_same(x, u['up_w'], u['up_b'])

    x = jnp.concatenate([x, x_init], axis=-1)
    x = resblock(P['final_res'], x, t)
    x = conv3d_same(x, P['final_conv_w'], P['final_conv_b'])
    x = x[:, :D0, :H0, :W0, :]
    return jnp.transpose(x, (0, 4, 1, 2, 3))              # back to NCDHW


# ----------------------------------------------------------------------------

if __name__ == "__main__":
    in_nc, out_nc, nf, depth = 2, 2, 8, 2
    params = init_conditional_unet(0, in_nc, out_nc, nf, depth)

    key = jax.random.PRNGKey(0)
    k1, k2 = jax.random.split(key)
    B, D, H, W = 1, 6, 6, 6
    xt = jax.random.normal(k1, (B, in_nc, D, H, W), jnp.float32)
    cond = jax.random.normal(k2, (B, in_nc, D, H, W), jnp.float32)

    out = conditional_unet_forward(params, xt, cond, 0.5)
    out = jax.block_until_ready(out)
    assert out.shape == (B, out_nc, D, H, W), out.shape
    assert bool(jnp.all(jnp.isfinite(out)))
    print("KERNEL_OK")
</pallas_src>

<mosaic_0001>
module attributes {stable_mosaic.version = 11 : i64} {
  func.func @body_nosc(%arg0: i32, %arg1: i32, %arg2: i32, %arg3: memref<1x1x202x4xf32, #tpu.memory_space<vmem>>, %arg4: memref<1x49x4x8xbf16, #tpu.memory_space<vmem>>, %arg5: memref<1x1x8xf32, #tpu.memory_space<vmem>>, %arg6: memref<1x1x112x8xf32, #tpu.memory_space<vmem>>, %arg7: memref<112x8xf32, #tpu.memory_space<vmem>>) attributes {dimension_semantics = [#tpu.dimension_semantics<parallel>, #tpu.dimension_semantics<parallel>, #tpu.dimension_semantics<arbitrary>], iteration_bounds = array<i64: 1, 8, 7>, scalar_prefetch = 0 : i64, scratch_operands = 1 : i64, tpu.core_type = #tpu.core_type<tc>, window_params = [{transform_indices = @transform_0, window_bounds = array<i64: 1, 1, 202, 4>}, {transform_indices = @transform_1, window_bounds = array<i64: 1, 49, 4, 8>}, {pipeline_mode = #tpu.pipeline_mode<synchronous>, transform_indices = @transform_2, window_bounds = array<i64: 1, 1, 8>}, {transform_indices = @transform_3, window_bounds = array<i64: 1, 1, 112, 8>}]} {
    %c0_i32 = arith.constant 0 : i32
    %0 = arith.cmpi eq, %arg2, %c0_i32 : i32
    %1 = arith.extui %0 : i1 to i32
    %c0_i32_0 = arith.constant 0 : i32
    %2 = arith.cmpi ne, %1, %c0_i32_0 : i32
    scf.if %2 {
      %cst_376 = arith.constant 0.000000e+00 : f32
      %351 = vector.broadcast %cst_376 : f32 to vector<112x8xf32>
      %c0_377 = arith.constant 0 : index
      %c0_378 = arith.constant 0 : index
      %352 = vector.load %arg7[%c0_377, %c0_378] : memref<112x8xf32, #tpu.memory_space<vmem>>, vector<112x8xf32>
      tpu.vector_store %arg7[%c0_377, %c0_378], %351 {strides = array<i32>} : memref<112x8xf32, #tpu.memory_space<vmem>>, vector<112x8xf32>,
    } else {
    }
    %c0 = arith.constant 0 : index
    %c0_1 = arith.constant 0 : index
    %3 = vector.load %arg7[%c0, %c0_1] : memref<112x8xf32, #tpu.memory_space<vmem>>, vector<112x8xf32>
    %c0_2 = arith.constant 0 : index
    %c0_3 = arith.constant 0 : index
    %c0_4 = arith.constant 0 : index
    %c0_5 = arith.constant 0 : index
    %4 = vector.load %arg3[%c0_2, %c0_3, %c0_4, %c0_5] : memref<1x1x202x4xf32, #tpu.memory_space<vmem>>, vector<1x1x112x4xf32>
    %5 = vector.shape_cast %4 : vector<1x1x112x4xf32> to vector<112x4xf32>
    %6 = arith.truncf %5 : vector<112x4xf32> to vector<112x4xbf16>
    %c0_6 = arith.constant 0 : index
    %c0_7 = arith.constant 0 : index
    %c0_8 = arith.constant 0 : index
    %c0_9 = arith.constant 0 : index
    %7 = vector.load %arg4[%c0_6, %c0_7, %c0_8, %c0_9] : memref<1x49x4x8xbf16, #tpu.memory_space<vmem>>, vector<1x1x4x8xbf16>
    %8 = vector.shape_cast %7 : vector<1x1x4x8xbf16> to vector<4x8xbf16>
    %cst = arith.constant dense<0.000000e+00> : vector<112x8xf32>
    %9 = tpu.matmul %6, %8, %cst {dimension_numbers = #tpu.dot_dimension_numbers<[1], [0], [0], [1], [0, 0, 1, 1], [], []>} : vector<112x4xbf16>, vector<4x8xbf16>, vector<112x8xf32> -> vector<112x8xf32>
    %10 = arith.addf %3, %9 : vector<112x8xf32>
    %c0_10 = arith.constant 0 : index
    %c0_11 = arith.constant 0 : index
    %c1 = arith.constant 1 : index
    %c0_12 = arith.constant 0 : index
    %11 = vector.load %arg3[%c0_10, %c0_11, %c1, %c0_12] : memref<1x1x202x4xf32, #tpu.memory_space<vmem>>, vector<1x1x112x4xf32>
    %12 = vector.shape_cast %11 : vector<1x1x112x4xf32> to vector<112x4xf32>
    %13 = arith.truncf %12 : vector<112x4xf32> to vector<112x4xbf16>
    %c0_13 = arith.constant 0 : index
    %c1_14 = arith.constant 1 : index
    %c0_15 = arith.constant 0 : index
    %c0_16 = arith.constant 0 : index
    %14 = vector.load %arg4[%c0_13, %c1_14, %c0_15, %c0_16] : memref<1x49x4x8xbf16, #tpu.memory_space<vmem>>, vector<1x1x4x8xbf16>
    %15 = vector.shape_cast %14 : vector<1x1x4x8xbf16> to vector<4x8xbf16>
    %cst_17 = arith.constant dense<0.000000e+00> : vector<112x8xf32>
    %16 = tpu.matmul %13, %15, %cst_17 {dimension_numbers = #tpu.dot_dimension_numbers<[1], [0], [0], [1], [0, 0, 1, 1], [], []>} : vector<112x4xbf16>, vector<4x8xbf16>, vector<112x8xf32> -> vector<112x8xf32>
    %17 = arith.addf %10, %16 : vector<112x8xf32>
    %c0_18 = arith.constant 0 : index
    %c0_19 = arith.constant 0 : index
    %c2 = arith.constant 2 : index
    %c0_20 = arith.constant 0 : index
    %18 = vector.load %arg3[%c0_18, %c0_19, %c2, %c0_20] : memref<1x1x202x4xf32, #tpu.memory_space<vmem>>, vector<1x1x112x4xf32>
    %19 = vector.shape_cast %18 : vector<1x1x112x4xf32> to vector<112x4xf32>
    %20 = arith.truncf %19 : vector<112x4xf32> to vector<112x4xbf16>
    %c0_21 = arith.constant 0 : index
    %c2_22 = arith.constant 2 : index
    %c0_23 = arith.constant 0 : index
    %c0_24 = arith.constant 0 : index
    %21 = vector.load %arg4[%c0_21, %c2_22, %c0_23, %c0_24] : memref<1x49x4x8xbf16, #tpu.memory_space<vmem>>, vector<1x1x4x8xbf16>
    %22 = vector.shape_cast %21 : vector<1x1x4x8xbf16> to vector<4x8xbf16>
    %cst_25 = arith.constant dense<0.000000e+00> : vector<112x8xf32>
    %23 = tpu.matmul %20, %22, %cst_25 {dimension_numbers = #tpu.dot_dimension_numbers<[1], [0], [0], [1], [0, 0, 1, 1], [], []>} : vector<112x4xbf16>, vector<4x8xbf16>, vector<112x8xf32> -> vector<112x8xf32>
    %24 = arith.addf %17, %23 : vector<112x8xf32>
    %c0_26 = arith.constant 0 : index
    %c0_27 = arith.constant 0 : index
    %c3 = arith.constant 3 : index
    %c0_28 = arith.constant 0 : index
    %25 = vector.load %arg3[%c0_26, %c0_27, %c3, %c0_28] : memref<1x1x202x4xf32, #tpu.memory_space<vmem>>, vector<1x1x112x4xf32>
    %26 = vector.shape_cast %25 : vector<1x1x112x4xf32> to vector<112x4xf32>
    %27 = arith.truncf %26 : vector<112x4xf32> to vector<112x4xbf16>
    %c0_29 = arith.constant 0 : index
    %c3_30 = arith.constant 3 : index
    %c0_31 = arith.constant 0 : index
    %c0_32 = arith.constant 0 : index
    %28 = vector.load %arg4[%c0_29, %c3_30, %c0_31, %c0_32] : memref<1x49x4x8xbf16, #tpu.memory_space<vmem>>, vector<1x1x4x8xbf16>
    %29 = vector.shape_cast %28 : vector<1x1x4x8xbf16> to vector<4x8xbf16>
    %cst_33 = arith.constant dense<0.000000e+00> : vector<112x8xf32>
    %30 = tpu.matmul %27, %29, %cst_33 {dimension_numbers = #tpu.dot_dimension_numbers<[1], [0], [0], [1], [0, 0, 1, 1], [], []>} : vector<112x4xbf16>, vector<4x8xbf16>, vector<112x8xf32> -> vector<112x8xf32>
    %31 = arith.addf %24, %30 : vector<112x8xf32>
    %c0_34 = arith.constant 0 : index
    %c0_35 = arith.constant 0 : index
    %c4 = arith.constant 4 : index
    %c0_36 = arith.constant 0 : index
    %32 = vector.load %arg3[%c0_34, %c0_35, %c4, %c0_36] : memref<1x1x202x4xf32, #tpu.memory_space<vmem>>, vector<1x1x112x4xf32>
    %33 = vector.shape_cast %32 : vector<1x1x112x4xf32> to vector<112x4xf32>
    %34 = arith.truncf %33 : vector<112x4xf32> to vector<112x4xbf16>
    %c0_37 = arith.constant 0 : index
    %c4_38 = arith.constant 4 : index
    %c0_39 = arith.constant 0 : index
    %c0_40 = arith.constant 0 : index
    %35 = vector.load %arg4[%c0_37, %c4_38, %c0_39, %c0_40] : memref<1x49x4x8xbf16, #tpu.memory_space<vmem>>, vector<1x1x4x8xbf16>
    %36 = vector.shape_cast %35 : vector<1x1x4x8xbf16> to vector<4x8xbf16>
    %cst_41 = arith.constant dense<0.000000e+00> : vector<112x8xf32>
    %37 = tpu.matmul %34, %36, %cst_41 {dimension_numbers = #tpu.dot_dimension_numbers<[1], [0], [0], [1], [0, 0, 1, 1], [], []>} : vector<112x4xbf16>, vector<4x8xbf16>, vector<112x8xf32> -> vector<112x8xf32>
    %38 = arith.addf %31, %37 : vector<112x8xf32>
    %c0_42 = arith.constant 0 : index
    %c0_43 = arith.constant 0 : index
    %c5 = arith.constant 5 : index
    %c0_44 = arith.constant 0 : index
    %39 = vector.load %arg3[%c0_42, %c0_43, %c5, %c0_44] : memref<1x1x202x4xf32, #tpu.memory_space<vmem>>, vector<1x1x112x4xf32>
    %40 = vector.shape_cast %39 : vector<1x1x112x4xf32> to vector<112x4xf32>
    %41 = arith.truncf %40 : vector<112x4xf32> to vector<112x4xbf16>
    %c0_45 = arith.constant 0 : index
    %c5_46 = arith.constant 5 : index
    %c0_47 = arith.constant 0 : index
    %c0_48 = arith.constant 0 : index
    %42 = vector.load %arg4[%c0_45, %c5_46, %c0_47, %c0_48] : memref<1x49x4x8xbf16, #tpu.memory_space<vmem>>, vector<1x1x4x8xbf16>
    %43 = vector.shape_cast %42 : vector<1x1x4x8xbf16> to vector<4x8xbf16>
    %cst_49 = arith.constant dense<0.000000e+00> : vector<112x8xf32>
    %44 = tpu.matmul %41, %43, %cst_49 {dimension_numbers = #tpu.dot_dimension_numbers<[1], [0], [0], [1], [0, 0, 1, 1], [], []>} : vector<112x4xbf16>, vector<4x8xbf16>, vector<112x8xf32> -> vector<112x8xf32>
    %45 = arith.addf %38, %44 : vector<112x8xf32>
    %c0_50 = arith.constant 0 : index
    %c0_51 = arith.constant 0 : index
    %c6 = arith.constant 6 : index
    %c0_52 = arith.constant 0 : index
    %46 = vector.load %arg3[%c0_50, %c0_51, %c6, %c0_52] : memref<1x1x202x4xf32, #tpu.memory_space<vmem>>, vector<1x1x112x4xf32>
    %47 = vector.shape_cast %46 : vector<1x1x112x4xf32> to vector<112x4xf32>
    %48 = arith.truncf %47 : vector<112x4xf32> to vector<112x4xbf16>
    %c0_53 = arith.constant 0 : index
    %c6_54 = arith.constant 6 : index
    %c0_55 = arith.constant 0 : index
    %c0_56 = arith.constant 0 : index
    %49 = vector.load %arg4[%c0_53, %c6_54, %c0_55, %c0_56] : memref<1x49x4x8xbf16, #tpu.memory_space<vmem>>, vector<1x1x4x8xbf16>
    %50 = vector.shape_cast %49 : vector<1x1x4x8xbf16> to vector<4x8xbf16>
    %cst_57 = arith.constant dense<0.000000e+00> : vector<112x8xf32>
    %51 = tpu.matmul %48, %50, %cst_57 {dimension_numbers = #tpu.dot_dimension_numbers<[1], [0], [0], [1], [0, 0, 1, 1], [], []>} : vector<112x4xbf16>, vector<4x8xbf16>, vector<112x8xf32> -> vector<112x8xf32>
    %52 = arith.addf %45, %51 : vector<112x8xf32>
    %c0_58 = arith.constant 0 : index
    %c0_59 = arith.constant 0 : index
    %c14 = arith.constant 14 : index
    %c0_60 = arith.constant 0 : index
    %53 = vector.load %arg3[%c0_58, %c0_59, %c14, %c0_60] : memref<1x1x202x4xf32, #tpu.memory_space<vmem>>, vector<1x1x112x4xf32>
    %54 = vector.shape_cast %53 : vector<1x1x112x4xf32> to vector<112x4xf32>
    %55 = arith.truncf %54 : vector<112x4xf32> to vector<112x4xbf16>
    %c0_61 = arith.constant 0 : index
    %c7 = arith.constant 7 : index
    %c0_62 = arith.constant 0 : index
    %c0_63 = arith.constant 0 : index
    %56 = vector.load %arg4[%c0_61, %c7, %c0_62, %c0_63] : memref<1x49x4x8xbf16, #tpu.memory_space<vmem>>, vector<1x1x4x8xbf16>
    %57 = vector.shape_cast %56 : vector<1x1x4x8xbf16> to vector<4x8xbf16>
    %cst_64 = arith.constant dense<0.000000e+00> : vector<112x8xf32>
    %58 = tpu.matmul %55, %57, %cst_64 {dimension_numbers = #tpu.dot_dimension_numbers<[1], [0], [0], [1], [0, 0, 1, 1], [], []>} : vector<112x4xbf16>, vector<4x8xbf16>, vector<112x8xf32> -> vector<112x8xf32>
    %59 = arith.addf %52, %58 : vector<112x8xf32>
    %c0_65 = arith.constant 0 : index
    %c0_66 = arith.constant 0 : index
    %c15 = arith.constant 15 : index
    %c0_67 = arith.constant 0 : index
    %60 = vector.load %arg3[%c0_65, %c0_66, %c15, %c0_67] : memref<1x1x202x4xf32, #tpu.memory_space<vmem>>, vector<1x1x112x4xf32>
    %61 = vector.shape_cast %60 : vector<1x1x112x4xf32> to vector<112x4xf32>
    %62 = arith.truncf %61 : vector<112x4xf32> to vector<112x4xbf16>
    %c0_68 = arith.constant 0 : index
    %c8 = arith.constant 8 : index
    %c0_69 = arith.constant 0 : index
    %c0_70 = arith.constant 0 : index
    %63 = vector.load %arg4[%c0_68, %c8, %c0_69, %c0_70] : memref<1x49x4x8xbf16, #tpu.memory_space<vmem>>, vector<1x1x4x8xbf16>
    %64 = vector.shape_cast %63 : vector<1x1x4x8xbf16> to vector<4x8xbf16>
    %cst_71 = arith.constant dense<0.000000e+00> : vector<112x8xf32>
    %65 = tpu.matmul %62, %64, %cst_71 {dimension_numbers = #tpu.dot_dimension_numbers<[1], [0], [0], [1], [0, 0, 1, 1], [], []>} : vector<112x4xbf16>, vector<4x8xbf16>, vector<112x8xf32> -> vector<112x8xf32>
    %66 = arith.addf %59, %65 : vector<112x8xf32>
    %c0_72 = arith.constant 0 : index
    %c0_73 = arith.constant 0 : index
    %c16 = arith.constant 16 : index
    %c0_74 = arith.constant 0 : index
    %67 = vector.load %arg3[%c0_72, %c0_73, %c16, %c0_74] : memref<1x1x202x4xf32, #tpu.memory_space<vmem>>, vector<1x1x112x4xf32>
    %68 = vector.shape_cast %67 : vector<1x1x112x4xf32> to vector<112x4xf32>
    %69 = arith.truncf %68 : vector<112x4xf32> to vector<112x4xbf16>
    %c0_75 = arith.constant 0 : index
    %c9 = arith.constant 9 : index
    %c0_76 = arith.constant 0 : index
    %c0_77 = arith.constant 0 : index
    %70 = vector.load %arg4[%c0_75, %c9, %c0_76, %c0_77] : memref<1x49x4x8xbf16, #tpu.memory_space<vmem>>, vector<1x1x4x8xbf16>
    %71 = vector.shape_cast %70 : vector<1x1x4x8xbf16> to vector<4x8xbf16>
    %cst_78 = arith.constant dense<0.000000e+00> : vector<112x8xf32>
    %72 = tpu.matmul %69, %71, %cst_78 {dimension_numbers = #tpu.dot_dimension_numbers<[1], [0], [0], [1], [0, 0, 1, 1], [], []>} : vector<112x4xbf16>, vector<4x8xbf16>, vector<112x8xf32> -> vector<112x8xf32>
    %73 = arith.addf %66, %72 : vector<112x8xf32>
    %c0_79 = arith.constant 0 : index
    %c0_80 = arith.constant 0 : index
    %c17 = arith.constant 17 : index
    %c0_81 = arith.constant 0 : index
    %74 = vector.load %arg3[%c0_79, %c0_80, %c17, %c0_81] : memref<1x1x202x4xf32, #tpu.memory_space<vmem>>, vector<1x1x112x4xf32>
    %75 = vector.shape_cast %74 : vector<1x1x112x4xf32> to vector<112x4xf32>
    %76 = arith.truncf %75 : vector<112x4xf32> to vector<112x4xbf16>
    %c0_82 = arith.constant 0 : index
    %c10 = arith.constant 10 : index
    %c0_83 = arith.constant 0 : index
    %c0_84 = arith.constant 0 : index
    %77 = vector.load %arg4[%c0_82, %c10, %c0_83, %c0_84] : memref<1x49x4x8xbf16, #tpu.memory_space<vmem>>, vector<1x1x4x8xbf16>
    %78 = vector.shape_cast %77 : vector<1x1x4x8xbf16> to vector<4x8xbf16>
    %cst_85 = arith.constant dense<0.000000e+00> : vector<112x8xf32>
    %79 = tpu.matmul %76, %78, %cst_85 {dimension_numbers = #tpu.dot_dimension_numbers<[1], [0], [0], [1], [0, 0, 1, 1], [], []>} : vector<112x4xbf16>, vector<4x8xbf16>, vector<112x8xf32> -> vector<112x8xf32>
    %80 = arith.addf %73, %79 : vector<112x8xf32>
    %c0_86 = arith.constant 0 : index
    %c0_87 = arith.constant 0 : index
    %c18 = arith.constant 18 : index
    %c0_88 = arith.constant 0 : index
    %81 = vector.load %arg3[%c0_86, %c0_87, %c18, %c0_88] : memref<1x1x202x4xf32, #tpu.memory_space<vmem>>, vector<1x1x112x4xf32>
    %82 = vector.shape_cast %81 : vector<1x1x112x4xf32> to vector<112x4xf32>
    %83 = arith.truncf %82 : vector<112x4xf32> to vector<112x4xbf16>
    %c0_89 = arith.constant 0 : index
    %c11 = arith.constant 11 : index
    %c0_90 = arith.constant 0 : index
    %c0_91 = arith.constant 0 : index
    %84 = vector.load %arg4[%c0_89, %c11, %c0_90, %c0_91] : memref<1x49x4x8xbf16, #tpu.memory_space<vmem>>, vector<1x1x4x8xbf16>
    %85 = vector.shape_cast %84 : vector<1x1x4x8xbf16> to vector<4x8xbf16>
    %cst_92 = arith.constant dense<0.000000e+00> : vector<112x8xf32>
    %86 = tpu.matmul %83, %85, %cst_92 {dimension_numbers = #tpu.dot_dimension_numbers<[1], [0], [0], [1], [0, 0, 1, 1], [], []>} : vector<112x4xbf16>, vector<4x8xbf16>, vector<112x8xf32> -> vector<112x8xf32>
    %87 = arith.addf %80, %86 : vector<112x8xf32>
    %c0_93 = arith.constant 0 : index
    %c0_94 = arith.constant 0 : index
    %c19 = arith.constant 19 : index
    %c0_95 = arith.constant 0 : index
    %88 = vector.load %arg3[%c0_93, %c0_94, %c19, %c0_95] : memref<1x1x202x4xf32, #tpu.memory_space<vmem>>, vector<1x1x112x4xf32>
    %89 = vector.shape_cast %88 : vector<1x1x112x4xf32> to vector<112x4xf32>
    %90 = arith.truncf %89 : vector<112x4xf32> to vector<112x4xbf16>
    %c0_96 = arith.constant 0 : index
    %c12 = arith.constant 12 : index
    %c0_97 = arith.constant 0 : index
    %c0_98 = arith.constant 0 : index
    %91 = vector.load %arg4[%c0_96, %c12, %c0_97, %c0_98] : memref<1x49x4x8xbf16, #tpu.memory_space<vmem>>, vector<1x1x4x8xbf16>
    %92 = vector.shape_cast %91 : vector<1x1x4x8xbf16> to vector<4x8xbf16>
    %cst_99 = arith.constant dense<0.000000e+00> : vector<112x8xf32>
    %93 = tpu.matmul %90, %92, %cst_99 {dimension_numbers = #tpu.dot_dimension_numbers<[1], [0], [0], [1], [0, 0, 1, 1], [], []>} : vector<112x4xbf16>, vector<4x8xbf16>, vector<112x8xf32> -> vector<112x8xf32>
    %94 = arith.addf %87, %93 : vector<112x8xf32>
    %c0_100 = arith.constant 0 : index
    %c0_101 = arith.constant 0 : index
    %c20 = arith.constant 20 : index
    %c0_102 = arith.constant 0 : index
    %95 = vector.load %arg3[%c0_100, %c0_101, %c20, %c0_102] : memref<1x1x202x4xf32, #tpu.memory_space<vmem>>, vector<1x1x112x4xf32>
    %96 = vector.shape_cast %95 : vector<1x1x112x4xf32> to vector<112x4xf32>
    %97 = arith.truncf %96 : vector<112x4xf32> to vector<112x4xbf16>
    %c0_103 = arith.constant 0 : index
    %c13 = arith.constant 13 : index
    %c0_104 = arith.constant 0 : index
    %c0_105 = arith.constant 0 : index
    %98 = vector.load %arg4[%c0_103, %c13, %c0_104, %c0_105] : memref<1x49x4x8xbf16, #tpu.memory_space<vmem>>, vector<1x1x4x8xbf16>
    %99 = vector.shape_cast %98 : vector<1x1x4x8xbf16> to vector<4x8xbf16>
    %cst_106 = arith.constant dense<0.000000e+00> : vector<112x8xf32>
    %100 = tpu.matmul %97, %99, %cst_106 {dimension_numbers = #tpu.dot_dimension_numbers<[1], [0], [0], [1], [0, 0, 1, 1], [], []>} : vector<112x4xbf16>, vector<4x8xbf16>, vector<112x8xf32> -> vector<112x8xf32>
    %101 = arith.addf %94, %100 : vector<112x8xf32>
    %c0_107 = arith.constant 0 : index
    %c0_108 = arith.constant 0 : index
    %c28 = arith.constant 28 : index
    %c0_109 = arith.constant 0 : index
    %102 = vector.load %arg3[%c0_107, %c0_108, %c28, %c0_109] : memref<1x1x202x4xf32, #tpu.memory_space<vmem>>, vector<1x1x112x4xf32>
    %103 = vector.shape_cast %102 : vector<1x1x112x4xf32> to vector<112x4xf32>
    %104 = arith.truncf %103 : vector<112x4xf32> to vector<112x4xbf16>
    %c0_110 = arith.constant 0 : index
    %c14_111 = arith.constant 14 : index
    %c0_112 = arith.constant 0 : index
    %c0_113 = arith.constant 0 : index
    %105 = vector.load %arg4[%c0_110, %c14_111, %c0_112, %c0_113] : memref<1x49x4x8xbf16, #tpu.memory_space<vmem>>, vector<1x1x4x8xbf16>
    %106 = vector.shape_cast %105 : vector<1x1x4x8xbf16> to vector<4x8xbf16>
    %cst_114 = arith.constant dense<0.000000e+00> : vector<112x8xf32>
    %107 = tpu.matmul %104, %106, %cst_114 {dimension_numbers = #tpu.dot_dimension_numbers<[1], [0], [0], [1], [0, 0, 1, 1], [], []>} : vector<112x4xbf16>, vector<4x8xbf16>, vector<112x8xf32> -> vector<112x8xf32>
    %108 = arith.addf %101, %107 : vector<112x8xf32>
    %c0_115 = arith.constant 0 : index
    %c0_116 = arith.constant 0 : index
    %c29 = arith.constant 29 : index
    %c0_117 = arith.constant 0 : index
    %109 = vector.load %arg3[%c0_115, %c0_116, %c29, %c0_117] : memref<1x1x202x4xf32, #tpu.memory_space<vmem>>, vector<1x1x112x4xf32>
    %110 = vector.shape_cast %109 : vector<1x1x112x4xf32> to vector<112x4xf32>
    %111 = arith.truncf %110 : vector<112x4xf32> to vector<112x4xbf16>
    %c0_118 = arith.constant 0 : index
    %c15_119 = arith.constant 15 : index
    %c0_120 = arith.constant 0 : index
    %c0_121 = arith.constant 0 : index
    %112 = vector.load %arg4[%c0_118, %c15_119, %c0_120, %c0_121] : memref<1x49x4x8xbf16, #tpu.memory_space<vmem>>, vector<1x1x4x8xbf16>
    %113 = vector.shape_cast %112 : vector<1x1x4x8xbf16> to vector<4x8xbf16>
    %cst_122 = arith.constant dense<0.000000e+00> : vector<112x8xf32>
    %114 = tpu.matmul %111, %113, %cst_122 {dimension_numbers = #tpu.dot_dimension_numbers<[1], [0], [0], [1], [0, 0, 1, 1], [], []>} : vector<112x4xbf16>, vector<4x8xbf16>, vector<112x8xf32> -> vector<112x8xf32>
    %115 = arith.addf %108, %114 : vector<112x8xf32>
    %c0_123 = arith.constant 0 : index
    %c0_124 = arith.constant 0 : index
    %c30 = arith.constant 30 : index
    %c0_125 = arith.constant 0 : index
    %116 = vector.load %arg3[%c0_123, %c0_124, %c30, %c0_125] : memref<1x1x202x4xf32, #tpu.memory_space<vmem>>, vector<1x1x112x4xf32>
    %117 = vector.shape_cast %116 : vector<1x1x112x4xf32> to vector<112x4xf32>
    %118 = arith.truncf %117 : vector<112x4xf32> to vector<112x4xbf16>
    %c0_126 = arith.constant 0 : index
    %c16_127 = arith.constant 16 : index
    %c0_128 = arith.constant 0 : index
    %c0_129 = arith.constant 0 : index
    %119 = vector.load %arg4[%c0_126, %c16_127, %c0_128, %c0_129] : memref<1x49x4x8xbf16, #tpu.memory_space<vmem>>, vector<1x1x4x8xbf16>
    %120 = vector.shape_cast %119 : vector<1x1x4x8xbf16> to vector<4x8xbf16>
    %cst_130 = arith.constant dense<0.000000e+00> : vector<112x8xf32>
    %121 = tpu.matmul %118, %120, %cst_130 {dimension_numbers = #tpu.dot_dimension_numbers<[1], [0], [0], [1], [0, 0, 1, 1], [], []>} : vector<112x4xbf16>, vector<4x8xbf16>, vector<112x8xf32> -> vector<112x8xf32>
    %122 = arith.addf %115, %121 : vector<112x8xf32>
    %c0_131 = arith.constant 0 : index
    %c0_132 = arith.constant 0 : index
    %c31 = arith.constant 31 : index
    %c0_133 = arith.constant 0 : index
    %123 = vector.load %arg3[%c0_131, %c0_132, %c31, %c0_133] : memref<1x1x202x4xf32, #tpu.memory_space<vmem>>, vector<1x1x112x4xf32>
    %124 = vector.shape_cast %123 : vector<1x1x112x4xf32> to vector<112x4xf32>
    %125 = arith.truncf %124 : vector<112x4xf32> to vector<112x4xbf16>
    %c0_134 = arith.constant 0 : index
    %c17_135 = arith.constant 17 : index
    %c0_136 = arith.constant 0 : index
    %c0_137 = arith.constant 0 : index
    %126 = vector.load %arg4[%c0_134, %c17_135, %c0_136, %c0_137] : memref<1x49x4x8xbf16, #tpu.memory_space<vmem>>, vector<1x1x4x8xbf16>
    %127 = vector.shape_cast %126 : vector<1x1x4x8xbf16> to vector<4x8xbf16>
    %cst_138 = arith.constant dense<0.000000e+00> : vector<112x8xf32>
    %128 = tpu.matmul %125, %127, %cst_138 {dimension_numbers = #tpu.dot_dimension_numbers<[1], [0], [0], [1], [0, 0, 1, 1], [], []>} : vector<112x4xbf16>, vector<4x8xbf16>, vector<112x8xf32> -> vector<112x8xf32>
    %129 = arith.addf %122, %128 : vector<112x8xf32>
    %c0_139 = arith.constant 0 : index
    %c0_140 = arith.constant 0 : index
    %c32 = arith.constant 32 : index
    %c0_141 = arith.constant 0 : index
    %130 = vector.load %arg3[%c0_139, %c0_140, %c32, %c0_141] : memref<1x1x202x4xf32, #tpu.memory_space<vmem>>, vector<1x1x112x4xf32>
    %131 = vector.shape_cast %130 : vector<1x1x112x4xf32> to vector<112x4xf32>
    %132 = arith.truncf %131 : vector<112x4xf32> to vector<112x4xbf16>
    %c0_142 = arith.constant 0 : index
    %c18_143 = arith.constant 18 : index
    %c0_144 = arith.constant 0 : index
    %c0_145 = arith.constant 0 : index
    %133 = vector.load %arg4[%c0_142, %c18_143, %c0_144, %c0_145] : memref<1x49x4x8xbf16, #tpu.memory_space<vmem>>, vector<1x1x4x8xbf16>
    %134 = vector.shape_cast %133 : vector<1x1x4x8xbf16> to vector<4x8xbf16>
    %cst_146 = arith.constant dense<0.000000e+00> : vector<112x8xf32>
    %135 = tpu.matmul %132, %134, %cst_146 {dimension_numbers = #tpu.dot_dimension_numbers<[1], [0], [0], [1], [0, 0, 1, 1], [], []>} : vector<112x4xbf16>, vector<4x8xbf16>, vector<112x8xf32> -> vector<112x8xf32>
    %136 = arith.addf %129, %135 : vector<112x8xf32>
    %c0_147 = arith.constant 0 : index
    %c0_148 = arith.constant 0 : index
    %c33 = arith.constant 33 : index
    %c0_149 = arith.constant 0 : index
    %137 = vector.load %arg3[%c0_147, %c0_148, %c33, %c0_149] : memref<1x1x202x4xf32, #tpu.memory_space<vmem>>, vector<1x1x112x4xf32>
    %138 = vector.shape_cast %137 : vector<1x1x112x4xf32> to vector<112x4xf32>
    %139 = arith.truncf %138 : vector<112x4xf32> to vector<112x4xbf16>
    %c0_150 = arith.constant 0 : index
    %c19_151 = arith.constant 19 : index
    %c0_152 = arith.constant 0 : index
    %c0_153 = arith.constant 0 : index
    %140 = vector.load %arg4[%c0_150, %c19_151, %c0_152, %c0_153] : memref<1x49x4x8xbf16, #tpu.memory_space<vmem>>, vector<1x1x4x8xbf16>
    %141 = vector.shape_cast %140 : vector<1x1x4x8xbf16> to vector<4x8xbf16>
    %cst_154 = arith.constant dense<0.000000e+00> : vector<112x8xf32>
    %142 = tpu.matmul %139, %141, %cst_154 {dimension_numbers = #tpu.dot_dimension_numbers<[1], [0], [0], [1], [0, 0, 1, 1], [], []>} : vector<112x4xbf16>, vector<4x8xbf16>, vector<112x8xf32> -> vector<112x8xf32>
    %143 = arith.addf %136, %142 : vector<112x8xf32>
    %c0_155 = arith.constant 0 : index
    %c0_156 = arith.constant 0 : index
    %c34 = arith.constant 34 : index
    %c0_157 = arith.constant 0 : index
    %144 = vector.load %arg3[%c0_155, %c0_156, %c34, %c0_157] : memref<1x1x202x4xf32, #tpu.memory_space<vmem>>, vector<1x1x112x4xf32>
    %145 = vector.shape_cast %144 : vector<1x1x112x4xf32> to vector<112x4xf32>
    %146 = arith.truncf %145 : vector<112x4xf32> to vector<112x4xbf16>
    %c0_158 = arith.constant 0 : index
    %c20_159 = arith.constant 20 : index
    %c0_160 = arith.constant 0 : index
    %c0_161 = arith.constant 0 : index
    %147 = vector.load %arg4[%c0_158, %c20_159, %c0_160, %c0_161] : memref<1x49x4x8xbf16, #tpu.memory_space<vmem>>, vector<1x1x4x8xbf16>
    %148 = vector.shape_cast %147 : vector<1x1x4x8xbf16> to vector<4x8xbf16>
    %cst_162 = arith.constant dense<0.000000e+00> : vector<112x8xf32>
    %149 = tpu.matmul %146, %148, %cst_162 {dimension_numbers = #tpu.dot_dimension_numbers<[1], [0], [0], [1], [0, 0, 1, 1], [], []>} : vector<112x4xbf16>, vector<4x8xbf16>, vector<112x8xf32> -> vector<112x8xf32>
    %150 = arith.addf %143, %149 : vector<112x8xf32>
    %c0_163 = arith.constant 0 : index
    %c0_164 = arith.constant 0 : index
    %c42 = arith.constant 42 : index
    %c0_165 = arith.constant 0 : index
    %151 = vector.load %arg3[%c0_163, %c0_164, %c42, %c0_165] : memref<1x1x202x4xf32, #tpu.memory_space<vmem>>, vector<1x1x112x4xf32>
    %152 = vector.shape_cast %151 : vector<1x1x112x4xf32> to vector<112x4xf32>
    %153 = arith.truncf %152 : vector<112x4xf32> to vector<112x4xbf16>
    %c0_166 = arith.constant 0 : index
    %c21 = arith.constant 21 : index
    %c0_167 = arith.constant 0 : index
    %c0_168 = arith.constant 0 : index
    %154 = vector.load %arg4[%c0_166, %c21, %c0_167, %c0_168] : memref<1x49x4x8xbf16, #tpu.memory_space<vmem>>, vector<1x1x4x8xbf16>
    %155 = vector.shape_cast %154 : vector<1x1x4x8xbf16> to vector<4x8xbf16>
    %cst_169 = arith.constant dense<0.000000e+00> : vector<112x8xf32>
    %156 = tpu.matmul %153, %155, %cst_169 {dimension_numbers = #tpu.dot_dimension_numbers<[1], [0], [0], [1], [0, 0, 1, 1], [], []>} : vector<112x4xbf16>, vector<4x8xbf16>, vector<112x8xf32> -> vector<112x8xf32>
    %157 = arith.addf %150, %156 : vector<112x8xf32>
    %c0_170 = arith.constant 0 : index
    %c0_171 = arith.constant 0 : index
    %c43 = arith.constant 43 : index
    %c0_172 = arith.constant 0 : index
    %158 = vector.load %arg3[%c0_170, %c0_171, %c43, %c0_172] : memref<1x1x202x4xf32, #tpu.memory_space<vmem>>, vector<1x1x112x4xf32>
    %159 = vector.shape_cast %158 : vector<1x1x112x4xf32> to vector<112x4xf32>
    %160 = arith.truncf %159 : vector<112x4xf32> to vector<112x4xbf16>
    %c0_173 = arith.constant 0 : index
    %c22 = arith.constant 22 : index
    %c0_174 = arith.constant 0 : index
    %c0_175 = arith.constant 0 : index
    %161 = vector.load %arg4[%c0_173, %c22, %c0_174, %c0_175] : memref<1x49x4x8xbf16, #tpu.memory_space<vmem>>, vector<1x1x4x8xbf16>
    %162 = vector.shape_cast %161 : vector<1x1x4x8xbf16> to vector<4x8xbf16>
    %cst_176 = arith.constant dense<0.000000e+00> : vector<112x8xf32>
    %163 = tpu.matmul %160, %162, %cst_176 {dimension_numbers = #tpu.dot_dimension_numbers<[1], [0], [0], [1], [0, 0, 1, 1], [], []>} : vector<112x4xbf16>, vector<4x8xbf16>, vector<112x8xf32> -> vector<112x8xf32>
    %164 = arith.addf %157, %163 : vector<112x8xf32>
    %c0_177 = arith.constant 0 : index
    %c0_178 = arith.constant 0 : index
    %c44 = arith.constant 44 : index
    %c0_179 = arith.constant 0 : index
    %165 = vector.load %arg3[%c0_177, %c0_178, %c44, %c0_179] : memref<1x1x202x4xf32, #tpu.memory_space<vmem>>, vector<1x1x112x4xf32>
    %166 = vector.shape_cast %165 : vector<1x1x112x4xf32> to vector<112x4xf32>
    %167 = arith.truncf %166 : vector<112x4xf32> to vector<112x4xbf16>
    %c0_180 = arith.constant 0 : index
    %c23 = arith.constant 23 : index
    %c0_181 = arith.constant 0 : index
    %c0_182 = arith.constant 0 : index
    %168 = vector.load %arg4[%c0_180, %c23, %c0_181, %c0_182] : memref<1x49x4x8xbf16, #tpu.memory_space<vmem>>, vector<1x1x4x8xbf16>
    %169 = vector.shape_cast %168 : vector<1x1x4x8xbf16> to vector<4x8xbf16>
    %cst_183 = arith.constant dense<0.000000e+00> : vector<112x8xf32>
    %170 = tpu.matmul %167, %169, %cst_183 {dimension_numbers = #tpu.dot_dimension_numbers<[1], [0], [0], [1], [0, 0, 1, 1], [], []>} : vector<112x4xbf16>, vector<4x8xbf16>, vector<112x8xf32> -> vector<112x8xf32>
    %171 = arith.addf %164, %170 : vector<112x8xf32>
    %c0_184 = arith.constant 0 : index
    %c0_185 = arith.constant 0 : index
    %c45 = arith.constant 45 : index
    %c0_186 = arith.constant 0 : index
    %172 = vector.load %arg3[%c0_184, %c0_185, %c45, %c0_186] : memref<1x1x202x4xf32, #tpu.memory_space<vmem>>, vector<1x1x112x4xf32>
    %173 = vector.shape_cast %172 : vector<1x1x112x4xf32> to vector<112x4xf32>
    %174 = arith.truncf %173 : vector<112x4xf32> to vector<112x4xbf16>
    %c0_187 = arith.constant 0 : index
    %c24 = arith.constant 24 : index
    %c0_188 = arith.constant 0 : index
    %c0_189 = arith.constant 0 : index
    %175 = vector.load %arg4[%c0_187, %c24, %c0_188, %c0_189] : memref<1x49x4x8xbf16, #tpu.memory_space<vmem>>, vector<1x1x4x8xbf16>
    %176 = vector.shape_cast %175 : vector<1x1x4x8xbf16> to vector<4x8xbf16>
    %cst_190 = arith.constant dense<0.000000e+00> : vector<112x8xf32>
    %177 = tpu.matmul %174, %176, %cst_190 {dimension_numbers = #tpu.dot_dimension_numbers<[1], [0], [0], [1], [0, 0, 1, 1], [], []>} : vector<112x4xbf16>, vector<4x8xbf16>, vector<112x8xf32> -> vector<112x8xf32>
    %178 = arith.addf %171, %177 : vector<112x8xf32>
    %c0_191 = arith.constant 0 : index
    %c0_192 = arith.constant 0 : index
    %c46 = arith.constant 46 : index
    %c0_193 = arith.constant 0 : index
    %179 = vector.load %arg3[%c0_191, %c0_192, %c46, %c0_193] : memref<1x1x202x4xf32, #tpu.memory_space<vmem>>, vector<1x1x112x4xf32>
    %180 = vector.shape_cast %179 : vector<1x1x112x4xf32> to vector<112x4xf32>
    %181 = arith.truncf %180 : vector<112x4xf32> to vector<112x4xbf16>
    %c0_194 = arith.constant 0 : index
    %c25 = arith.constant 25 : index
    %c0_195 = arith.constant 0 : index
    %c0_196 = arith.constant 0 : index
    %182 = vector.load %arg4[%c0_194, %c25, %c0_195, %c0_196] : memref<1x49x4x8xbf16, #tpu.memory_space<vmem>>, vector<1x1x4x8xbf16>
    %183 = vector.shape_cast %182 : vector<1x1x4x8xbf16> to vector<4x8xbf16>
    %cst_197 = arith.constant dense<0.000000e+00> : vector<112x8xf32>
    %184 = tpu.matmul %181, %183, %cst_197 {dimension_numbers = #tpu.dot_dimension_numbers<[1], [0], [0], [1], [0, 0, 1, 1], [], []>} : vector<112x4xbf16>, vector<4x8xbf16>, vector<112x8xf32> -> vector<112x8xf32>
    %185 = arith.addf %178, %184 : vector<112x8xf32>
    %c0_198 = arith.constant 0 : index
    %c0_199 = arith.constant 0 : index
    %c47 = arith.constant 47 : index
    %c0_200 = arith.constant 0 : index
    %186 = vector.load %arg3[%c0_198, %c0_199, %c47, %c0_200] : memref<1x1x202x4xf32, #tpu.memory_space<vmem>>, vector<1x1x112x4xf32>
    %187 = vector.shape_cast %186 : vector<1x1x112x4xf32> to vector<112x4xf32>
    %188 = arith.truncf %187 : vector<112x4xf32> to vector<112x4xbf16>
    %c0_201 = arith.constant 0 : index
    %c26 = arith.constant 26 : index
    %c0_202 = arith.constant 0 : index
    %c0_203 = arith.constant 0 : index
    %189 = vector.load %arg4[%c0_201, %c26, %c0_202, %c0_203] : memref<1x49x4x8xbf16, #tpu.memory_space<vmem>>, vector<1x1x4x8xbf16>
    %190 = vector.shape_cast %189 : vector<1x1x4x8xbf16> to vector<4x8xbf16>
    %cst_204 = arith.constant dense<0.000000e+00> : vector<112x8xf32>
    %191 = tpu.matmul %188, %190, %cst_204 {dimension_numbers = #tpu.dot_dimension_numbers<[1], [0], [0], [1], [0, 0, 1, 1], [], []>} : vector<112x4xbf16>, vector<4x8xbf16>, vector<112x8xf32> -> vector<112x8xf32>
    %192 = arith.addf %185, %191 : vector<112x8xf32>
    %c0_205 = arith.constant 0 : index
    %c0_206 = arith.constant 0 : index
    %c48 = arith.constant 48 : index
    %c0_207 = arith.constant 0 : index
    %193 = vector.load %arg3[%c0_205, %c0_206, %c48, %c0_207] : memref<1x1x202x4xf32, #tpu.memory_space<vmem>>, vector<1x1x112x4xf32>
    %194 = vector.shape_cast %193 : vector<1x1x112x4xf32> to vector<112x4xf32>
    %195 = arith.truncf %194 : vector<112x4xf32> to vector<112x4xbf16>
    %c0_208 = arith.constant 0 : index
    %c27 = arith.constant 27 : index
    %c0_209 = arith.constant 0 : index
    %c0_210 = arith.constant 0 : index
    %196 = vector.load %arg4[%c0_208, %c27, %c0_209, %c0_210] : memref<1x49x4x8xbf16, #tpu.memory_space<vmem>>, vector<1x1x4x8xbf16>
    %197 = vector.shape_cast %196 : vector<1x1x4x8xbf16> to vector<4x8xbf16>
    %cst_211 = arith.constant dense<0.000000e+00> : vector<112x8xf32>
    %198 = tpu.matmul %195, %197, %cst_211 {dimension_numbers = #tpu.dot_dimension_numbers<[1], [0], [0], [1], [0, 0, 1, 1], [], []>} : vector<112x4xbf16>, vector<4x8xbf16>, vector<112x8xf32> -> vector<112x8xf32>
    %199 = arith.addf %192, %198 : vector<112x8xf32>
    %c0_212 = arith.constant 0 : index
    %c0_213 = arith.constant 0 : index
    %c56 = arith.constant 56 : index
    %c0_214 = arith.constant 0 : index
    %200 = vector.load %arg3[%c0_212, %c0_213, %c56, %c0_214] : memref<1x1x202x4xf32, #tpu.memory_space<vmem>>, vector<1x1x112x4xf32>
    %201 = vector.shape_cast %200 : vector<1x1x112x4xf32> to vector<112x4xf32>
    %202 = arith.truncf %201 : vector<112x4xf32> to vector<112x4xbf16>
    %c0_215 = arith.constant 0 : index
    %c28_216 = arith.constant 28 : index
    %c0_217 = arith.constant 0 : index
    %c0_218 = arith.constant 0 : index
    %203 = vector.load %arg4[%c0_215, %c28_216, %c0_217, %c0_218] : memref<1x49x4x8xbf16, #tpu.memory_space<vmem>>, vector<1x1x4x8xbf16>
    %204 = vector.shape_cast %203 : vector<1x1x4x8xbf16> to vector<4x8xbf16>
    %cst_219 = arith.constant dense<0.000000e+00> : vector<112x8xf32>
    %205 = tpu.matmul %202, %204, %cst_219 {dimension_numbers = #tpu.dot_dimension_numbers<[1], [0], [0], [1], [0, 0, 1, 1], [], []>} : vector<112x4xbf16>, vector<4x8xbf16>, vector<112x8xf32> -> vector<112x8xf32>
    %206 = arith.addf %199, %205 : vector<112x8xf32>
    %c0_220 = arith.constant 0 : index
    %c0_221 = arith.constant 0 : index
    %c57 = arith.constant 57 : index
    %c0_222 = arith.constant 0 : index
    %207 = vector.load %arg3[%c0_220, %c0_221, %c57, %c0_222] : memref<1x1x202x4xf32, #tpu.memory_space<vmem>>, vector<1x1x112x4xf32>
    %208 = vector.shape_cast %207 : vector<1x1x112x4xf32> to vector<112x4xf32>
    %209 = arith.truncf %208 : vector<112x4xf32> to vector<112x4xbf16>
    %c0_223 = arith.constant 0 : index
    %c29_224 = arith.constant 29 : index
    %c0_225 = arith.constant 0 : index
    %c0_226 = arith.constant 0 : index
    %210 = vector.load %arg4[%c0_223, %c29_224, %c0_225, %c0_226] : memref<1x49x4x8xbf16, #tpu.memory_space<vmem>>, vector<1x1x4x8xbf16>
    %211 = vector.shape_cast %210 : vector<1x1x4x8xbf16> to vector<4x8xbf16>
    %cst_227 = arith.constant dense<0.000000e+00> : vector<112x8xf32>
    %212 = tpu.matmul %209, %211, %cst_227 {dimension_numbers = #tpu.dot_dimension_numbers<[1], [0], [0], [1], [0, 0, 1, 1], [], []>} : vector<112x4xbf16>, vector<4x8xbf16>, vector<112x8xf32> -> vector<112x8xf32>
    %213 = arith.addf %206, %212 : vector<112x8xf32>
    %c0_228 = arith.constant 0 : index
    %c0_229 = arith.constant 0 : index
    %c58 = arith.constant 58 : index
    %c0_230 = arith.constant 0 : index
    %214 = vector.load %arg3[%c0_228, %c0_229, %c58, %c0_230] : memref<1x1x202x4xf32, #tpu.memory_space<vmem>>, vector<1x1x112x4xf32>
    %215 = vector.shape_cast %214 : vector<1x1x112x4xf32> to vector<112x4xf32>
    %216 = arith.truncf %215 : vector<112x4xf32> to vector<112x4xbf16>
    %c0_231 = arith.constant 0 : index
    %c30_232 = arith.constant 30 : index
    %c0_233 = arith.constant 0 : index
    %c0_234 = arith.constant 0 : index
    %217 = vector.load %arg4[%c0_231, %c30_232, %c0_233, %c0_234] : memref<1x49x4x8xbf16, #tpu.memory_space<vmem>>, vector<1x1x4x8xbf16>
    %218 = vector.shape_cast %217 : vector<1x1x4x8xbf16> to vector<4x8xbf16>
    %cst_235 = arith.constant dense<0.000000e+00> : vector<112x8xf32>
    %219 = tpu.matmul %216, %218, %cst_235 {dimension_numbers = #tpu.dot_dimension_numbers<[1], [0], [0], [1], [0, 0, 1, 1], [], []>} : vector<112x4xbf16>, vector<4x8xbf16>, vector<112x8xf32> -> vector<112x8xf32>
    %220 = arith.addf %213, %219 : vector<112x8xf32>
    %c0_236 = arith.constant 0 : index
    %c0_237 = arith.constant 0 : index
    %c59 = arith.constant 59 : index
    %c0_238 = arith.constant 0 : index
    %221 = vector.load %arg3[%c0_236, %c0_237, %c59, %c0_238] : memref<1x1x202x4xf32, #tpu.memory_space<vmem>>, vector<1x1x112x4xf32>
    %222 = vector.shape_cast %221 : vector<1x1x112x4xf32> to vector<112x4xf32>
    %223 = arith.truncf %222 : vector<112x4xf32> to vector<112x4xbf16>
    %c0_239 = arith.constant 0 : index
    %c31_240 = arith.constant 31 : index
    %c0_241 = arith.constant 0 : index
    %c0_242 = arith.constant 0 : index
    %224 = vector.load %arg4[%c0_239, %c31_240, %c0_241, %c0_242] : memref<1x49x4x8xbf16, #tpu.memory_space<vmem>>, vector<1x1x4x8xbf16>
    %225 = vector.shape_cast %224 : vector<1x1x4x8xbf16> to vector<4x8xbf16>
    %cst_243 = arith.constant dense<0.000000e+00> : vector<112x8xf32>
    %226 = tpu.matmul %223, %225, %cst_243 {dimension_numbers = #tpu.dot_dimension_numbers<[1], [0], [0], [1], [0, 0, 1, 1], [], []>} : vector<112x4xbf16>, vector<4x8xbf16>, vector<112x8xf32> -> vector<112x8xf32>
    %227 = arith.addf %220, %226 : vector<112x8xf32>
    %c0_244 = arith.constant 0 : index
    %c0_245 = arith.constant 0 : index
    %c60 = arith.constant 60 : index
    %c0_246 = arith.constant 0 : index
    %228 = vector.load %arg3[%c0_244, %c0_245, %c60, %c0_246] : memref<1x1x202x4xf32, #tpu.memory_space<vmem>>, vector<1x1x112x4xf32>
    %229 = vector.shape_cast %228 : vector<1x1x112x4xf32> to vector<112x4xf32>
    %230 = arith.truncf %229 : vector<112x4xf32> to vector<112x4xbf16>
    %c0_247 = arith.constant 0 : index
    %c32_248 = arith.constant 32 : index
    %c0_249 = arith.constant 0 : index
    %c0_250 = arith.constant 0 : index
    %231 = vector.load %arg4[%c0_247, %c32_248, %c0_249, %c0_250] : memref<1x49x4x8xbf16, #tpu.memory_space<vmem>>, vector<1x1x4x8xbf16>
    %232 = vector.shape_cast %231 : vector<1x1x4x8xbf16> to vector<4x8xbf16>
    %cst_251 = arith.constant dense<0.000000e+00> : vector<112x8xf32>
    %233 = tpu.matmul %230, %232, %cst_251 {dimension_numbers = #tpu.dot_dimension_numbers<[1], [0], [0], [1], [0, 0, 1, 1], [], []>} : vector<112x4xbf16>, vector<4x8xbf16>, vector<112x8xf32> -> vector<112x8xf32>
    %234 = arith.addf %227, %233 : vector<112x8xf32>
    %c0_252 = arith.constant 0 : index
    %c0_253 = arith.constant 0 : index
    %c61 = arith.constant 61 : index
    %c0_254 = arith.constant 0 : index
    %235 = vector.load %arg3[%c0_252, %c0_253, %c61, %c0_254] : memref<1x1x202x4xf32, #tpu.memory_space<vmem>>, vector<1x1x112x4xf32>
    %236 = vector.shape_cast %235 : vector<1x1x112x4xf32> to vector<112x4xf32>
    %237 = arith.truncf %236 : vector<112x4xf32> to vector<112x4xbf16>
    %c0_255 = arith.constant 0 : index
    %c33_256 = arith.constant 33 : index
    %c0_257 = arith.constant 0 : index
    %c0_258 = arith.constant 0 : index
    %238 = vector.load %arg4[%c0_255, %c33_256, %c0_257, %c0_258] : memref<1x49x4x8xbf16, #tpu.memory_space<vmem>>, vector<1x1x4x8xbf16>
    %239 = vector.shape_cast %238 : vector<1x1x4x8xbf16> to vector<4x8xbf16>
    %cst_259 = arith.constant dense<0.000000e+00> : vector<112x8xf32>
    %240 = tpu.matmul %237, %239, %cst_259 {dimension_numbers = #tpu.dot_dimension_numbers<[1], [0], [0], [1], [0, 0, 1, 1], [], []>} : vector<112x4xbf16>, vector<4x8xbf16>, vector<112x8xf32> -> vector<112x8xf32>
    %241 = arith.addf %234, %240 : vector<112x8xf32>
    %c0_260 = arith.constant 0 : index
    %c0_261 = arith.constant 0 : index
    %c62 = arith.constant 62 : index
    %c0_262 = arith.constant 0 : index
    %242 = vector.load %arg3[%c0_260, %c0_261, %c62, %c0_262] : memref<1x1x202x4xf32, #tpu.memory_space<vmem>>, vector<1x1x112x4xf32>
    %243 = vector.shape_cast %242 : vector<1x1x112x4xf32> to vector<112x4xf32>
    %244 = arith.truncf %243 : vector<112x4xf32> to vector<112x4xbf16>
    %c0_263 = arith.constant 0 : index
    %c34_264 = arith.constant 34 : index
    %c0_265 = arith.constant 0 : index
    %c0_266 = arith.constant 0 : index
    %245 = vector.load %arg4[%c0_263, %c34_264, %c0_265, %c0_266] : memref<1x49x4x8xbf16, #tpu.memory_space<vmem>>, vector<1x1x4x8xbf16>
    %246 = vector.shape_cast %245 : vector<1x1x4x8xbf16> to vector<4x8xbf16>
    %cst_267 = arith.constant dense<0.000000e+00> : vector<112x8xf32>
    %247 = tpu.matmul %244, %246, %cst_267 {dimension_numbers = #tpu.dot_dimension_numbers<[1], [0], [0], [1], [0, 0, 1, 1], [], []>} : vector<112x4xbf16>, vector<4x8xbf16>, vector<112x8xf32> -> vector<112x8xf32>
    %248 = arith.addf %241, %247 : vector<112x8xf32>
    %c0_268 = arith.constant 0 : index
    %c0_269 = arith.constant 0 : index
    %c70 = arith.constant 70 : index
    %c0_270 = arith.constant 0 : index
    %249 = vector.load %arg3[%c0_268, %c0_269, %c70, %c0_270] : memref<1x1x202x4xf32, #tpu.memory_space<vmem>>, vector<1x1x112x4xf32>
    %250 = vector.shape_cast %249 : vector<1x1x112x4xf32> to vector<112x4xf32>
    %251 = arith.truncf %250 : vector<112x4xf32> to vector<112x4xbf16>
    %c0_271 = arith.constant 0 : index
    %c35 = arith.constant 35 : index
    %c0_272 = arith.constant 0 : index
    %c0_273 = arith.constant 0 : index
    %252 = vector.load %arg4[%c0_271, %c35, %c0_272, %c0_273] : memref<1x49x4x8xbf16, #tpu.memory_space<vmem>>, vector<1x1x4x8xbf16>
    %253 = vector.shape_cast %252 : vector<1x1x4x8xbf16> to vector<4x8xbf16>
    %cst_274 = arith.constant dense<0.000000e+00> : vector<112x8xf32>
    %254 = tpu.matmul %251, %253, %cst_274 {dimension_numbers = #tpu.dot_dimension_numbers<[1], [0], [0], [1], [0, 0, 1, 1], [], []>} : vector<112x4xbf16>, vector<4x8xbf16>, vector<112x8xf32> -> vector<112x8xf32>
    %255 = arith.addf %248, %254 : vector<112x8xf32>
    %c0_275 = arith.constant 0 : index
    %c0_276 = arith.constant 0 : index
    %c71 = arith.constant 71 : index
    %c0_277 = arith.constant 0 : index
    %256 = vector.load %arg3[%c0_275, %c0_276, %c71, %c0_277] : memref<1x1x202x4xf32, #tpu.memory_space<vmem>>, vector<1x1x112x4xf32>
    %257 = vector.shape_cast %256 : vector<1x1x112x4xf32> to vector<112x4xf32>
    %258 = arith.truncf %257 : vector<112x4xf32> to vector<112x4xbf16>
    %c0_278 = arith.constant 0 : index
    %c36 = arith.constant 36 : index
    %c0_279 = arith.constant 0 : index
    %c0_280 = arith.constant 0 : index
    %259 = vector.load %arg4[%c0_278, %c36, %c0_279, %c0_280] : memref<1x49x4x8xbf16, #tpu.memory_space<vmem>>, vector<1x1x4x8xbf16>
    %260 = vector.shape_cast %259 : vector<1x1x4x8xbf16> to vector<4x8xbf16>
    %cst_281 = arith.constant dense<0.000000e+00> : vector<112x8xf32>
    %261 = tpu.matmul %258, %260, %cst_281 {dimension_numbers = #tpu.dot_dimension_numbers<[1], [0], [0], [1], [0, 0, 1, 1], [], []>} : vector<112x4xbf16>, vector<4x8xbf16>, vector<112x8xf32> -> vector<112x8xf32>
    %262 = arith.addf %255, %261 : vector<112x8xf32>
    %c0_282 = arith.constant 0 : index
    %c0_283 = arith.constant 0 : index
    %c72 = arith.constant 72 : index
    %c0_284 = arith.constant 0 : index
    %263 = vector.load %arg3[%c0_282, %c0_283, %c72, %c0_284] : memref<1x1x202x4xf32, #tpu.memory_space<vmem>>, vector<1x1x112x4xf32>
    %264 = vector.shape_cast %263 : vector<1x1x112x4xf32> to vector<112x4xf32>
    %265 = arith.truncf %264 : vector<112x4xf32> to vector<112x4xbf16>
    %c0_285 = arith.constant 0 : index
    %c37 = arith.constant 37 : index
    %c0_286 = arith.constant 0 : index
    %c0_287 = arith.constant 0 : index
    %266 = vector.load %arg4[%c0_285, %c37, %c0_286, %c0_287] : memref<1x49x4x8xbf16, #tpu.memory_space<vmem>>, vector<1x1x4x8xbf16>
    %267 = vector.shape_cast %266 : vector<1x1x4x8xbf16> to vector<4x8xbf16>
    %cst_288 = arith.constant dense<0.000000e+00> : vector<112x8xf32>
    %268 = tpu.matmul %265, %267, %cst_288 {dimension_numbers = #tpu.dot_dimension_numbers<[1], [0], [0], [1], [0, 0, 1, 1], [], []>} : vector<112x4xbf16>, vector<4x8xbf16>, vector<112x8xf32> -> vector<112x8xf32>
    %269 = arith.addf %262, %268 : vector<112x8xf32>
    %c0_289 = arith.constant 0 : index
    %c0_290 = arith.constant 0 : index
    %c73 = arith.constant 73 : index
    %c0_291 = arith.constant 0 : index
    %270 = vector.load %arg3[%c0_289, %c0_290, %c73, %c0_291] : memref<1x1x202x4xf32, #tpu.memory_space<vmem>>, vector<1x1x112x4xf32>
    %271 = vector.shape_cast %270 : vector<1x1x112x4xf32> to vector<112x4xf32>
    %272 = arith.truncf %271 : vector<112x4xf32> to vector<112x4xbf16>
    %c0_292 = arith.constant 0 : index
    %c38 = arith.constant 38 : index
    %c0_293 = arith.constant 0 : index
    %c0_294 = arith.constant 0 : index
    %273 = vector.load %arg4[%c0_292, %c38, %c0_293, %c0_294] : memref<1x49x4x8xbf16, #tpu.memory_space<vmem>>, vector<1x1x4x8xbf16>
    %274 = vector.shape_cast %273 : vector<1x1x4x8xbf16> to vector<4x8xbf16>
    %cst_295 = arith.constant dense<0.000000e+00> : vector<112x8xf32>
    %275 = tpu.matmul %272, %274, %cst_295 {dimension_numbers = #tpu.dot_dimension_numbers<[1], [0], [0], [1], [0, 0, 1, 1], [], []>} : vector<112x4xbf16>, vector<4x8xbf16>, vector<112x8xf32> -> vector<112x8xf32>
    %276 = arith.addf %269, %275 : vector<112x8xf32>
    %c0_296 = arith.constant 0 : index
    %c0_297 = arith.constant 0 : index
    %c74 = arith.constant 74 : index
    %c0_298 = arith.constant 0 : index
    %277 = vector.load %arg3[%c0_296, %c0_297, %c74, %c0_298] : memref<1x1x202x4xf32, #tpu.memory_space<vmem>>, vector<1x1x112x4xf32>
    %278 = vector.shape_cast %277 : vector<1x1x112x4xf32> to vector<112x4xf32>
    %279 = arith.truncf %278 : vector<112x4xf32> to vector<112x4xbf16>
    %c0_299 = arith.constant 0 : index
    %c39 = arith.constant 39 : index
    %c0_300 = arith.constant 0 : index
    %c0_301 = arith.constant 0 : index
    %280 = vector.load %arg4[%c0_299, %c39, %c0_300, %c0_301] : memref<1x49x4x8xbf16, #tpu.memory_space<vmem>>, vector<1x1x4x8xbf16>
    %281 = vector.shape_cast %280 : vector<1x1x4x8xbf16> to vector<4x8xbf16>
    %cst_302 = arith.constant dense<0.000000e+00> : vector<112x8xf32>
    %282 = tpu.matmul %279, %281, %cst_302 {dimension_numbers = #tpu.dot_dimension_numbers<[1], [0], [0], [1], [0, 0, 1, 1], [], []>} : vector<112x4xbf16>, vector<4x8xbf16>, vector<112x8xf32> -> vector<112x8xf32>
    %283 = arith.addf %276, %282 : vector<112x8xf32>
    %c0_303 = arith.constant 0 : index
    %c0_304 = arith.constant 0 : index
    %c75 = arith.constant 75 : index
    %c0_305 = arith.constant 0 : index
    %284 = vector.load %arg3[%c0_303, %c0_304, %c75, %c0_305] : memref<1x1x202x4xf32, #tpu.memory_space<vmem>>, vector<1x1x112x4xf32>
    %285 = vector.shape_cast %284 : vector<1x1x112x4xf32> to vector<112x4xf32>
    %286 = arith.truncf %285 : vector<112x4xf32> to vector<112x4xbf16>
    %c0_306 = arith.constant 0 : index
    %c40 = arith.constant 40 : index
    %c0_307 = arith.constant 0 : index
    %c0_308 = arith.constant 0 : index
    %287 = vector.load %arg4[%c0_306, %c40, %c0_307, %c0_308] : memref<1x49x4x8xbf16, #tpu.memory_space<vmem>>, vector<1x1x4x8xbf16>
    %288 = vector.shape_cast %287 : vector<1x1x4x8xbf16> to vector<4x8xbf16>
    %cst_309 = arith.constant dense<0.000000e+00> : vector<112x8xf32>
    %289 = tpu.matmul %286, %288, %cst_309 {dimension_numbers = #tpu.dot_dimension_numbers<[1], [0], [0], [1], [0, 0, 1, 1], [], []>} : vector<112x4xbf16>, vector<4x8xbf16>, vector<112x8xf32> -> vector<112x8xf32>
    %290 = arith.addf %283, %289 : vector<112x8xf32>
    %c0_310 = arith.constant 0 : index
    %c0_311 = arith.constant 0 : index
    %c76 = arith.constant 76 : index
    %c0_312 = arith.constant 0 : index
    %291 = vector.load %arg3[%c0_310, %c0_311, %c76, %c0_312] : memref<1x1x202x4xf32, #tpu.memory_space<vmem>>, vector<1x1x112x4xf32>
    %292 = vector.shape_cast %291 : vector<1x1x112x4xf32> to vector<112x4xf32>
    %293 = arith.truncf %292 : vector<112x4xf32> to vector<112x4xbf16>
    %c0_313 = arith.constant 0 : index
    %c41 = arith.constant 41 : index
    %c0_314 = arith.constant 0 : index
    %c0_315 = arith.constant 0 : index
    %294 = vector.load %arg4[%c0_313, %c41, %c0_314, %c0_315] : memref<1x49x4x8xbf16, #tpu.memory_space<vmem>>, vector<1x1x4x8xbf16>
    %295 = vector.shape_cast %294 : vector<1x1x4x8xbf16> to vector<4x8xbf16>
    %cst_316 = arith.constant dense<0.000000e+00> : vector<112x8xf32>
    %296 = tpu.matmul %293, %295, %cst_316 {dimension_numbers = #tpu.dot_dimension_numbers<[1], [0], [0], [1], [0, 0, 1, 1], [], []>} : vector<112x4xbf16>, vector<4x8xbf16>, vector<112x8xf32> -> vector<112x8xf32>
    %297 = arith.addf %290, %296 : vector<112x8xf32>
    %c0_317 = arith.constant 0 : index
    %c0_318 = arith.constant 0 : index
    %c84 = arith.constant 84 : index
    %c0_319 = arith.constant 0 : index
    %298 = vector.load %arg3[%c0_317, %c0_318, %c84, %c0_319] : memref<1x1x202x4xf32, #tpu.memory_space<vmem>>, vector<1x1x112x4xf32>
    %299 = vector.shape_cast %298 : vector<1x1x112x4xf32> to vector<112x4xf32>
    %300 = arith.truncf %299 : vector<112x4xf32> to vector<112x4xbf16>
    %c0_320 = arith.constant 0 : index
    %c42_321 = arith.constant 42 : index
    %c0_322 = arith.constant 0 : index
    %c0_323 = arith.constant 0 : index
    %301 = vector.load %arg4[%c0_320, %c42_321, %c0_322, %c0_323] : memref<1x49x4x8xbf16, #tpu.memory_space<vmem>>, vector<1x1x4x8xbf16>
    %302 = vector.shape_cast %301 : vector<1x1x4x8xbf16> to vector<4x8xbf16>
    %cst_324 = arith.constant dense<0.000000e+00> : vector<112x8xf32>
    %303 = tpu.matmul %300, %302, %cst_324 {dimension_numbers = #tpu.dot_dimension_numbers<[1], [0], [0], [1], [0, 0, 1, 1], [], []>} : vector<112x4xbf16>, vector<4x8xbf16>, vector<112x8xf32> -> vector<112x8xf32>
    %304 = arith.addf %297, %303 : vector<112x8xf32>
    %c0_325 = arith.constant 0 : index
    %c0_326 = arith.constant 0 : index
    %c85 = arith.constant 85 : index
    %c0_327 = arith.constant 0 : index
    %305 = vector.load %arg3[%c0_325, %c0_326, %c85, %c0_327] : memref<1x1x202x4xf32, #tpu.memory_space<vmem>>, vector<1x1x112x4xf32>
    %306 = vector.shape_cast %305 : vector<1x1x112x4xf32> to vector<112x4xf32>
    %307 = arith.truncf %306 : vector<112x4xf32> to vector<112x4xbf16>
    %c0_328 = arith.constant 0 : index
    %c43_329 = arith.constant 43 : index
    %c0_330 = arith.constant 0 : index
    %c0_331 = arith.constant 0 : index
    %308 = vector.load %arg4[%c0_328, %c43_329, %c0_330, %c0_331] : memref<1x49x4x8xbf16, #tpu.memory_space<vmem>>, vector<1x1x4x8xbf16>
    %309 = vector.shape_cast %308 : vector<1x1x4x8xbf16> to vector<4x8xbf16>
    %cst_332 = arith.constant dense<0.000000e+00> : vector<112x8xf32>
    %310 = tpu.matmul %307, %309, %cst_332 {dimension_numbers = #tpu.dot_dimension_numbers<[1], [0], [0], [1], [0, 0, 1, 1], [], []>} : vector<112x4xbf16>, vector<4x8xbf16>, vector<112x8xf32> -> vector<112x8xf32>
    %311 = arith.addf %304, %310 : vector<112x8xf32>
    %c0_333 = arith.constant 0 : index
    %c0_334 = arith.constant 0 : index
    %c86 = arith.constant 86 : index
    %c0_335 = arith.constant 0 : index
    %312 = vector.load %arg3[%c0_333, %c0_334, %c86, %c0_335] : memref<1x1x202x4xf32, #tpu.memory_space<vmem>>, vector<1x1x112x4xf32>
    %313 = vector.shape_cast %312 : vector<1x1x112x4xf32> to vector<112x4xf32>
    %314 = arith.truncf %313 : vector<112x4xf32> to vector<112x4xbf16>
    %c0_336 = arith.constant 0 : index
    %c44_337 = arith.constant 44 : index
    %c0_338 = arith.constant 0 : index
    %c0_339 = arith.constant 0 : index
    %315 = vector.load %arg4[%c0_336, %c44_337, %c0_338, %c0_339] : memref<1x49x4x8xbf16, #tpu.memory_space<vmem>>, vector<1x1x4x8xbf16>
    %316 = vector.shape_cast %315 : vector<1x1x4x8xbf16> to vector<4x8xbf16>
    %cst_340 = arith.constant dense<0.000000e+00> : vector<112x8xf32>
    %317 = tpu.matmul %314, %316, %cst_340 {dimension_numbers = #tpu.dot_dimension_numbers<[1], [0], [0], [1], [0, 0, 1, 1], [], []>} : vector<112x4xbf16>, vector<4x8xbf16>, vector<112x8xf32> -> vector<112x8xf32>
    %318 = arith.addf %311, %317 : vector<112x8xf32>
    %c0_341 = arith.constant 0 : index
    %c0_342 = arith.constant 0 : index
    %c87 = arith.constant 87 : index
    %c0_343 = arith.constant 0 : index
    %319 = vector.load %arg3[%c0_341, %c0_342, %c87, %c0_343] : memref<1x1x202x4xf32, #tpu.memory_space<vmem>>, vector<1x1x112x4xf32>
    %320 = vector.shape_cast %319 : vector<1x1x112x4xf32> to vector<112x4xf32>
    %321 = arith.truncf %320 : vector<112x4xf32> to vector<112x4xbf16>
    %c0_344 = arith.constant 0 : index
    %c45_345 = arith.constant 45 : index
    %c0_346 = arith.constant 0 : index
    %c0_347 = arith.constant 0 : index
    %322 = vector.load %arg4[%c0_344, %c45_345, %c0_346, %c0_347] : memref<1x49x4x8xbf16, #tpu.memory_space<vmem>>, vector<1x1x4x8xbf16>
    %323 = vector.shape_cast %322 : vector<1x1x4x8xbf16> to vector<4x8xbf16>
    %cst_348 = arith.constant dense<0.000000e+00> : vector<112x8xf32>
    %324 = tpu.matmul %321, %323, %cst_348 {dimension_numbers = #tpu.dot_dimension_numbers<[1], [0], [0], [1], [0, 0, 1, 1], [], []>} : vector<112x4xbf16>, vector<4x8xbf16>, vector<112x8xf32> -> vector<112x8xf32>
    %325 = arith.addf %318, %324 : vector<112x8xf32>
    %c0_349 = arith.constant 0 : index
    %c0_350 = arith.constant 0 : index
    %c88 = arith.constant 88 : index
    %c0_351 = arith.constant 0 : index
    %326 = vector.load %arg3[%c0_349, %c0_350, %c88, %c0_351] : memref<1x1x202x4xf32, #tpu.memory_space<vmem>>, vector<1x1x112x4xf32>
    %327 = vector.shape_cast %326 : vector<1x1x112x4xf32> to vector<112x4xf32>
    %328 = arith.truncf %327 : vector<112x4xf32> to vector<112x4xbf16>
    %c0_352 = arith.constant 0 : index
    %c46_353 = arith.constant 46 : index
    %c0_354 = arith.constant 0 : index
    %c0_355 = arith.constant 0 : index
    %329 = vector.load %arg4[%c0_352, %c46_353, %c0_354, %c0_355] : memref<1x49x4x8xbf16, #tpu.memory_space<vmem>>, vector<1x1x4x8xbf16>
    %330 = vector.shape_cast %329 : vector<1x1x4x8xbf16> to vector<4x8xbf16>
    %cst_356 = arith.constant dense<0.000000e+00> : vector<112x8xf32>
    %331 = tpu.matmul %328, %330, %cst_356 {dimension_numbers = #tpu.dot_dimension_numbers<[1], [0], [0], [1], [0, 0, 1, 1], [], []>} : vector<112x4xbf16>, vector<4x8xbf16>, vector<112x8xf32> -> vector<112x8xf32>
    %332 = arith.addf %325, %331 : vector<112x8xf32>
    %c0_357 = arith.constant 0 : index
    %c0_358 = arith.constant 0 : index
    %c89 = arith.constant 89 : index
    %c0_359 = arith.constant 0 : index
    %333 = vector.load %arg3[%c0_357, %c0_358, %c89, %c0_359] : memref<1x1x202x4xf32, #tpu.memory_space<vmem>>, vector<1x1x112x4xf32>
    %334 = vector.shape_cast %333 : vector<1x1x112x4xf32> to vector<112x4xf32>
    %335 = arith.truncf %334 : vector<112x4xf32> to vector<112x4xbf16>
    %c0_360 = arith.constant 0 : index
    %c47_361 = arith.constant 47 : index
    %c0_362 = arith.constant 0 : index
    %c0_363 = arith.constant 0 : index
    %336 = vector.load %arg4[%c0_360, %c47_361, %c0_362, %c0_363] : memref<1x49x4x8xbf16, #tpu.memory_space<vmem>>, vector<1x1x4x8xbf16>
    %337 = vector.shape_cast %336 : vector<1x1x4x8xbf16> to vector<4x8xbf16>
    %cst_364 = arith.constant dense<0.000000e+00> : vector<112x8xf32>
    %338 = tpu.matmul %335, %337, %cst_364 {dimension_numbers = #tpu.dot_dimension_numbers<[1], [0], [0], [1], [0, 0, 1, 1], [], []>} : vector<112x4xbf16>, vector<4x8xbf16>, vector<112x8xf32> -> vector<112x8xf32>
    %339 = arith.addf %332, %338 : vector<112x8xf32>
    %c0_365 = arith.constant 0 : index
    %c0_366 = arith.constant 0 : index
    %c90 = arith.constant 90 : index
    %c0_367 = arith.constant 0 : index
    %340 = vector.load %arg3[%c0_365, %c0_366, %c90, %c0_367] : memref<1x1x202x4xf32, #tpu.memory_space<vmem>>, vector<1x1x112x4xf32>
    %341 = vector.shape_cast %340 : vector<1x1x112x4xf32> to vector<112x4xf32>
    %342 = arith.truncf %341 : vector<112x4xf32> to vector<112x4xbf16>
    %c0_368 = arith.constant 0 : index
    %c48_369 = arith.constant 48 : index
    %c0_370 = arith.constant 0 : index
    %c0_371 = arith.constant 0 : index
    %343 = vector.load %arg4[%c0_368, %c48_369, %c0_370, %c0_371] : memref<1x49x4x8xbf16, #tpu.memory_space<vmem>>, vector<1x1x4x8xbf16>
    %344 = vector.shape_cast %343 : vector<1x1x4x8xbf16> to vector<4x8xbf16>
    %cst_372 = arith.constant dense<0.000000e+00> : vector<112x8xf32>
    %345 = tpu.matmul %342, %344, %cst_372 {dimension_numbers = #tpu.dot_dimension_numbers<[1], [0], [0], [1], [0, 0, 1, 1], [], []>} : vector<112x4xbf16>, vector<4x8xbf16>, vector<112x8xf32> -> vector<112x8xf32>
    %346 = arith.addf %339, %345 : vector<112x8xf32>
    %c0_373 = arith.constant 0 : index
    %c0_374 = arith.constant 0 : index
    %347 = vector.load %arg7[%c0_373, %c0_374] : memref<112x8xf32, #tpu.memory_space<vmem>>, vector<112x8xf32>
    tpu.vector_store %arg7[%c0_373, %c0_374], %346 {strides = array<i32>} : memref<112x8xf32, #tpu.memory_space<vmem>>, vector<112x8xf32>,
    %c6_i32 = arith.constant 6 : i32
    %348 = arith.cmpi eq, %arg2, %c6_i32 : i32
    %349 = arith.extui %348 : i1 to i32
    %c0_i32_375 = arith.constant 0 : i32
    %350 = arith.cmpi ne, %349, %c0_i32_375 : i32
    scf.if %350 {
      %c0_376 = arith.constant 0 : index
      %c0_377 = arith.constant 0 : index
      %c0_378 = arith.constant 0 : index
      %351 = vector.load %arg5[%c0_376, %c0_377, %c0_378] : memref<1x1x8xf32, #tpu.memory_space<vmem>>, vector<1x1x8xf32>
      %352 = vector.shape_cast %351 : vector<1x1x8xf32> to vector<1x8xf32>
      %353 = vector.broadcast %352 : vector<1x8xf32> to vector<112x8xf32>
      %354 = arith.addf %346, %353 : vector<112x8xf32>
      %c0_379 = arith.constant 0 : index
      %c0_380 = arith.constant 0 : index
      %c0_381 = arith.constant 0 : index
      %c0_382 = arith.constant 0 : index
      %355 = vector.load %arg6[%c0_379, %c0_380, %c0_381, %c0_382] : memref<1x1x112x8xf32, #tpu.memory_space<vmem>>, vector<1x1x112x8xf32>
      %356 = vector.shape_cast %355 : vector<1x1x112x8xf32> to vector<112x8xf32>
      %357 = vector.shape_cast %354 : vector<112x8xf32> to vector<1x1x112x8xf32>
      tpu.vector_store %arg6[%c0_379, %c0_380, %c0_381, %c0_382], %357 {strides = array<i32>} : memref<1x1x112x8xf32, #tpu.memory_space<vmem>>, vector<1x1x112x8xf32>,
    } else {
    }
    return
  }
  func.func @transform_0(%arg0: i32, %arg1: i32, %arg2: i32) -> (i32, i32, i32, i32) {
    %0 = arith.addi %arg1, %arg2 : i32
    %c0_i32 = arith.constant 0 : i32
    %c0_i32_0 = arith.constant 0 : i32
    %c0_i32_1 = arith.constant 0 : i32
    return %arg0, %0, %c0_i32, %c0_i32_0 : i32, i32, i32, i32
  }
  func.func @transform_1(%arg0: i32, %arg1: i32, %arg2: i32) -> (i32, i32, i32, i32) {
    %c0_i32 = arith.constant 0 : i32
    %c0_i32_0 = arith.constant 0 : i32
    %c0_i32_1 = arith.constant 0 : i32
    %c0_i32_2 = arith.constant 0 : i32
    return %arg2, %c0_i32, %c0_i32_0, %c0_i32_1 : i32, i32, i32, i32
  }
  func.func @transform_2(%arg0: i32, %arg1: i32, %arg2: i32) -> (i32, i32, i32) {
    %c0_i32 = arith.constant 0 : i32
    %c0_i32_0 = arith.constant 0 : i32
    %c0_i32_1 = arith.constant 0 : i32
    %c0_i32_2 = arith.constant 0 : i32
    return %c0_i32, %c0_i32_0, %c0_i32_1 : i32, i32, i32
  }
  func.func @transform_3(%arg0: i32, %arg1: i32, %arg2: i32) -> (i32, i32, i32, i32) {
    %c0_i32 = arith.constant 0 : i32
    %c0_i32_0 = arith.constant 0 : i32
    %c0_i32_1 = arith.constant 0 : i32
    return %arg0, %arg1, %c0_i32, %c0_i32_0 : i32, i32, i32, i32
  }
}

</mosaic_0001>

<bundles_post_ra>
// kernel: tpu_custom_call.1
= control target key start
LH: loop header
LB: loop body
LE: loop exit
PB: predicated region body
PF: predicated region fallthrough
CT: control target
= control target key end

     0   :  { %s11511_s12 = smov 0   ;;  %s11513_s13 = smov 0   ;;  %s14053_s0 = inlined_call_operand.vmem [shape: f32[1,14,202,4], index: 0, kind: input, shape index: {}]   ;;  %s14054_s1 = inlined_call_operand.vmem [shape: bf16[7,49,4,8], index: 1, kind: input, shape index: {}]   ;;  %s14055_s2 = inlined_call_operand.vmem [shape: f32[1,1,8], index: 2, kind: input, shape index: {}]   ;;  %s14056_s3 = inlined_call_operand.vmem [shape: f32[1,8,112,8], index: 3, kind: output, shape index: {}]  }
   0x1   :  { %s11515_s14 = smov 0   ;;  %s11517_s15 = smov 0  }
   0x2   :  { %s11519_s16 = smov 0  }
   0x3 LB: > { %s25_s17 = sadd.s32 1, %s11478_s14  ;;  %s28_s18 = sadd.s32 1, %s11482_s15  ;;  %s11486_s16 = sphi %s11519_s16, %s13_s16   ;;  %s11482_s15 = sphi %s11517_s15, %s14060_s15   ;;  %s11478_s14 = sphi %s11515_s14, %s14059_s14   ;;  %s11474_s13 = sphi %s11513_s13, %s14058_s13   ;;  %s11470_s12 = sphi %s11511_s12, %s14057_s12  }
   0x4   : > { %p26_p0 = scmp.ge.s32.totalorder %s25_s17, 7  ;;  %p7794_p1 = scmp.ge.s32.totalorder %s11486_s16, 1 }
   0x5   : > { %p178_p2 = scmp.lt.s32.totalorder %s11486_s16, 57 }
   0x6   : > { %s14062_s17 = smov (%p26_p0, %s25_s17), 0  ;;  %s14064_s18 = smov (!%p26_p0, %s28_s18), %s11482_s15 }
   0x7   : > { %p179_p3 = pnand %p7794_p1, %p178_p2  ;;  %p30_p4 = scmp.ge.s32.totalorder %s14064_s18, 8 }
   0x8   : > { %s216_s19 = sadd.s32 (!%p179_p3), %s11470_s12, %s11474_s13  ;;  %p227_p5 = scmp.lt.s32.totalorder (!%p179_p3), %s11470_s12, 6 }
   0x9   : > { %s14066_s18 = smov (%p30_p4, %s14064_s18), 0  ;;  %182 = sbr.rel (%p179_p3) target bundleno = 1620 (0x654), region = 32 }
   0xa   : > { %p219_p6 = scmp.lt.s32.totalorder (!%p179_p3), %s216_s19, 13  ;;  %p234_p7 = scmp.lt.s32.totalorder (!%p179_p3), %s11474_s13, 7 }
   0xb   : > { %p7798_p8 = scmp.ne.s32.totalorder (!%p179_p3), %s11470_s12, 0 }
  0x10   : > { %s228_s20 = scalar_select %p227_p5, %s11470_s12, 6 }
  0x11   : > { %s14068_s19 = smov (!%p219_p6, %s216_s19), 13  ;;  %s14070_s13 = smov (!%p234_p7, %s11474_s13), 7 }
  0x12   : > { %s11403_s21 = smul.u32 98, %s228_s20  ;;  %vm246_vm0 = vcmask (!%p7798_p8), 64512   ;;  %v11488_v0 = vmov (!%p7798_p8), 0.0  }
  0x13   : > { %s11402_s22 = smul.u32 208, %s14068_s19  ;;  %247 = vst.msk [vmem:[#allocation2] sm:$0xff] (!%p7798_p8), %vm246_vm0, %v11488_v0  ;;  %248 = vst.msk [vmem:[#allocation2 + $0x8] sm:$0xff] (!%p7798_p8), %vm246_vm0, %v11488_v0 }
  0x14   : > { %s11549_s25 = scalar_lea.vmem %s14054_s1, %s11403_s21  ;;  %s11404_s29 = smul.u32 112, %s14070_s13  ;;  %249 = vst.msk [vmem:[#allocation2 + $0x10] sm:$0xff] (!%p7798_p8), %vm246_vm0, %v11488_v0  ;;  %250 = vst.msk [vmem:[#allocation2 + $0x18] sm:$0xff] (!%p7798_p8), %vm246_vm0, %v11488_v0 }
  0x15   : > { %s11554_s28 = scalar_lea.vmem %s14053_s0, %s11402_s22  ;;  %245 = sbr.rel (%p7798_p8) target bundleno = 28 (0x1c), region = 36  ;;  %251 = vst.msk [vmem:[#allocation2 + $0x20] sm:$0xff] (!%p7798_p8), %vm246_vm0, %v11488_v0  ;;  %252 = vst.msk [vmem:[#allocation2 + $0x28] sm:$0xff] (!%p7798_p8), %vm246_vm0, %v11488_v0 }
  0x16   : > { %s11559_s5 = scalar_lea.vmem %s14056_s3, %s11404_s29  ;;  %253 = vst.msk [vmem:[#allocation2 + $0x30] sm:$0xff] (!%p7798_p8), %vm246_vm0, %v11488_v0  ;;  %254 = vst.msk [vmem:[#allocation2 + $0x38] sm:$0xff] (!%p7798_p8), %vm246_vm0, %v11488_v0 }
  0x17   : > { %255 = vst.msk [vmem:[#allocation2 + $0x40] sm:$0xff] (!%p7798_p8), %vm246_vm0, %v11488_v0  ;;  %256 = vst.msk [vmem:[#allocation2 + $0x48] sm:$0xff] (!%p7798_p8), %vm246_vm0, %v11488_v0 }
  0x18   : > { %257 = vst.msk [vmem:[#allocation2 + $0x50] sm:$0xff] (!%p7798_p8), %vm246_vm0, %v11488_v0  ;;  %258 = vst.msk [vmem:[#allocation2 + $0x58] sm:$0xff] (!%p7798_p8), %vm246_vm0, %v11488_v0 }
  0x19   : > { %259 = vst.msk [vmem:[#allocation2 + $0x60] sm:$0xff] (!%p7798_p8), %vm246_vm0, %v11488_v0  ;;  %260 = vst.msk [vmem:[#allocation2 + $0x68] sm:$0xff] (!%p7798_p8), %vm246_vm0, %v11488_v0 }
  0x1c PF: > { %v296_v1 = vld [vmem:[%s11549_s25] sm:$0x3]  ;;  %vm319_vm1 = vcmask 1041408   ;;  %v7990_v2 = vld [vmem:[%s11549_s25 + $0x30] sm:$0x3]  ;;  %v11489_v3 = vmov 0.0  }
  0x1d   : > { %8586 = vmatprep.subr.bf16.mxu1 %v11489_v3  ;;  %9306 = vmatprep.subr.bf16.mxu0 %v11489_v3  ;;  %v321_v4 = vsel %vm319_vm1, %v296_v1, 0  ;;  %v11568_v5 = vsel %vm319_vm1, %v7990_v2, 0  ;;  %v275_v6 = vld [vmem:[%s11554_s28] sm:$0xff]  ;;  %v276_v7 = vld [vmem:[%s11554_s28 + $0x8] sm:$0xff]  ;;  %vm297_vm2 = vcmask 31744   ;;  %v11577_v10 = vld [vmem:[%s11554_s28 + $0x35] sm:$0xff] }
  0x1e   : > { %8587 = vmatpush3.bf16.msra.mxu1 %v321_v4  ;;  %9307 = vmatpush3.bf16.msra.mxu0 %v11568_v5  ;;  %v289_v8 = vpack.c.bf16 %v276_v7, %v275_v6  ;;  %v11574_v9 = vld [vmem:[%s11554_s28 + $0x2d] sm:$0xff]  ;;  %vm11490_vm3 = vmmov 0   ;;  %v7806_v14 = vld [vmem:[%s11549_s25 + $0x2] sm:$0x3]  ;;  %v278_v17 = vld [vmem:[%s11554_s28 + $0x18] sm:$0xff]  ;;  %vm7626_vm4 = vcmask 64512  }
  0x1f   : > { %v7998_v11 = vld [vmem:[%s11549_s25 + $0x32] sm:$0x3]  ;;  %8588 = vmatprep.mubr.msk.bf16.mxu1 %vm11490_vm3, %v11489_v3  ;;  %9308 = vmatprep.mubr.msk.bf16.mxu0 %vm11490_vm3, %v11489_v3  ;;  %v3890_v12 = vpack.c.bf16 %v11577_v10, %v11574_v9  ;;  %v471_v15 = vsel %vm319_vm1, %v7806_v14, 0  ;;  %v11598_v18 = vld [vmem:[%s11554_s28 + $0x3d] sm:$0xff]  ;;  %v11601_v19 = vld [vmem:[%s11554_s28 + $0x45] sm:$0xff]  ;;  %p8190_p9 = scmp.ne.s32.totalorder %s11470_s12, 6 }
  0x20   : > { %v4071_v13 = vsel %vm319_vm1, %v7998_v11, 0  ;;  %9336 = vmatprep.subr.bf16.mxu0 %v11489_v3  ;;  %8616 = vmatprep.subr.bf16.mxu1 %v11489_v3  ;;  %v277_v16 = vld [vmem:[%s11554_s28 + $0x10] sm:$0xff]  ;;  %v3891_v21 = vpack.c.bf16 %v11601_v19, %v11598_v18  ;;  %v279_v22 = vld [vmem:[%s11554_s28 + $0x20] sm:$0xff]  ;;  %v280_v23 = vld [vmem:[%s11554_s28 + $0x28] sm:$0xff] }
  0x21   : > { %8589 = vmatmul.mubr.msk.bf16.vlgmr.msra.gmra.mrb[0].mxu1 %vm297_vm2, %v289_v8  ;;  %9309 = vmatmul.mubr.msk.bf16.vlgmr.msra.gmra.mrb[0].mxu0 %vm297_vm2, %v3890_v12  ;;  %v290_v20 = vpack.c.bf16 %v278_v17, %v277_v16  ;;  %v11618_v24 = vld [vmem:[%s11554_s28 + $0x4d] sm:$0xff]  ;;  %v11621_v25 = vld [vmem:[%s11554_s28 + $0x55] sm:$0xff]  ;;  %v291_v26 = vpack.c.bf16 %v280_v23, %v279_v22  ;;  %v11636_v30 = vld [vmem:[%s11554_s28 + $0x5d] sm:$0xff] }
  0x22   : > { %9337 = vmatpush3.bf16.msra.mxu0 %v4071_v13  ;;  %8592 = vmatprep.mubr.msk.bf16.mxu1 %vm11490_vm3, %v11489_v3  ;;  %v3892_v27 = vpack.c.bf16 %v11621_v25, %v11618_v24  ;;  %v281_v28 = vld [vmem:[%s11554_s28 + $0x30] sm:$0xff]  ;;  %v11633_v29 = vld [vmem:[%s11554_s28 + $0x38] sm:$0xff]  ;;  %v11639_v31 = vld [vmem:[%s11554_s28 + $0x65] sm:$0xff] }
  0x23   : > { %8617 = vmatpush3.bf16.msra.mxu1 %v471_v15  ;;  %9312 = vmatprep.mubr.msk.bf16.mxu0 %vm11490_vm3, %v11489_v3  ;;  %v11642_v32 = vpack.c.bf16 %v11633_v29, %v281_v28  ;;  %v3893_v33 = vpack.c.bf16 %v11639_v31, %v11636_v30  ;;  %v11650_v34 = vld [vmem:[%s11554_s28 + $0x40] sm:$0xff]  ;;  %v11657_v35 = vld [vmem:[%s11554_s28 + $0x48] sm:$0xff]  ;;  %v11663_v37 = vld [vmem:[%s11554_s28 + $0x36] sm:$0xff] }
  0x24   : > { %9366 = vmatprep.subr.bf16.mxu0 %v11489_v3  ;;  %8646 = vmatprep.subr.bf16.mxu1 %v11489_v3  ;;  %v11660_v36 = vld [vmem:[%s11554_s28 + $0x2e] sm:$0xff]  ;;  %v11668_v39 = vpack.c.bf16 %v11657_v35, %v11650_v34  ;;  %v11682_v43 = vld [vmem:[%s11554_s28 + $0x58] sm:$0xff]  ;;  %v11688_v45 = vld [vmem:[%s11554_s28 + $0x46] sm:$0xff] }
  0x25   : > { %v8006_v38 = vld [vmem:[%s11549_s25 + $0x34] sm:$0x3]  ;;  %v4040_v40 = vpack.c.bf16 %v11663_v37, %v11660_v36  ;;  %v11685_v44 = vld [vmem:[%s11554_s28 + $0x3e] sm:$0xff]  ;;  %v11710_v49 = vld [vmem:[%s11554_s28 + $0x68] sm:$0xff] }
  0x26   : > { %v4221_v41 = vsel %vm319_vm1, %v8006_v38, 0  ;;  %v11677_v42 = vld [vmem:[%s11554_s28 + $0x50] sm:$0xff]  ;;  %v4041_v47 = vpack.c.bf16 %v11688_v45, %v11685_v44  ;;  %v11703_v48 = vld [vmem:[%s11554_s28 + $0x60] sm:$0xff] }
  0x27   : > { %v11695_v46 = vpack.c.bf16 %v11682_v43, %v11677_v42  ;;  %v11713_v50 = vld [vmem:[%s11554_s28 + $0x4e] sm:$0xff]  ;;  %v11716_v51 = vld [vmem:[%s11554_s28 + $0x56] sm:$0xff]  ;;  %v11720_v52 = vpack.c.bf16 %v11710_v49, %v11703_v48  ;;  %v426_v54 = vld [vmem:[%s11554_s28 + $0x1] sm:$0xff] }
  0x28   : > { %v4042_v53 = vpack.c.bf16 %v11716_v51, %v11713_v50  ;;  %v427_v55 = vld [vmem:[%s11554_s28 + $0x9] sm:$0xff]  ;;  %v11734_v56 = vld [vmem:[%s11554_s28 + $0x5e] sm:$0xff]  ;;  %v428_v62 = vld [vmem:[%s11554_s28 + $0x11] sm:$0xff] }
  0x29   : > { %8593 = vmatmul.mubr.msk.bf16.gmra.mrb[4].mxu1 %vm297_vm2, %v290_v20  ;;  %9313 = vmatmul.mubr.msk.bf16.gmra.mrb[4].mxu0 %vm297_vm2, %v3891_v21  ;;  %v11737_v57 = vld [vmem:[%s11554_s28 + $0x66] sm:$0xff]  ;;  %v7814_v58 = vld [vmem:[%s11549_s25 + $0x4] sm:$0x3]  ;;  %v440_v59 = vpack.c.bf16 %v427_v55, %v426_v54  ;;  %v429_v63 = vld [vmem:[%s11554_s28 + $0x19] sm:$0xff] }
  0x2a   : > { %8596 = vmatprep.mubr.msk.bf16.mxu1 %vm11490_vm3, %v11489_v3  ;;  %9316 = vmatprep.mubr.msk.bf16.mxu0 %vm11490_vm3, %v11489_v3  ;;  %v4043_v60 = vpack.c.bf16 %v11737_v57, %v11734_v56  ;;  %v621_v61 = vsel %vm319_vm1, %v7814_v58, 0  ;;  %v11750_v0 = vld [vmem:[%s11554_s28 + $0x6e] sm:$0xff]  ;;  %v4035_v1 = vld [vmem:[%s11554_s28 + $0x76] sm:$0xff]  ;;  %v441_v2 = vpack.c.bf16 %v429_v63, %v428_v62  ;;  %v430_v6 = vld [vmem:[%s11554_s28 + $0x21] sm:$0xff] }
  0x2b   : > { %v4044_v4 = vpack.c.bf16 %v4035_v1, %v11750_v0  ;;  %v431_v7 = vld [vmem:[%s11554_s28 + $0x29] sm:$0xff]  ;;  %v4036_v8 = vld [vmem:[%s11554_s28 + $0x7e] sm:$0xff]  ;;  %v432_v14 = vld [vmem:[%s11554_s28 + $0x31] sm:$0xff] }
  0x2c   : > { %v4037_v11 = vld [vmem:[%s11554_s28 + $0x86] sm:$0xff]  ;;  %v442_v12 = vpack.c.bf16 %v431_v7, %v430_v6  ;;  %v11775_v15 = vld [vmem:[%s11554_s28 + $0x39] sm:$0xff]  ;;  %v4038_v16 = vld [vmem:[%s11554_s28 + $0x8e] sm:$0xff] }
  0x2d   : > { %v4045_v13 = vpack.c.bf16 %v4037_v11, %v4036_v8  ;;  %v4039_v17 = vld [vmem:[%s11554_s28 + $0x96] sm:$0xff]  ;;  %v443_v20 = vpack.c.bf16 %v11775_v15, %v432_v14  ;;  %v11783_v22 = vld [vmem:[%s11554_s28 + $0x41] sm:$0xff]  ;;  %v11790_v23 = vld [vmem:[%s11554_s28 + $0x49] sm:$0xff] }
  0x2e   : > { %v4046_v21 = vpack.c.bf16 %v4039_v17, %v4038_v16  ;;  %v8014_v28 = vld [vmem:[%s11549_s25 + $0x36] sm:$0x3]  ;;  %v4179_v54 = vld [vmem:[%s11554_s28 + $0x47] sm:$0xff]  ;;  %v4182_v6 = vld [vmem:[%s11554_s28 + $0x5f] sm:$0xff] }
  0x2f   : > { %v4181_v62 = vld [vmem:[%s11554_s28 + $0x57] sm:$0xff]  ;;  %v4183_v7 = vld [vmem:[%s11554_s28 + $0x67] sm:$0xff]  ;;  %v4184_v17 = vld [vmem:[%s11554_s28 + $0x6f] sm:$0xff] }
  0x30   : > { %v7822_v8 = vld [vmem:[%s11549_s25 + $0x6] sm:$0x3]  ;;  %v578_v14 = vld [vmem:[%s11554_s28 + $0x12] sm:$0xff]  ;;  %v579_v16 = vld [vmem:[%s11554_s28 + $0x1a] sm:$0xff] }
  0x31   : > { %8597 = vmatmul.mubr.msk.bf16.gmra.mrb[8].mxu1 %vm297_vm2, %v291_v26  ;;  %9317 = vmatmul.mubr.msk.bf16.gmra.mrb[8].mxu0 %vm297_vm2, %v3892_v27  ;;  %v4176_v26 = vld [vmem:[%s11554_s28 + $0x2f] sm:$0xff]  ;;  %v4177_v27 = vld [vmem:[%s11554_s28 + $0x37] sm:$0xff] }
  0x32   : > { %8600 = vmatprep.mubr.msk.bf16.mxu1 %vm11490_vm3, %v11489_v3  ;;  %9320 = vmatprep.mubr.msk.bf16.mxu0 %vm11490_vm3, %v11489_v3  ;;  %v4190_v38 = vpack.c.bf16 %v4177_v27, %v4176_v26  ;;  %v580_v27 = vld [vmem:[%s11554_s28 + $0x22] sm:$0xff] }
  0x39   : > { %8601 = vmatmul.mubr.msk.bf16.gmra.mrb[12].mxu1 %vm297_vm2, %v11642_v32  ;;  %9321 = vmatmul.mubr.msk.bf16.gmra.mrb[12].mxu0 %vm297_vm2, %v3893_v33  ;;  %v444_v33 = vpack.c.bf16 %v11790_v23, %v11783_v22 }
  0x3a   : > { %8604 = vmatprep.mubr.msk.bf16.mxu1 %vm11490_vm3, %v11489_v3  ;;  %9338 = vmatprep.mubr.msk.bf16.mxu0 %vm11490_vm3, %v11489_v3 }
  0x41   : > { %8605 = vmatmul.mubr.msk.bf16.gmra.mrb[16].mxu1 %vm297_vm2, %v11668_v39  ;;  %9339 = vmatmul.mubr.msk.bf16.vlgmr.msra.gmra.mrb[0].mxu0 %vm297_vm2, %v4040_v40  ;;  %v4371_v40 = vsel %vm319_vm1, %v8014_v28, 0  ;;  %v581_v28 = vld [vmem:[%s11554_s28 + $0x2a] sm:$0xff] }
  0x42   : > { %9367 = vmatpush3.bf16.msra.mxu0 %v4221_v41  ;;  %8608 = vmatprep.mubr.msk.bf16.mxu1 %vm11490_vm3, %v11489_v3  ;;  %v11801_v41 = vld [vmem:[%s11554_s28 + $0x51] sm:$0xff] }
  0x43   : > { %9342 = vmatprep.mubr.msk.bf16.mxu0 %vm11490_vm3, %v11489_v3  ;;  %9396 = vmatprep.subr.bf16.mxu0 %v11489_v3 }
  0x49   : > { %8609 = vmatmul.mubr.msk.bf16.gmra.mrb[20].mxu1 %vm297_vm2, %v11695_v46  ;;  %9343 = vmatmul.mubr.msk.bf16.gmra.mrb[4].mxu0 %vm297_vm2, %v4041_v47  ;;  %v11806_v47 = vld [vmem:[%s11554_s28 + $0x59] sm:$0xff] }
  0x4a   : > { %8612 = vmatprep.mubr.msk.bf16.mxu1 %vm11490_vm3, %v11489_v3  ;;  %9346 = vmatprep.mubr.msk.bf16.mxu0 %vm11490_vm3, %v11489_v3  ;;  %v445_v55 = vpack.c.bf16 %v11806_v47, %v11801_v41 }
  0x51   : > { %8613 = vmatmul.mubr.msk.bf16.gmra.mrb[24].mxu1 %vm297_vm2, %v11720_v52  ;;  %9347 = vmatmul.mubr.msk.bf16.gmra.mrb[8].mxu0 %vm297_vm2, %v4042_v53  ;;  %v4178_v53 = vld [vmem:[%s11554_s28 + $0x3f] sm:$0xff] }
  0x52   : > { %8618 = vmatprep.mubr.msk.bf16.mxu1 %vm11490_vm3, %v11489_v3  ;;  %9350 = vmatprep.mubr.msk.bf16.mxu0 %vm11490_vm3, %v11489_v3  ;;  %v4191_v58 = vpack.c.bf16 %v4179_v54, %v4178_v53  ;;  %v582_v54 = vld [vmem:[%s11554_s28 + $0x32] sm:$0xff] }
  0x59   : > { %8619 = vmatmul.mubr.msk.bf16.vlgmr.msra.gmra.mrb[0].mxu1 %vm297_vm2, %v440_v59  ;;  %9351 = vmatmul.mubr.msk.bf16.gmra.mrb[12].mxu0 %vm297_vm2, %v4043_v60  ;;  %v11818_v59 = vld [vmem:[%s11554_s28 + $0x61] sm:$0xff]  ;;  %v11825_v60 = vld [vmem:[%s11554_s28 + $0x69] sm:$0xff] }
  0x5a   : > { %8622 = vmatprep.mubr.msk.bf16.mxu1 %vm11490_vm3, %v11489_v3  ;;  %8647 = vmatpush3.bf16.msra.mxu1 %v621_v61  ;;  %v4180_v61 = vld [vmem:[%s11554_s28 + $0x4f] sm:$0xff]  ;;  %v446_v63 = vpack.c.bf16 %v11825_v60, %v11818_v59 }
  0x5b   : > { %9354 = vmatprep.mubr.msk.bf16.mxu0 %vm11490_vm3, %v11489_v3  ;;  %8676 = vmatprep.subr.bf16.mxu1 %v11489_v3  ;;  %v4192_v1 = vpack.c.bf16 %v4181_v62, %v4180_v61  ;;  %v4189_v61 = vld [vmem:[%s11554_s28 + $0x97] sm:$0xff] }
  0x61   : > { %8623 = vmatmul.mubr.msk.bf16.gmra.mrb[4].mxu1 %vm297_vm2, %v441_v2  ;;  %9355 = vmatmul.mubr.msk.bf16.gmra.mrb[16].mxu0 %vm297_vm2, %v4044_v4  ;;  %v576_v2 = vld [vmem:[%s11554_s28 + $0x2] sm:$0xff]  ;;  %v577_v4 = vld [vmem:[%s11554_s28 + $0xa] sm:$0xff] }
  0x62   : > { %8626 = vmatprep.mubr.msk.bf16.mxu1 %vm11490_vm3, %v11489_v3  ;;  %9358 = vmatprep.mubr.msk.bf16.mxu0 %vm11490_vm3, %v11489_v3  ;;  %v590_v11 = vpack.c.bf16 %v577_v4, %v576_v2  ;;  %v11887_v2 = vld [vmem:[%s11554_s28 + $0x4a] sm:$0xff]  ;;  %v8022_v4 = vld [vmem:[%s11549_s25 + $0x38] sm:$0x3] }
  0x69   : > { %8627 = vmatmul.mubr.msk.bf16.gmra.mrb[8].mxu1 %vm297_vm2, %v442_v12  ;;  %9359 = vmatmul.mubr.msk.bf16.gmra.mrb[20].mxu0 %vm297_vm2, %v4045_v13  ;;  %v4193_v12 = vpack.c.bf16 %v4183_v7, %v4182_v6  ;;  %v771_v13 = vsel %vm319_vm1, %v7822_v8, 0  ;;  %v4521_v7 = vsel %vm319_vm1, %v8022_v4, 0  ;;  %v11899_v8 = vld [vmem:[%s11554_s28 + $0x52] sm:$0xff] }
  0x6a   : > { %8630 = vmatprep.mubr.msk.bf16.mxu1 %vm11490_vm3, %v11489_v3  ;;  %9362 = vmatprep.mubr.msk.bf16.mxu0 %vm11490_vm3, %v11489_v3  ;;  %v4338_v4 = vld [vmem:[%s11554_s28 + $0x90] sm:$0xff] }
  0x71   : > { %8631 = vmatmul.mubr.msk.bf16.gmra.mrb[12].mxu1 %vm297_vm2, %v443_v20  ;;  %9363 = vmatmul.mubr.msk.bf16.gmra.mrb[24].mxu0 %vm297_vm2, %v4046_v21  ;;  %v4185_v20 = vld [vmem:[%s11554_s28 + $0x77] sm:$0xff]  ;;  %v591_v21 = vpack.c.bf16 %v579_v16, %v578_v14  ;;  %v727_v16 = vld [vmem:[%s11554_s28 + $0xb] sm:$0xff] }
  0x72   : > { %8634 = vmatprep.mubr.msk.bf16.mxu1 %vm11490_vm3, %v11489_v3  ;;  %9368 = vmatprep.mubr.msk.bf16.mxu0 %vm11490_vm3, %v11489_v3  ;;  %v4194_v26 = vpack.c.bf16 %v4185_v20, %v4184_v17  ;;  %v7830_v17 = vld [vmem:[%s11549_s25 + $0x8] sm:$0x3] }
  0x79   : > { %8635 = vmatmul.mubr.msk.bf16.gmra.mrb[16].mxu1 %vm297_vm2, %v444_v33  ;;  %9369 = vmatmul.mubr.msk.bf16.vlgmr.msra.gmra.mrb[0].mxu0 %vm297_vm2, %v4190_v38  ;;  %v4186_v33 = vld [vmem:[%s11554_s28 + $0x7f] sm:$0xff]  ;;  %v4187_v38 = vld [vmem:[%s11554_s28 + $0x87] sm:$0xff] }
  0x7a   : > { %9397 = vmatpush3.bf16.msra.mxu0 %v4371_v40  ;;  %8638 = vmatprep.mubr.msk.bf16.mxu1 %vm11490_vm3, %v11489_v3  ;;  %v592_v40 = vpack.c.bf16 %v581_v28, %v580_v27  ;;  %v4195_v53 = vpack.c.bf16 %v4187_v38, %v4186_v33  ;;  %v11943_v27 = vld [vmem:[%s11554_s28 + $0x70] sm:$0xff]  ;;  %v11946_v28 = vld [vmem:[%s11554_s28 + $0x78] sm:$0xff]  ;;  %v730_v38 = vld [vmem:[%s11554_s28 + $0x23] sm:$0xff] }
  0x7b   : > { %9372 = vmatprep.mubr.msk.bf16.mxu0 %vm11490_vm3, %v11489_v3  ;;  %9426 = vmatprep.subr.bf16.mxu0 %v11489_v3  ;;  %v4344_v33 = vpack.c.bf16 %v11946_v28, %v11943_v27 }
  0x81   : > { %8639 = vmatmul.mubr.msk.bf16.gmra.mrb[20].mxu1 %vm297_vm2, %v445_v55  ;;  %9373 = vmatmul.mubr.msk.bf16.gmra.mrb[4].mxu0 %vm297_vm2, %v4191_v58  ;;  %v11872_v55 = vld [vmem:[%s11554_s28 + $0x3a] sm:$0xff]  ;;  %v4188_v58 = vld [vmem:[%s11554_s28 + $0x8f] sm:$0xff] }
  0x82   : > { %8642 = vmatprep.mubr.msk.bf16.mxu1 %vm11490_vm3, %v11489_v3  ;;  %9376 = vmatprep.mubr.msk.bf16.mxu0 %vm11490_vm3, %v11489_v3  ;;  %v593_v62 = vpack.c.bf16 %v11872_v55, %v582_v54  ;;  %v11965_v54 = vld [vmem:[%s11554_s28 + $0x88] sm:$0xff] }
  0x89   : > { %8643 = vmatmul.mubr.msk.bf16.gmra.mrb[24].mxu1 %vm297_vm2, %v446_v63  ;;  %9377 = vmatmul.mubr.msk.bf16.gmra.mrb[8].mxu0 %vm297_vm2, %v4192_v1  ;;  %v4196_v63 = vpack.c.bf16 %v4189_v61, %v4188_v58  ;;  %v11884_v1 = vld [vmem:[%s11554_s28 + $0x42] sm:$0xff] }
  0x8a   : > { %8648 = vmatprep.mubr.msk.bf16.mxu1 %vm11490_vm3, %v11489_v3  ;;  %9380 = vmatprep.mubr.msk.bf16.mxu0 %vm11490_vm3, %v11489_v3  ;;  %v594_v6 = vpack.c.bf16 %v11887_v2, %v11884_v1 }
  0x91   : > { %8649 = vmatmul.mubr.msk.bf16.vlgmr.msra.gmra.mrb[0].mxu1 %vm297_vm2, %v590_v11  ;;  %9381 = vmatmul.mubr.msk.bf16.gmra.mrb[12].mxu0 %vm297_vm2, %v4193_v12  ;;  %v11902_v11 = vld [vmem:[%s11554_s28 + $0x5a] sm:$0xff] }
  0x92   : > { %8652 = vmatprep.mubr.msk.bf16.mxu1 %vm11490_vm3, %v11489_v3  ;;  %8677 = vmatpush3.bf16.msra.mxu1 %v771_v13  ;;  %v595_v12 = vpack.c.bf16 %v11902_v11, %v11899_v8  ;;  %v11920_v13 = vld [vmem:[%s11554_s28 + $0x6a] sm:$0xff] }
  0x93   : > { %9384 = vmatprep.mubr.msk.bf16.mxu0 %vm11490_vm3, %v11489_v3  ;;  %8706 = vmatprep.subr.bf16.mxu1 %v11489_v3 }
  0x99   : > { %8653 = vmatmul.mubr.msk.bf16.gmra.mrb[4].mxu1 %vm297_vm2, %v591_v21  ;;  %9385 = vmatmul.mubr.msk.bf16.gmra.mrb[16].mxu0 %vm297_vm2, %v4194_v26  ;;  %v921_v21 = vsel %vm319_vm1, %v7830_v17, 0  ;;  %v729_v26 = vld [vmem:[%s11554_s28 + $0x1b] sm:$0xff] }
  0x9a   : > { %8656 = vmatprep.mubr.msk.bf16.mxu1 %vm11490_vm3, %v11489_v3  ;;  %9388 = vmatprep.mubr.msk.bf16.mxu0 %vm11490_vm3, %v11489_v3 }
  0xa1   : > { %8657 = vmatmul.mubr.msk.bf16.gmra.mrb[8].mxu1 %vm297_vm2, %v592_v40  ;;  %9389 = vmatmul.mubr.msk.bf16.gmra.mrb[20].mxu0 %vm297_vm2, %v4195_v53  ;;  %v731_v40 = vld [vmem:[%s11554_s28 + $0x2b] sm:$0xff]  ;;  %v11962_v53 = vld [vmem:[%s11554_s28 + $0x80] sm:$0xff] }
  0xa2   : > { %8660 = vmatprep.mubr.msk.bf16.mxu1 %vm11490_vm3, %v11489_v3  ;;  %9392 = vmatprep.mubr.msk.bf16.mxu0 %vm11490_vm3, %v11489_v3  ;;  %v742_v58 = vpack.c.bf16 %v731_v40, %v730_v38  ;;  %v4345_v61 = vpack.c.bf16 %v11965_v54, %v11962_v53  ;;  %v877_v40 = vld [vmem:[%s11554_s28 + $0xc] sm:$0xff] }
  0xa9   : > { %8661 = vmatmul.mubr.msk.bf16.gmra.mrb[12].mxu1 %vm297_vm2, %v593_v62  ;;  %9393 = vmatmul.mubr.msk.bf16.gmra.mrb[24].mxu0 %vm297_vm2, %v4196_v63  ;;  %v732_v62 = vld [vmem:[%s11554_s28 + $0x33] sm:$0xff]  ;;  %v11977_v63 = vld [vmem:[%s11554_s28 + $0x3b] sm:$0xff] }
  0xaa   : > { %8664 = vmatprep.mubr.msk.bf16.mxu1 %vm11490_vm3, %v11489_v3  ;;  %9398 = vmatprep.mubr.msk.bf16.mxu0 %vm11490_vm3, %v11489_v3 }
  0xb1   : > { %8665 = vmatmul.mubr.msk.bf16.gmra.mrb[16].mxu1 %vm297_vm2, %v594_v6  ;;  %9399 = vmatmul.mubr.msk.bf16.vlgmr.msra.gmra.mrb[0].mxu0 %vm297_vm2, %v11642_v32  ;;  %v11917_v32 = vld [vmem:[%s11554_s28 + $0x62] sm:$0xff]  ;;  %v11981_v6 = vld [vmem:[%s11554_s28 + $0x98] sm:$0xff] }
  0xb2   : > { %9427 = vmatpush3.bf16.msra.mxu0 %v4521_v7  ;;  %8668 = vmatprep.mubr.msk.bf16.mxu1 %vm11490_vm3, %v11489_v3  ;;  %v596_v14 = vpack.c.bf16 %v11920_v13, %v11917_v32  ;;  %v743_v7 = vpack.c.bf16 %v11977_v63, %v732_v62  ;;  %v4493_v62 = vpack.c.bf16 %v11943_v27, %v11710_v49 }
  0xb3   : > { %9402 = vmatprep.mubr.msk.bf16.mxu0 %vm11490_vm3, %v11489_v3  ;;  %9456 = vmatprep.subr.bf16.mxu0 %v11489_v3  ;;  %v4494_v27 = vpack.c.bf16 %v11962_v53, %v11946_v28  ;;  %v882_v28 = vld [vmem:[%s11554_s28 + $0x34] sm:$0xff]  ;;  %v12076_v53 = vld [vmem:[%s11554_s28 + $0x3c] sm:$0xff] }
  0xb9   : > { %8669 = vmatmul.mubr.msk.bf16.gmra.mrb[20].mxu1 %vm297_vm2, %v595_v12  ;;  %9403 = vmatmul.mubr.msk.bf16.gmra.mrb[4].mxu0 %vm297_vm2, %v11668_v39  ;;  %v726_v39 = vld [vmem:[%s11554_s28 + $0x3] sm:$0xff]  ;;  %v4346_v12 = vpack.c.bf16 %v11981_v6, %v4338_v4 }
  0xba   : > { %8672 = vmatprep.mubr.msk.bf16.mxu1 %vm11490_vm3, %v11489_v3  ;;  %9406 = vmatprep.mubr.msk.bf16.mxu0 %vm11490_vm3, %v11489_v3  ;;  %v740_v20 = vpack.c.bf16 %v727_v16, %v726_v39  ;;  %v11995_v39 = vld [vmem:[%s11554_s28 + $0x4b] sm:$0xff]  ;;  %v8030_v16 = vld [vmem:[%s11549_s25 + $0x3a] sm:$0x3] }
  0xc1   : > { %8673 = vmatmul.mubr.msk.bf16.gmra.mrb[24].mxu1 %vm297_vm2, %v596_v14  ;;  %9407 = vmatmul.mubr.msk.bf16.gmra.mrb[8].mxu0 %vm297_vm2, %v11695_v46  ;;  %v728_v46 = vld [vmem:[%s11554_s28 + $0x13] sm:$0xff]  ;;  %v11992_v14 = vld [vmem:[%s11554_s28 + $0x43] sm:$0xff] }
  0xc2   : > { %8678 = vmatprep.mubr.msk.bf16.mxu1 %vm11490_vm3, %v11489_v3  ;;  %9410 = vmatprep.mubr.msk.bf16.mxu0 %vm11490_vm3, %v11489_v3  ;;  %v744_v17 = vpack.c.bf16 %v11995_v39, %v11992_v14 }
  0xc9   : > { %8679 = vmatmul.mubr.msk.bf16.vlgmr.msra.gmra.mrb[0].mxu1 %vm297_vm2, %v740_v20  ;;  %9411 = vmatmul.mubr.msk.bf16.gmra.mrb[12].mxu0 %vm297_vm2, %v11720_v52  ;;  %v741_v52 = vpack.c.bf16 %v729_v26, %v728_v46  ;;  %v4490_v20 = vpack.c.bf16 %v11650_v34, %v11633_v29  ;;  %v12008_v46 = vld [vmem:[%s11554_s28 + $0x53] sm:$0xff]  ;;  %v12011_v26 = vld [vmem:[%s11554_s28 + $0x5b] sm:$0xff]  ;;  %v4491_v34 = vpack.c.bf16 %v11677_v42, %v11657_v35  ;;  %v876_v42 = vld [vmem:[%s11554_s28 + $0x4] sm:$0xff] }
  0xca   : > { %8682 = vmatprep.mubr.msk.bf16.mxu1 %vm11490_vm3, %v11489_v3  ;;  %8707 = vmatpush3.bf16.msra.mxu1 %v921_v21  ;;  %v4671_v21 = vsel %vm319_vm1, %v8030_v16, 0  ;;  %v745_v29 = vpack.c.bf16 %v12011_v26, %v12008_v46  ;;  %v4492_v35 = vpack.c.bf16 %v11703_v48, %v11682_v43  ;;  %v878_v48 = vld [vmem:[%s11554_s28 + $0x14] sm:$0xff]  ;;  %v881_v16 = vld [vmem:[%s11554_s28 + $0x2c] sm:$0xff] }
  0xcb   : > { %9414 = vmatprep.mubr.msk.bf16.mxu0 %vm11490_vm3, %v11489_v3  ;;  %8736 = vmatprep.subr.bf16.mxu1 %v11489_v3 }
  0xd1   : > { %8683 = vmatmul.mubr.msk.bf16.gmra.mrb[4].mxu1 %vm297_vm2, %v741_v52  ;;  %9415 = vmatmul.mubr.msk.bf16.gmra.mrb[16].mxu0 %vm297_vm2, %v4344_v33  ;;  %v12027_v52 = vld [vmem:[%s11554_s28 + $0x63] sm:$0xff]  ;;  %v12030_v33 = vld [vmem:[%s11554_s28 + $0x6b] sm:$0xff] }
  0xd2   : > { %8686 = vmatprep.mubr.msk.bf16.mxu1 %vm11490_vm3, %v11489_v3  ;;  %9418 = vmatprep.mubr.msk.bf16.mxu0 %vm11490_vm3, %v11489_v3  ;;  %v746_v38 = vpack.c.bf16 %v12030_v33, %v12027_v52 }
  0xd9   : > { %8687 = vmatmul.mubr.msk.bf16.gmra.mrb[8].mxu1 %vm297_vm2, %v742_v58  ;;  %9419 = vmatmul.mubr.msk.bf16.gmra.mrb[20].mxu0 %vm297_vm2, %v4345_v61  ;;  %v7838_v58 = vld [vmem:[%s11549_s25 + $0xa] sm:$0x3]  ;;  %v890_v61 = vpack.c.bf16 %v877_v40, %v876_v42  ;;  %v12104_v40 = vld [vmem:[%s11554_s28 + $0x54] sm:$0xff] }
  0xda   : > { %8690 = vmatprep.mubr.msk.bf16.mxu1 %vm11490_vm3, %v11489_v3  ;;  %9422 = vmatprep.mubr.msk.bf16.mxu0 %vm11490_vm3, %v11489_v3  ;;  %v1071_v43 = vsel %vm319_vm1, %v7838_v58, 0  ;;  %v12107_v58 = vld [vmem:[%s11554_s28 + $0x5c] sm:$0xff] }
  0xe1   : > { %8691 = vmatmul.mubr.msk.bf16.gmra.mrb[12].mxu1 %vm297_vm2, %v743_v7  ;;  %9423 = vmatmul.mubr.msk.bf16.gmra.mrb[24].mxu0 %vm297_vm2, %v4346_v12  ;;  %v879_v7 = vld [vmem:[%s11554_s28 + $0x1c] sm:$0xff]  ;;  %v880_v12 = vld [vmem:[%s11554_s28 + $0x24] sm:$0xff] }
  0xe2   : > { %8694 = vmatprep.mubr.msk.bf16.mxu1 %vm11490_vm3, %v11489_v3  ;;  %9428 = vmatprep.mubr.msk.bf16.mxu0 %vm11490_vm3, %v11489_v3  ;;  %v891_v49 = vpack.c.bf16 %v879_v7, %v878_v48  ;;  %v1027_v48 = vld [vmem:[%s11554_s28 + $0xd] sm:$0xff] }
  0xe3   : > { %v12141_v7 = vld [vmem:[%s11554_s28 + $0x71] sm:$0xff] }
  0xe9   : > { %8695 = vmatmul.mubr.msk.bf16.gmra.mrb[16].mxu1 %vm297_vm2, %v744_v17  ;;  %9429 = vmatmul.mubr.msk.bf16.vlgmr.msra.gmra.mrb[0].mxu0 %vm297_vm2, %v4490_v20  ;;  %v892_v17 = vpack.c.bf16 %v881_v16, %v880_v12  ;;  %v4495_v20 = vpack.c.bf16 %v4338_v4, %v11965_v54  ;;  %v12088_v4 = vld [vmem:[%s11554_s28 + $0x44] sm:$0xff]  ;;  %v1028_v12 = vld [vmem:[%s11554_s28 + $0x15] sm:$0xff] }
  0xea   : > { %9457 = vmatpush3.bf16.msra.mxu0 %v4671_v21  ;;  %8698 = vmatprep.mubr.msk.bf16.mxu1 %vm11490_vm3, %v11489_v3  ;;  %v4489_v21 = vld [vmem:[%s11554_s28 + $0xa0] sm:$0xff] }
  0xeb   : > { %9432 = vmatprep.mubr.msk.bf16.mxu0 %vm11490_vm3, %v11489_v3  ;;  %9486 = vmatprep.subr.bf16.mxu0 %v11489_v3  ;;  %v4496_v54 = vpack.c.bf16 %v4489_v21, %v11981_v6  ;;  %v4640_v6 = vpack.c.bf16 %v11783_v22, %v11775_v15  ;;  %v895_v15 = vpack.c.bf16 %v12107_v58, %v12104_v40  ;;  %v1029_v16 = vld [vmem:[%s11554_s28 + $0x1d] sm:$0xff]  ;;  %v1030_v21 = vld [vmem:[%s11554_s28 + $0x25] sm:$0xff] }
  0xec   : > { %v4641_v22 = vpack.c.bf16 %v11801_v41, %v11790_v23  ;;  %v4642_v23 = vpack.c.bf16 %v11818_v59, %v11806_v47  ;;  %v1026_v41 = vld [vmem:[%s11554_s28 + $0x5] sm:$0xff]  ;;  %v4643_v47 = vpack.c.bf16 %v12141_v7, %v11825_v60  ;;  %v1041_v60 = vpack.c.bf16 %v1029_v16, %v1028_v12  ;;  %v4787_v16 = vld [vmem:[%s11554_s28 + $0x92] sm:$0xff] }
  0xed   : > { %v4786_v12 = vld [vmem:[%s11554_s28 + $0x8a] sm:$0xff] }
  0xf1   : > { %8699 = vmatmul.mubr.msk.bf16.gmra.mrb[20].mxu1 %vm297_vm2, %v745_v29  ;;  %9433 = vmatmul.mubr.msk.bf16.gmra.mrb[4].mxu0 %vm297_vm2, %v4491_v34  ;;  %v893_v29 = vpack.c.bf16 %v12076_v53, %v882_v28  ;;  %v12091_v34 = vld [vmem:[%s11554_s28 + $0x4c] sm:$0xff] }
  0xf2   : > { %8702 = vmatprep.mubr.msk.bf16.mxu1 %vm11490_vm3, %v11489_v3  ;;  %9436 = vmatprep.mubr.msk.bf16.mxu0 %vm11490_vm3, %v11489_v3 }
  0xf9   : > { %8703 = vmatmul.mubr.msk.bf16.gmra.mrb[24].mxu1 %vm297_vm2, %v746_v38  ;;  %9437 = vmatmul.mubr.msk.bf16.gmra.mrb[8].mxu0 %vm297_vm2, %v4492_v35  ;;  %v8038_v38 = vld [vmem:[%s11549_s25 + $0x3c] sm:$0x3]  ;;  %v894_v35 = vpack.c.bf16 %v12091_v34, %v12088_v4 }
  0xfa   : > { %8708 = vmatprep.mubr.msk.bf16.mxu1 %vm11490_vm3, %v11489_v3  ;;  %9440 = vmatprep.mubr.msk.bf16.mxu0 %vm11490_vm3, %v11489_v3  ;;  %v4821_v42 = vsel %vm319_vm1, %v8038_v38, 0  ;;  %v1042_v38 = vpack.c.bf16 %v11574_v9, %v1030_v21  ;;  %v8046_v9 = vld [vmem:[%s11549_s25 + $0x3e] sm:$0x3]  ;;  %v4789_v21 = vld [vmem:[%s11554_s28 + $0xa2] sm:$0xff] }
 0x101   : > { %8709 = vmatmul.mubr.msk.bf16.vlgmr.msra.gmra.mrb[0].mxu1 %vm297_vm2, %v890_v61  ;;  %9441 = vmatmul.mubr.msk.bf16.gmra.mrb[12].mxu0 %vm297_vm2, %v4493_v62  ;;  %v12123_v61 = vld [vmem:[%s11554_s28 + $0x64] sm:$0xff]  ;;  %v12126_v62 = vld [vmem:[%s11554_s28 + $0x6c] sm:$0xff] }
 0x102   : > { %8712 = vmatprep.mubr.msk.bf16.mxu1 %vm11490_vm3, %v11489_v3  ;;  %8737 = vmatpush3.bf16.msra.mxu1 %v1071_v43  ;;  %v896_v43 = vpack.c.bf16 %v12126_v62, %v12123_v61 }
 0x103   : > { %9444 = vmatprep.mubr.msk.bf16.mxu0 %vm11490_vm3, %v11489_v3  ;;  %8766 = vmatprep.subr.bf16.mxu1 %v11489_v3 }
 0x109   : > { %8713 = vmatmul.mubr.msk.bf16.gmra.mrb[4].mxu1 %vm297_vm2, %v891_v49  ;;  %9445 = vmatmul.mubr.msk.bf16.gmra.mrb[16].mxu0 %vm297_vm2, %v4494_v27  ;;  %v7846_v49 = vld [vmem:[%s11549_s25 + $0xc] sm:$0x3]  ;;  %v1040_v27 = vpack.c.bf16 %v1027_v48, %v1026_v41  ;;  %v1178_v41 = vld [vmem:[%s11554_s28 + $0x16] sm:$0xff]  ;;  %v12241_v48 = vld [vmem:[%s11554_s28 + $0x1e] sm:$0xff] }
 0x10a   : > { %8716 = vmatprep.mubr.msk.bf16.mxu1 %vm11490_vm3, %v11489_v3  ;;  %9448 = vmatprep.mubr.msk.bf16.mxu0 %vm11490_vm3, %v11489_v3  ;;  %v1221_v59 = vsel %vm319_vm1, %v7846_v49, 0  ;;  %v12244_v49 = vld [vmem:[%s11554_s28 + $0x7a] sm:$0xff] }
 0x111   : > { %8717 = vmatmul.mubr.msk.bf16.gmra.mrb[8].mxu1 %vm297_vm2, %v892_v17  ;;  %9449 = vmatmul.mubr.msk.bf16.gmra.mrb[20].mxu0 %vm297_vm2, %v4495_v20  ;;  %v12154_v17 = vld [vmem:[%s11554_s28 + $0x79] sm:$0xff]  ;;  %v4635_v20 = vld [vmem:[%s11554_s28 + $0x81] sm:$0xff] }
 0x112   : > { %8720 = vmatprep.mubr.msk.bf16.mxu1 %vm11490_vm3, %v11489_v3  ;;  %9452 = vmatprep.mubr.msk.bf16.mxu0 %vm11490_vm3, %v11489_v3  ;;  %v4644_v28 = vpack.c.bf16 %v4635_v20, %v12154_v17 }
 0x119   : > { %8721 = vmatmul.mubr.msk.bf16.gmra.mrb[12].mxu1 %vm297_vm2, %v893_v29  ;;  %9453 = vmatmul.mubr.msk.bf16.gmra.mrb[24].mxu0 %vm297_vm2, %v4496_v54  ;;  %v4636_v29 = vld [vmem:[%s11554_s28 + $0x89] sm:$0xff]  ;;  %v4637_v54 = vld [vmem:[%s11554_s28 + $0x91] sm:$0xff] }
 0x11a   : > { %8724 = vmatprep.mubr.msk.bf16.mxu1 %vm11490_vm3, %v11489_v3  ;;  %9458 = vmatprep.mubr.msk.bf16.mxu0 %vm11490_vm3, %v11489_v3 }
 0x121   : > { %8725 = vmatmul.mubr.msk.bf16.gmra.mrb[16].mxu1 %vm297_vm2, %v894_v35  ;;  %9459 = vmatmul.mubr.msk.bf16.vlgmr.msra.gmra.mrb[0].mxu0 %vm297_vm2, %v4640_v6  ;;  %v4645_v35 = vpack.c.bf16 %v4637_v54, %v4636_v29  ;;  %v4638_v6 = vld [vmem:[%s11554_s28 + $0x99] sm:$0xff]  ;;  %v1193_v29 = vpack.c.bf16 %v11685_v44, %v11663_v37  ;;  %v1195_v44 = vpack.c.bf16 %v11734_v56, %v11716_v51 }
 0x122   : > { %9487 = vmatpush3.bf16.msra.mxu0 %v4821_v42  ;;  %8728 = vmatprep.mubr.msk.bf16.mxu1 %vm11490_vm3, %v11489_v3  ;;  %v4639_v42 = vld [vmem:[%s11554_s28 + $0xa1] sm:$0xff]  ;;  %v4942_v51 = vpack.c.bf16 %v12027_v52, %v12011_v26  ;;  %v12312_v56 = vld [vmem:[%s11554_s28 + $0x73] sm:$0xff] }
 0x123   : > { %9462 = vmatprep.mubr.msk.bf16.mxu0 %vm11490_vm3, %v11489_v3  ;;  %9516 = vmatprep.subr.bf16.mxu0 %v11489_v3 }
 0x129   : > { %8729 = vmatmul.mubr.msk.bf16.gmra.mrb[20].mxu1 %vm297_vm2, %v895_v15  ;;  %9463 = vmatmul.mubr.msk.bf16.gmra.mrb[4].mxu0 %vm297_vm2, %v4641_v22  ;;  %v1043_v15 = vpack.c.bf16 %v11598_v18, %v11577_v10  ;;  %v4646_v22 = vpack.c.bf16 %v4639_v42, %v4638_v6  ;;  %v4971_v10 = vsel %vm319_vm1, %v8046_v9, 0  ;;  %v1045_v18 = vpack.c.bf16 %v11636_v30, %v11621_v25  ;;  %v1331_v6 = vld [vmem:[%s11554_s28 + $0x36] sm:$0xff]  ;;  %v4936_v42 = vld [vmem:[%s11554_s28 + $0x8b] sm:$0xff] }
 0x12a   : > { %8732 = vmatprep.mubr.msk.bf16.mxu1 %vm11490_vm3, %v11489_v3  ;;  %9466 = vmatprep.mubr.msk.bf16.mxu0 %vm11490_vm3, %v11489_v3  ;;  %v4792_v30 = vpack.c.bf16 %v11917_v32, %v11902_v11 }
 0x131   : > { %8733 = vmatmul.mubr.msk.bf16.gmra.mrb[24].mxu1 %vm297_vm2, %v896_v43  ;;  %9467 = vmatmul.mubr.msk.bf16.gmra.mrb[8].mxu0 %vm297_vm2, %v4642_v23  ;;  %v1044_v43 = vpack.c.bf16 %v11618_v24, %v11601_v19  ;;  %v4790_v23 = vpack.c.bf16 %v11884_v1, %v11872_v55  ;;  %v4791_v19 = vpack.c.bf16 %v11899_v8, %v11887_v2  ;;  %v12211_v24 = vld [vmem:[%s11554_s28 + $0x6d] sm:$0xff] }
 0x132   : > { %8738 = vmatprep.mubr.msk.bf16.mxu1 %vm11490_vm3, %v11489_v3  ;;  %9470 = vmatprep.mubr.msk.bf16.mxu0 %vm11490_vm3, %v11489_v3  ;;  %v1046_v25 = vpack.c.bf16 %v12211_v24, %v11639_v31  ;;  %v1176_v55 = vld [vmem:[%s11554_s28 + $0x6] sm:$0xff]  ;;  %v12225_v1 = vld [vmem:[%s11554_s28 + $0xe] sm:$0xff] }
 0x133   : > { %v12228_v31 = vld [vmem:[%s11554_s28 + $0x72] sm:$0xff]  ;;  %v7854_v2 = vld [vmem:[%s11549_s25 + $0xe] sm:$0x3]  ;;  %v1190_v8 = vpack.c.bf16 %v12225_v1, %v1176_v55 }
 0x134   : > { %v4793_v11 = vpack.c.bf16 %v12228_v31, %v11920_v13  ;;  %v1371_v32 = vsel %vm319_vm1, %v7854_v2, 0  ;;  %v1191_v13 = vpack.c.bf16 %v12241_v48, %v1178_v41  ;;  %v12368_v55 = vld [vmem:[%s11554_s28 + $0x56] sm:$0xff] }
 0x139   : > { %8739 = vmatmul.mubr.msk.bf16.vlgmr.msra.gmra.mrb[0].mxu1 %vm297_vm2, %v1040_v27  ;;  %9471 = vmatmul.mubr.msk.bf16.gmra.mrb[12].mxu0 %vm297_vm2, %v4643_v47  ;;  %v4785_v27 = vld [vmem:[%s11554_s28 + $0x82] sm:$0xff] }
 0x13a   : > { %8742 = vmatprep.mubr.msk.bf16.mxu1 %vm11490_vm3, %v11489_v3  ;;  %8767 = vmatpush3.bf16.msra.mxu1 %v1221_v59  ;;  %v4794_v47 = vpack.c.bf16 %v4785_v27, %v12244_v49  ;;  %v1180_v59 = vld [vmem:[%s11554_s28 + $0x26] sm:$0xff]  ;;  %v12409_v27 = vld [vmem:[%s11554_s28 + $0x76] sm:$0xff] }
 0x13b   : > { %9474 = vmatprep.mubr.msk.bf16.mxu0 %vm11490_vm3, %v11489_v3  ;;  %8796 = vmatprep.subr.bf16.mxu1 %v11489_v3  ;;  %v1192_v20 = vpack.c.bf16 %v11660_v36, %v1180_v59  ;;  %v8054_v36 = vld [vmem:[%s11549_s25 + $0x40] sm:$0x3]  ;;  %v1341_v26 = vpack.c.bf16 %v1180_v59, %v12241_v48  ;;  %v12406_v48 = vld [vmem:[%s11554_s28 + $0x6e] sm:$0xff] }
 0x13c   : > { %v5121_v37 = vsel %vm319_vm1, %v8054_v36, 0  ;;  %v12427_v59 = vld [vmem:[%s11554_s28 + $0x74] sm:$0xff] }
 0x13d   : > { %v1481_v36 = vld [vmem:[%s11554_s28 + $0x37] sm:$0xff] }
 0x141   : > { %8743 = vmatmul.mubr.msk.bf16.gmra.mrb[4].mxu1 %vm297_vm2, %v1041_v60  ;;  %9475 = vmatmul.mubr.msk.bf16.gmra.mrb[16].mxu0 %vm297_vm2, %v4644_v28  ;;  %v4795_v60 = vpack.c.bf16 %v4787_v16, %v4786_v12  ;;  %v4788_v28 = vld [vmem:[%s11554_s28 + $0x9a] sm:$0xff]  ;;  %v7870_v12 = vld [vmem:[%s11549_s25 + $0x12] sm:$0x3] }
 0x142   : > { %8746 = vmatprep.mubr.msk.bf16.mxu1 %vm11490_vm3, %v11489_v3  ;;  %9478 = vmatprep.mubr.msk.bf16.mxu0 %vm11490_vm3, %v11489_v3  ;;  %v4796_v54 = vpack.c.bf16 %v4789_v21, %v4788_v28  ;;  %v1671_v16 = vsel %vm319_vm1, %v7870_v12, 0  ;;  %v12440_v28 = vld [vmem:[%s11554_s28 + $0x7c] sm:$0xff]  ;;  %v5085_v21 = vld [vmem:[%s11554_s28 + $0x84] sm:$0xff] }
 0x143   : > { %v1627_v12 = vld [vmem:[%s11554_s28 + $0x18] sm:$0xff] }
 0x149   : > { %8747 = vmatmul.mubr.msk.bf16.gmra.mrb[8].mxu1 %vm297_vm2, %v1042_v38  ;;  %9479 = vmatmul.mubr.msk.bf16.gmra.mrb[20].mxu0 %vm297_vm2, %v4645_v35  ;;  %v1194_v38 = vpack.c.bf16 %v11713_v50, %v11688_v45  ;;  %v4940_v35 = vpack.c.bf16 %v11992_v14, %v11977_v63  ;;  %v4941_v45 = vpack.c.bf16 %v12008_v46, %v11995_v39  ;;  %v7862_v63 = vld [vmem:[%s11549_s25 + $0x10] sm:$0x3]  ;;  %v12324_v39 = vld [vmem:[%s11554_s28 + $0x7b] sm:$0xff]  ;;  %v4935_v46 = vld [vmem:[%s11554_s28 + $0x83] sm:$0xff] }
 0x14a   : > { %8750 = vmatprep.mubr.msk.bf16.mxu1 %vm11490_vm3, %v11489_v3  ;;  %9482 = vmatprep.mubr.msk.bf16.mxu0 %vm11490_vm3, %v11489_v3  ;;  %v1196_v50 = vpack.c.bf16 %v11750_v0, %v11737_v57  ;;  %v1340_v57 = vpack.c.bf16 %v1178_v41, %v12225_v1  ;;  %v4943_v0 = vpack.c.bf16 %v12312_v56, %v12030_v33  ;;  %v1521_v14 = vsel %vm319_vm1, %v7862_v63, 0  ;;  %v1330_v33 = vld [vmem:[%s11554_s28 + $0x2e] sm:$0xff]  ;;  %v8062_v1 = vld [vmem:[%s11549_s25 + $0x42] sm:$0x3]  ;;  %v12387_v41 = vld [vmem:[%s11554_s28 + $0x66] sm:$0xff] }
 0x14b   : > { %v4944_v52 = vpack.c.bf16 %v4935_v46, %v12324_v39  ;;  %v5089_v63 = vld [vmem:[%s11554_s28 + $0xa4] sm:$0xff]  ;;  %v12480_v46 = vld [vmem:[%s11554_s28 + $0x57] sm:$0xff] }
 0x151   : > { %8751 = vmatmul.mubr.msk.bf16.gmra.mrb[12].mxu1 %vm297_vm2, %v1043_v15  ;;  %9483 = vmatmul.mubr.msk.bf16.gmra.mrb[24].mxu0 %vm297_vm2, %v4646_v22  ;;  %v4937_v15 = vld [vmem:[%s11554_s28 + $0x93] sm:$0xff]  ;;  %v1342_v22 = vpack.c.bf16 %v1331_v6, %v1330_v33  ;;  %v8070_v33 = vld [vmem:[%s11549_s25 + $0x44] sm:$0x3] }
 0x152   : > { %8754 = vmatprep.mubr.msk.bf16.mxu1 %vm11490_vm3, %v11489_v3  ;;  %9488 = vmatprep.mubr.msk.bf16.mxu0 %vm11490_vm3, %v11489_v3  ;;  %v4945_v9 = vpack.c.bf16 %v4937_v15, %v4936_v42  ;;  %v5421_v15 = vsel %vm319_vm1, %v8070_v33, 0 }
 0x159   : > { %8755 = vmatmul.mubr.msk.bf16.gmra.mrb[16].mxu1 %vm297_vm2, %v1044_v43  ;;  %9489 = vmatmul.mubr.msk.bf16.vlgmr.msra.gmra.mrb[0].mxu0 %vm297_vm2, %v4790_v23  ;;  %v1332_v43 = vld [vmem:[%s11554_s28 + $0x3e] sm:$0xff]  ;;  %v12350_v23 = vld [vmem:[%s11554_s28 + $0x46] sm:$0xff] }
 0x15a   : > { %9517 = vmatpush3.bf16.msra.mxu0 %v4971_v10  ;;  %8758 = vmatprep.mubr.msk.bf16.mxu1 %vm11490_vm3, %v11489_v3  ;;  %v4938_v10 = vld [vmem:[%s11554_s28 + $0x9b] sm:$0xff] }
 0x15b   : > { %9492 = vmatprep.mubr.msk.bf16.mxu0 %vm11490_vm3, %v11489_v3  ;;  %9546 = vmatprep.subr.bf16.mxu0 %v11489_v3 }
 0x161   : > { %8759 = vmatmul.mubr.msk.bf16.gmra.mrb[20].mxu1 %vm297_vm2, %v1045_v18  ;;  %9493 = vmatmul.mubr.msk.bf16.gmra.mrb[4].mxu0 %vm297_vm2, %v4791_v19  ;;  %v4939_v18 = vld [vmem:[%s11554_s28 + $0xa3] sm:$0xff]  ;;  %v12355_v19 = vpack.c.bf16 %v12350_v23, %v1332_v43  ;;  %v5228_v43 = vld [vmem:[%s11554_s28 + $0x4d] sm:$0xff] }
 0x162   : > { %8762 = vmatprep.mubr.msk.bf16.mxu1 %vm11490_vm3, %v11489_v3  ;;  %9496 = vmatprep.mubr.msk.bf16.mxu0 %vm11490_vm3, %v11489_v3 }
 0x169   : > { %8763 = vmatmul.mubr.msk.bf16.gmra.mrb[24].mxu1 %vm297_vm2, %v1046_v25  ;;  %9497 = vmatmul.mubr.msk.bf16.gmra.mrb[8].mxu0 %vm297_vm2, %v4792_v30  ;;  %v4946_v25 = vpack.c.bf16 %v4939_v18, %v4938_v10  ;;  %v12365_v30 = vld [vmem:[%s11554_s28 + $0x4e] sm:$0xff] }
 0x16a   : > { %8768 = vmatprep.mubr.msk.bf16.mxu1 %vm11490_vm3, %v11489_v3  ;;  %9500 = vmatprep.mubr.msk.bf16.mxu0 %vm11490_vm3, %v11489_v3  ;;  %v12373_v2 = vpack.c.bf16 %v12368_v55, %v12365_v30  ;;  %v5229_v10 = vld [vmem:[%s11554_s28 + $0x55] sm:$0xff] }
 0x171   : > { %8769 = vmatmul.mubr.msk.bf16.vlgmr.msra.gmra.mrb[0].mxu1 %vm297_vm2, %v1190_v8  ;;  %9501 = vmatmul.mubr.msk.bf16.gmra.mrb[12].mxu0 %vm297_vm2, %v4793_v11  ;;  %v5090_v8 = vpack.c.bf16 %v12088_v4, %v12076_v53  ;;  %v5271_v11 = vsel %vm319_vm1, %v8062_v1, 0  ;;  %v5091_v4 = vpack.c.bf16 %v12104_v40, %v12091_v34  ;;  %v12413_v34 = vpack.c.bf16 %v12409_v27, %v12406_v48  ;;  %v12508_v1 = vld [vmem:[%s11554_s28 + $0x6f] sm:$0xff] }
 0x172   : > { %8772 = vmatprep.mubr.msk.bf16.mxu1 %vm11490_vm3, %v11489_v3  ;;  %8797 = vmatpush3.bf16.msra.mxu1 %v1371_v32  ;;  %v12384_v32 = vld [vmem:[%s11554_s28 + $0x5e] sm:$0xff]  ;;  %v5092_v40 = vpack.c.bf16 %v12123_v61, %v12107_v58  ;;  %v5093_v61 = vpack.c.bf16 %v12427_v59, %v12126_v62 }
 0x173   : > { %9504 = vmatprep.mubr.msk.bf16.mxu0 %vm11490_vm3, %v11489_v3  ;;  %8826 = vmatprep.subr.bf16.mxu1 %v11489_v3  ;;  %v12394_v53 = vpack.c.bf16 %v12387_v41, %v12384_v32 }
 0x179   : > { %8773 = vmatmul.mubr.msk.bf16.gmra.mrb[4].mxu1 %vm297_vm2, %v1191_v13  ;;  %9505 = vmatmul.mubr.msk.bf16.gmra.mrb[16].mxu0 %vm297_vm2, %v4794_v47  ;;  %v1476_v13 = vld [vmem:[%s11554_s28 + $0xf] sm:$0xff]  ;;  %v1477_v47 = vld [vmem:[%s11554_s28 + $0x17] sm:$0xff] }
 0x17a   : > { %8776 = vmatprep.mubr.msk.bf16.mxu1 %vm11490_vm3, %v11489_v3  ;;  %9508 = vmatprep.mubr.msk.bf16.mxu0 %vm11490_vm3, %v11489_v3  ;;  %v1490_v58 = vpack.c.bf16 %v1477_v47, %v1476_v13  ;;  %v1626_v47 = vld [vmem:[%s11554_s28 + $0x10] sm:$0xff] }
 0x181   : > { %8777 = vmatmul.mubr.msk.bf16.gmra.mrb[8].mxu1 %vm297_vm2, %v1192_v20  ;;  %9509 = vmatmul.mubr.msk.bf16.gmra.mrb[20].mxu0 %vm297_vm2, %v4795_v60  ;;  %v1478_v20 = vld [vmem:[%s11554_s28 + $0x1f] sm:$0xff]  ;;  %v1479_v60 = vld [vmem:[%s11554_s28 + $0x27] sm:$0xff] }
 0x182   : > { %8780 = vmatprep.mubr.msk.bf16.mxu1 %vm11490_vm3, %v11489_v3  ;;  %9512 = vmatprep.mubr.msk.bf16.mxu0 %vm11490_vm3, %v11489_v3  ;;  %v1491_v62 = vpack.c.bf16 %v1479_v60, %v1478_v20 }
 0x189   : > { %8781 = vmatmul.mubr.msk.bf16.gmra.mrb[12].mxu1 %vm297_vm2, %v1193_v29  ;;  %9513 = vmatmul.mubr.msk.bf16.gmra.mrb[24].mxu0 %vm297_vm2, %v4796_v54  ;;  %v5094_v29 = vpack.c.bf16 %v5085_v21, %v12440_v28  ;;  %v1480_v54 = vld [vmem:[%s11554_s28 + $0x2f] sm:$0xff]  ;;  %v1628_v21 = vld [vmem:[%s11554_s28 + $0x20] sm:$0xff] }
 0x18a   : > { %8784 = vmatprep.mubr.msk.bf16.mxu1 %vm11490_vm3, %v11489_v3  ;;  %9518 = vmatprep.mubr.msk.bf16.mxu0 %vm11490_vm3, %v11489_v3 }
 0x191   : > { %8785 = vmatmul.mubr.msk.bf16.gmra.mrb[16].mxu1 %vm297_vm2, %v1194_v38  ;;  %9519 = vmatmul.mubr.msk.bf16.vlgmr.msra.gmra.mrb[0].mxu0 %vm297_vm2, %v4940_v35  ;;  %v5086_v38 = vld [vmem:[%s11554_s28 + $0x8c] sm:$0xff]  ;;  %v5087_v35 = vld [vmem:[%s11554_s28 + $0x94] sm:$0xff] }
 0x192   : > { %9547 = vmatpush3.bf16.msra.mxu0 %v5121_v37  ;;  %8788 = vmatprep.mubr.msk.bf16.mxu1 %vm11490_vm3, %v11489_v3  ;;  %v1492_v37 = vpack.c.bf16 %v1481_v36, %v1480_v54  ;;  %v5235_v54 = vld [vmem:[%s11554_s28 + $0x85] sm:$0xff] }
 0x193   : > { %9522 = vmatprep.mubr.msk.bf16.mxu0 %vm11490_vm3, %v11489_v3  ;;  %9576 = vmatprep.subr.bf16.mxu0 %v11489_v3 }
 0x199   : > { %8789 = vmatmul.mubr.msk.bf16.gmra.mrb[20].mxu1 %vm297_vm2, %v1195_v44  ;;  %9523 = vmatmul.mubr.msk.bf16.gmra.mrb[4].mxu0 %vm297_vm2, %v4941_v45  ;;  %v5095_v44 = vpack.c.bf16 %v5087_v35, %v5086_v38  ;;  %v1482_v45 = vld [vmem:[%s11554_s28 + $0x3f] sm:$0xff]  ;;  %v1630_v38 = vld [vmem:[%s11554_s28 + $0x30] sm:$0xff] }
 0x19a   : > { %8792 = vmatprep.mubr.msk.bf16.mxu1 %vm11490_vm3, %v11489_v3  ;;  %9526 = vmatprep.mubr.msk.bf16.mxu0 %vm11490_vm3, %v11489_v3  ;;  %v1631_v35 = vld [vmem:[%s11554_s28 + $0x38] sm:$0xff] }
 0x1a1   : > { %8793 = vmatmul.mubr.msk.bf16.gmra.mrb[24].mxu1 %vm297_vm2, %v1196_v50  ;;  %9527 = vmatmul.mubr.msk.bf16.gmra.mrb[8].mxu0 %vm297_vm2, %v4942_v51  ;;  %v12465_v50 = vld [vmem:[%s11554_s28 + $0x47] sm:$0xff]  ;;  %v5088_v51 = vld [vmem:[%s11554_s28 + $0x9c] sm:$0xff] }
 0x1a2   : > { %8798 = vmatprep.mubr.msk.bf16.mxu1 %vm11490_vm3, %v11489_v3  ;;  %9530 = vmatprep.mubr.msk.bf16.mxu0 %vm11490_vm3, %v11489_v3 }
 0x1a9   : > { %8799 = vmatmul.mubr.msk.bf16.vlgmr.msra.gmra.mrb[0].mxu1 %vm297_vm2, %v1340_v57  ;;  %9531 = vmatmul.mubr.msk.bf16.gmra.mrb[12].mxu0 %vm297_vm2, %v4943_v0  ;;  %v1493_v57 = vpack.c.bf16 %v12465_v50, %v1482_v45  ;;  %v5096_v0 = vpack.c.bf16 %v5089_v63, %v5088_v51  ;;  %v1642_v45 = vpack.c.bf16 %v1631_v35, %v1630_v38  ;;  %v1632_v63 = vld [vmem:[%s11554_s28 + $0x40] sm:$0xff]  ;;  %v12664_v35 = vld [vmem:[%s11554_s28 + $0x49] sm:$0xff] }
 0x1aa   : > { %8802 = vmatprep.mubr.msk.bf16.mxu1 %vm11490_vm3, %v11489_v3  ;;  %8827 = vmatpush3.bf16.msra.mxu1 %v1521_v14  ;;  %v12473_v14 = vld [vmem:[%s11554_s28 + $0x4f] sm:$0xff]  ;;  %v1782_v38 = vld [vmem:[%s11554_s28 + $0x41] sm:$0xff] }
 0x1ab   : > { %9534 = vmatprep.mubr.msk.bf16.mxu0 %vm11490_vm3, %v11489_v3  ;;  %8856 = vmatprep.subr.bf16.mxu1 %v11489_v3  ;;  %v1494_v6 = vpack.c.bf16 %v12480_v46, %v12473_v14 }
 0x1b1   : > { %8803 = vmatmul.mubr.msk.bf16.gmra.mrb[4].mxu1 %vm297_vm2, %v1341_v26  ;;  %9535 = vmatmul.mubr.msk.bf16.gmra.mrb[16].mxu0 %vm297_vm2, %v4944_v52  ;;  %v5226_v26 = vld [vmem:[%s11554_s28 + $0x3d] sm:$0xff]  ;;  %v5227_v52 = vld [vmem:[%s11554_s28 + $0x45] sm:$0xff] }
 0x1b2   : > { %8806 = vmatprep.mubr.msk.bf16.mxu1 %vm11490_vm3, %v11489_v3  ;;  %9538 = vmatprep.mubr.msk.bf16.mxu0 %vm11490_vm3, %v11489_v3  ;;  %v5240_v42 = vpack.c.bf16 %v5227_v52, %v5226_v26  ;;  %v5239_v26 = vld [vmem:[%s11554_s28 + $0xa5] sm:$0xff] }
 0x1b9   : > { %8807 = vmatmul.mubr.msk.bf16.gmra.mrb[8].mxu1 %vm297_vm2, %v1342_v22  ;;  %9539 = vmatmul.mubr.msk.bf16.gmra.mrb[20].mxu0 %vm297_vm2, %v4945_v9  ;;  %v12491_v22 = vld [vmem:[%s11554_s28 + $0x5f] sm:$0xff]  ;;  %v12496_v9 = vld [vmem:[%s11554_s28 + $0x67] sm:$0xff] }
 0x1ba   : > { %8810 = vmatprep.mubr.msk.bf16.mxu1 %vm11490_vm3, %v11489_v3  ;;  %9542 = vmatprep.mubr.msk.bf16.mxu0 %vm11490_vm3, %v11489_v3  ;;  %v1495_v18 = vpack.c.bf16 %v12496_v9, %v12491_v22 }
 0x1c1   : > { %8811 = vmatmul.mubr.msk.bf16.gmra.mrb[12].mxu1 %vm297_vm2, %v12355_v19  ;;  %9543 = vmatmul.mubr.msk.bf16.gmra.mrb[24].mxu0 %vm297_vm2, %v4946_v25  ;;  %v5241_v25 = vpack.c.bf16 %v5229_v10, %v5228_v43 }
 0x1c2   : > { %8814 = vmatprep.mubr.msk.bf16.mxu1 %vm11490_vm3, %v11489_v3  ;;  %9548 = vmatprep.mubr.msk.bf16.mxu0 %vm11490_vm3, %v11489_v3 }
 0x1c9   : > { %8815 = vmatmul.mubr.msk.bf16.gmra.mrb[16].mxu1 %vm297_vm2, %v12373_v2  ;;  %9549 = vmatmul.mubr.msk.bf16.vlgmr.msra.gmra.mrb[0].mxu0 %vm297_vm2, %v5090_v8  ;;  %v12515_v8 = vld [vmem:[%s11554_s28 + $0x77] sm:$0xff] }
 0x1ca   : > { %9577 = vmatpush3.bf16.msra.mxu0 %v5271_v11  ;;  %8818 = vmatprep.mubr.msk.bf16.mxu1 %vm11490_vm3, %v11489_v3  ;;  %v5230_v11 = vld [vmem:[%s11554_s28 + $0x5d] sm:$0xff] }
 0x1cb   : > { %9552 = vmatprep.mubr.msk.bf16.mxu0 %vm11490_vm3, %v11489_v3  ;;  %9606 = vmatprep.subr.bf16.mxu0 %v11489_v3 }
 0x1d1   : > { %8819 = vmatmul.mubr.msk.bf16.gmra.mrb[20].mxu1 %vm297_vm2, %v12394_v53  ;;  %9553 = vmatmul.mubr.msk.bf16.gmra.mrb[4].mxu0 %vm297_vm2, %v5091_v4  ;;  %v5231_v4 = vld [vmem:[%s11554_s28 + $0x65] sm:$0xff] }
 0x1d2   : > { %8822 = vmatprep.mubr.msk.bf16.mxu1 %vm11490_vm3, %v11489_v3  ;;  %9556 = vmatprep.mubr.msk.bf16.mxu0 %vm11490_vm3, %v11489_v3  ;;  %v5242_v13 = vpack.c.bf16 %v5231_v4, %v5230_v11  ;;  %v12610_v4 = vld [vmem:[%s11554_s28 + $0x78] sm:$0xff] }
 0x1d9   : > { %8823 = vmatmul.mubr.msk.bf16.gmra.mrb[24].mxu1 %vm297_vm2, %v12413_v34  ;;  %9557 = vmatmul.mubr.msk.bf16.gmra.mrb[8].mxu0 %vm297_vm2, %v5092_v40  ;;  %v1496_v40 = vpack.c.bf16 %v12515_v8, %v12508_v1 }
 0x1da   : > { %8828 = vmatprep.mubr.msk.bf16.mxu1 %vm11490_vm3, %v11489_v3  ;;  %9560 = vmatprep.mubr.msk.bf16.mxu0 %vm11490_vm3, %v11489_v3 }
 0x1e1   : > { %8829 = vmatmul.mubr.msk.bf16.vlgmr.msra.gmra.mrb[0].mxu1 %vm297_vm2, %v1490_v58  ;;  %9561 = vmatmul.mubr.msk.bf16.gmra.mrb[12].mxu0 %vm297_vm2, %v5093_v61  ;;  %v5233_v58 = vld [vmem:[%s11554_s28 + $0x75] sm:$0xff] }
 0x1e2   : > { %8832 = vmatprep.mubr.msk.bf16.mxu1 %vm11490_vm3, %v11489_v3  ;;  %8857 = vmatpush3.bf16.msra.mxu1 %v1671_v16  ;;  %v7878_v61 = vld [vmem:[%s11549_s25 + $0x14] sm:$0x3]  ;;  %v1640_v16 = vpack.c.bf16 %v1627_v12, %v1626_v47  ;;  %v5243_v20 = vpack.c.bf16 %v5233_v58, %v12211_v24  ;;  %v7886_v47 = vld [vmem:[%s11549_s25 + $0x16] sm:$0x3] }
 0x1e3   : > { %9564 = vmatprep.mubr.msk.bf16.mxu0 %vm11490_vm3, %v11489_v3  ;;  %8886 = vmatprep.subr.bf16.mxu1 %v11489_v3  ;;  %v1821_v60 = vsel %vm319_vm1, %v7878_v61, 0  ;;  %v1971_v58 = vsel %vm319_vm1, %v7886_v47, 0  ;;  %v1779_v61 = vld [vmem:[%s11554_s28 + $0x29] sm:$0xff] }
 0x1e9   : > { %8833 = vmatmul.mubr.msk.bf16.gmra.mrb[4].mxu1 %vm297_vm2, %v1491_v62  ;;  %9565 = vmatmul.mubr.msk.bf16.gmra.mrb[16].mxu0 %vm297_vm2, %v5094_v29  ;;  %v1629_v62 = vld [vmem:[%s11554_s28 + $0x28] sm:$0xff]  ;;  %v5234_v29 = vld [vmem:[%s11554_s28 + $0x7d] sm:$0xff] }
 0x1ea   : > { %8836 = vmatprep.mubr.msk.bf16.mxu1 %vm11490_vm3, %v11489_v3  ;;  %9568 = vmatprep.mubr.msk.bf16.mxu0 %vm11490_vm3, %v11489_v3  ;;  %v1641_v24 = vpack.c.bf16 %v1629_v62, %v1628_v21  ;;  %v5244_v36 = vpack.c.bf16 %v5235_v54, %v5234_v29  ;;  %v1780_v21 = vld [vmem:[%s11554_s28 + $0x31] sm:$0xff]  ;;  %v1781_v62 = vld [vmem:[%s11554_s28 + $0x39] sm:$0xff] }
 0x1eb   : > { %v5386_v29 = vld [vmem:[%s11554_s28 + $0x8e] sm:$0xff]  ;;  %v12653_v54 = vld [vmem:[%s11554_s28 + $0x96] sm:$0xff] }
 0x1f1   : > { %8837 = vmatmul.mubr.msk.bf16.gmra.mrb[8].mxu1 %vm297_vm2, %v1492_v37  ;;  %9569 = vmatmul.mubr.msk.bf16.gmra.mrb[20].mxu0 %vm297_vm2, %v5095_v44  ;;  %v5236_v37 = vld [vmem:[%s11554_s28 + $0x8d] sm:$0xff]  ;;  %v5237_v44 = vld [vmem:[%s11554_s28 + $0x95] sm:$0xff] }
 0x1f2   : > { %8840 = vmatprep.mubr.msk.bf16.mxu1 %vm11490_vm3, %v11489_v3  ;;  %9572 = vmatprep.mubr.msk.bf16.mxu0 %vm11490_vm3, %v11489_v3  ;;  %v5245_v51 = vpack.c.bf16 %v5237_v44, %v5236_v37  ;;  %v5388_v37 = vld [vmem:[%s11554_s28 + $0x9e] sm:$0xff]  ;;  %v12668_v44 = vld [vmem:[%s11554_s28 + $0xa6] sm:$0xff] }
 0x1f9   : > { %8841 = vmatmul.mubr.msk.bf16.gmra.mrb[12].mxu1 %vm297_vm2, %v1493_v57  ;;  %9573 = vmatmul.mubr.msk.bf16.gmra.mrb[24].mxu0 %vm297_vm2, %v5096_v0  ;;  %v12562_v57 = vld [vmem:[%s11554_s28 + $0x48] sm:$0xff]  ;;  %v5238_v0 = vld [vmem:[%s11554_s28 + $0x9d] sm:$0xff] }
 0x1fa   : > { %8844 = vmatprep.mubr.msk.bf16.mxu1 %vm11490_vm3, %v11489_v3  ;;  %9578 = vmatprep.mubr.msk.bf16.mxu0 %vm11490_vm3, %v11489_v3  ;;  %v1643_v52 = vpack.c.bf16 %v12562_v57, %v1632_v63  ;;  %v5246_v33 = vpack.c.bf16 %v5239_v26, %v5238_v0  ;;  %v12679_v63 = vld [vmem:[%s11554_s28 + $0x51] sm:$0xff]  ;;  %v12682_v0 = vld [vmem:[%s11554_s28 + $0x59] sm:$0xff]  ;;  %v8086_v26 = vld [vmem:[%s11549_s25 + $0x48] sm:$0x3] }
 0x201   : > { %8845 = vmatmul.mubr.msk.bf16.gmra.mrb[16].mxu1 %vm297_vm2, %v1494_v6  ;;  %9579 = vmatmul.mubr.msk.bf16.vlgmr.msra.gmra.mrb[0].mxu0 %vm297_vm2, %v5240_v42  ;;  %v12574_v6 = vld [vmem:[%s11554_s28 + $0x50] sm:$0xff]  ;;  %v12577_v42 = vld [vmem:[%s11554_s28 + $0x58] sm:$0xff] }
 0x202   : > { %9607 = vmatpush3.bf16.msra.mxu0 %v5421_v15  ;;  %8848 = vmatprep.mubr.msk.bf16.mxu1 %vm11490_vm3, %v11489_v3  ;;  %v8078_v15 = vld [vmem:[%s11549_s25 + $0x46] sm:$0x3]  ;;  %v1644_v43 = vpack.c.bf16 %v12577_v42, %v12574_v6 }
 0x203   : > { %9582 = vmatprep.mubr.msk.bf16.mxu0 %vm11490_vm3, %v11489_v3  ;;  %9636 = vmatprep.subr.bf16.mxu0 %v11489_v3  ;;  %v5571_v10 = vsel %vm319_vm1, %v8078_v15, 0  ;;  %v5721_v15 = vsel %vm319_vm1, %v8086_v26, 0  ;;  %v12815_v26 = vld [vmem:[%s11554_s28 + $0x7f] sm:$0xff] }
 0x209   : > { %8849 = vmatmul.mubr.msk.bf16.gmra.mrb[20].mxu1 %vm297_vm2, %v1495_v18  ;;  %9583 = vmatmul.mubr.msk.bf16.gmra.mrb[4].mxu0 %vm297_vm2, %v5241_v25  ;;  %v12589_v18 = vld [vmem:[%s11554_s28 + $0x60] sm:$0xff]  ;;  %v12592_v25 = vld [vmem:[%s11554_s28 + $0x68] sm:$0xff] }
 0x20a   : > { %8852 = vmatprep.mubr.msk.bf16.mxu1 %vm11490_vm3, %v11489_v3  ;;  %9586 = vmatprep.mubr.msk.bf16.mxu0 %vm11490_vm3, %v11489_v3  ;;  %v1645_v11 = vpack.c.bf16 %v12592_v25, %v12589_v18 }
 0x211   : > { %8853 = vmatmul.mubr.msk.bf16.gmra.mrb[24].mxu1 %vm297_vm2, %v1496_v40  ;;  %9587 = vmatmul.mubr.msk.bf16.gmra.mrb[8].mxu0 %vm297_vm2, %v5242_v13  ;;  %v1777_v13 = vld [vmem:[%s11554_s28 + $0x19] sm:$0xff] }
 0x212   : > { %8858 = vmatprep.mubr.msk.bf16.mxu1 %vm11490_vm3, %v11489_v3  ;;  %9590 = vmatprep.mubr.msk.bf16.mxu0 %vm11490_vm3, %v11489_v3 }
 0x219   : > { %8859 = vmatmul.mubr.msk.bf16.vlgmr.msra.gmra.mrb[0].mxu1 %vm297_vm2, %v1640_v16  ;;  %9591 = vmatmul.mubr.msk.bf16.gmra.mrb[12].mxu0 %vm297_vm2, %v5243_v20  ;;  %v12633_v16 = vld [vmem:[%s11554_s28 + $0x7e] sm:$0xff]  ;;  %v12636_v20 = vld [vmem:[%s11554_s28 + $0x86] sm:$0xff] }
 0x21a   : > { %8862 = vmatprep.mubr.msk.bf16.mxu1 %vm11490_vm3, %v11489_v3  ;;  %8887 = vmatpush3.bf16.msra.mxu1 %v1821_v60  ;;  %v5394_v60 = vpack.c.bf16 %v12636_v20, %v12633_v16  ;;  %v5544_v47 = vpack.c.bf16 %v5386_v29, %v12636_v20  ;;  %v12756_v20 = vld [vmem:[%s11554_s28 + $0x4a] sm:$0xff] }
 0x21b   : > { %9594 = vmatprep.mubr.msk.bf16.mxu0 %vm11490_vm3, %v11489_v3  ;;  %8916 = vmatprep.subr.bf16.mxu1 %v11489_v3 }
 0x221   : > { %8863 = vmatmul.mubr.msk.bf16.gmra.mrb[4].mxu1 %vm297_vm2, %v1641_v24  ;;  %9595 = vmatmul.mubr.msk.bf16.gmra.mrb[16].mxu0 %vm297_vm2, %v5244_v36  ;;  %v1792_v24 = vpack.c.bf16 %v1781_v62, %v1780_v21  ;;  %v5395_v36 = vpack.c.bf16 %v12653_v54, %v5386_v29  ;;  %v12768_v62 = vld [vmem:[%s11554_s28 + $0x52] sm:$0xff]  ;;  %v12771_v29 = vld [vmem:[%s11554_s28 + $0x5a] sm:$0xff] }
 0x222   : > { %8866 = vmatprep.mubr.msk.bf16.mxu1 %vm11490_vm3, %v11489_v3  ;;  %9598 = vmatprep.mubr.msk.bf16.mxu0 %vm11490_vm3, %v11489_v3 }
 0x229   : > { %8867 = vmatmul.mubr.msk.bf16.gmra.mrb[8].mxu1 %vm297_vm2, %v1642_v45  ;;  %9599 = vmatmul.mubr.msk.bf16.gmra.mrb[20].mxu0 %vm297_vm2, %v5245_v51  ;;  %v1793_v45 = vpack.c.bf16 %v12664_v35, %v1782_v38  ;;  %v5396_v51 = vpack.c.bf16 %v12668_v44, %v5388_v37 }
 0x22a   : > { %8870 = vmatprep.mubr.msk.bf16.mxu1 %vm11490_vm3, %v11489_v3  ;;  %9602 = vmatprep.mubr.msk.bf16.mxu0 %vm11490_vm3, %v11489_v3 }
 0x231   : > { %8871 = vmatmul.mubr.msk.bf16.gmra.mrb[12].mxu1 %vm297_vm2, %v1643_v52  ;;  %9603 = vmatmul.mubr.msk.bf16.gmra.mrb[24].mxu0 %vm297_vm2, %v5246_v33  ;;  %v1794_v52 = vpack.c.bf16 %v12682_v0, %v12679_v63  ;;  %v5540_v33 = vpack.c.bf16 %v12365_v30, %v12350_v23  ;;  %v5541_v30 = vpack.c.bf16 %v12384_v32, %v12368_v55  ;;  %v1926_v55 = vld [vmem:[%s11554_s28 + $0x12] sm:$0xff]  ;;  %v1927_v32 = vld [vmem:[%s11554_s28 + $0x1a] sm:$0xff] }
 0x232   : > { %8874 = vmatprep.mubr.msk.bf16.mxu1 %vm11490_vm3, %v11489_v3  ;;  %9608 = vmatprep.mubr.msk.bf16.mxu0 %vm11490_vm3, %v11489_v3 }
 0x239   : > { %8875 = vmatmul.mubr.msk.bf16.gmra.mrb[16].mxu1 %vm297_vm2, %v1644_v43  ;;  %9609 = vmatmul.mubr.msk.bf16.vlgmr.msra.gmra.mrb[0].mxu0 %vm297_vm2, %v12355_v19  ;;  %v12607_v19 = vld [vmem:[%s11554_s28 + $0x70] sm:$0xff]  ;;  %v12695_v43 = vld [vmem:[%s11554_s28 + $0x61] sm:$0xff] }
 0x23a   : > { %9637 = vmatpush3.bf16.msra.mxu0 %v5571_v10  ;;  %8878 = vmatprep.mubr.msk.bf16.mxu1 %vm11490_vm3, %v11489_v3  ;;  %v1646_v40 = vpack.c.bf16 %v12610_v4, %v12607_v19  ;;  %v12698_v10 = vld [vmem:[%s11554_s28 + $0x69] sm:$0xff] }
 0x23b   : > { %9612 = vmatprep.mubr.msk.bf16.mxu0 %vm11490_vm3, %v11489_v3  ;;  %9666 = vmatprep.subr.bf16.mxu0 %v11489_v3  ;;  %v1795_v23 = vpack.c.bf16 %v12698_v10, %v12695_v43 }
 0x241   : > { %8879 = vmatmul.mubr.msk.bf16.gmra.mrb[20].mxu1 %vm297_vm2, %v1645_v11  ;;  %9613 = vmatmul.mubr.msk.bf16.gmra.mrb[4].mxu0 %vm297_vm2, %v12373_v2  ;;  %v1776_v2 = vld [vmem:[%s11554_s28 + $0x11] sm:$0xff]  ;;  %v1796_v11 = vpack.c.bf16 %v12154_v17, %v12141_v7  ;;  %v5543_v7 = vpack.c.bf16 %v12633_v16, %v12409_v27  ;;  %v1932_v16 = vld [vmem:[%s11554_s28 + $0x42] sm:$0xff] }
 0x242   : > { %8882 = vmatprep.mubr.msk.bf16.mxu1 %vm11490_vm3, %v11489_v3  ;;  %9616 = vmatprep.mubr.msk.bf16.mxu0 %vm11490_vm3, %v11489_v3  ;;  %v1790_v12 = vpack.c.bf16 %v1777_v13, %v1776_v2  ;;  %v7894_v2 = vld [vmem:[%s11549_s25 + $0x18] sm:$0x3]  ;;  %v1940_v13 = vpack.c.bf16 %v1927_v32, %v1926_v55  ;;  %v5687_v32 = vld [vmem:[%s11554_s28 + $0x9f] sm:$0xff] }
 0x243   : > { %v2121_v17 = vsel %vm319_vm1, %v7894_v2, 0  ;;  %v5686_v55 = vld [vmem:[%s11554_s28 + $0x97] sm:$0xff] }
 0x249   : > { %8883 = vmatmul.mubr.msk.bf16.gmra.mrb[24].mxu1 %vm297_vm2, %v1646_v40  ;;  %9617 = vmatmul.mubr.msk.bf16.gmra.mrb[8].mxu0 %vm297_vm2, %v12394_v53  ;;  %v1778_v53 = vld [vmem:[%s11554_s28 + $0x21] sm:$0xff]  ;;  %v5542_v40 = vpack.c.bf16 %v12406_v48, %v12387_v41  ;;  %v1929_v48 = vld [vmem:[%s11554_s28 + $0x2a] sm:$0xff] }
 0x24a   : > { %8888 = vmatprep.mubr.msk.bf16.mxu1 %vm11490_vm3, %v11489_v3  ;;  %9620 = vmatprep.mubr.msk.bf16.mxu0 %vm11490_vm3, %v11489_v3  ;;  %v1928_v41 = vld [vmem:[%s11554_s28 + $0x22] sm:$0xff] }
 0x24b   : > { %v1941_v27 = vpack.c.bf16 %v1929_v48, %v1928_v41  ;;  %v5688_v41 = vld [vmem:[%s11554_s28 + $0xa7] sm:$0xff]  ;;  %v5689_v48 = vld [vmem:[%s11554_s28 + $0xaf] sm:$0xff] }
 0x251   : > { %8889 = vmatmul.mubr.msk.bf16.vlgmr.msra.gmra.mrb[0].mxu1 %vm297_vm2, %v1790_v12  ;;  %9621 = vmatmul.mubr.msk.bf16.gmra.mrb[12].mxu0 %vm297_vm2, %v12413_v34  ;;  %v1791_v34 = vpack.c.bf16 %v1779_v61, %v1778_v53  ;;  %v1930_v12 = vld [vmem:[%s11554_s28 + $0x32] sm:$0xff]  ;;  %v5545_v61 = vpack.c.bf16 %v5388_v37, %v12653_v54  ;;  %v8094_v54 = vld [vmem:[%s11549_s25 + $0x4a] sm:$0x3]  ;;  %v12784_v37 = vld [vmem:[%s11554_s28 + $0x62] sm:$0xff] }
 0x252   : > { %8892 = vmatprep.mubr.msk.bf16.mxu1 %vm11490_vm3, %v11489_v3  ;;  %8917 = vmatpush3.bf16.msra.mxu1 %v1971_v58  ;;  %v1931_v58 = vld [vmem:[%s11554_s28 + $0x3a] sm:$0xff]  ;;  %v5871_v38 = vsel %vm319_vm1, %v8094_v54, 0  ;;  %v2096_v54 = vpack.c.bf16 %v12324_v39, %v12312_v56 }
 0x253   : > { %9624 = vmatprep.mubr.msk.bf16.mxu0 %vm11490_vm3, %v11489_v3  ;;  %8946 = vmatprep.subr.bf16.mxu1 %v11489_v3  ;;  %v1942_v53 = vpack.c.bf16 %v1931_v58, %v1930_v12  ;;  %v12865_v12 = vld [vmem:[%s11554_s28 + $0x53] sm:$0xff]  ;;  %v12868_v58 = vld [vmem:[%s11554_s28 + $0x5b] sm:$0xff] }
 0x254   : > { %v12914_v56 = vld [vmem:[%s11554_s28 + $0x80] sm:$0xff]  ;;  %v7910_v39 = vld [vmem:[%s11549_s25 + $0x1c] sm:$0x3] }
 0x259   : > { %8893 = vmatmul.mubr.msk.bf16.gmra.mrb[4].mxu1 %vm297_vm2, %v1791_v34  ;;  %9625 = vmatmul.mubr.msk.bf16.gmra.mrb[16].mxu0 %vm297_vm2, %v5394_v60  ;;  %v5539_v34 = vld [vmem:[%s11554_s28 + $0xae] sm:$0xff]  ;;  %v1943_v60 = vpack.c.bf16 %v12756_v20, %v1932_v16  ;;  %v5840_v16 = vpack.c.bf16 %v12574_v6, %v12562_v57  ;;  %v5841_v6 = vpack.c.bf16 %v12589_v18, %v12577_v42  ;;  %v12911_v18 = vld [vmem:[%s11554_s28 + $0x1c] sm:$0xff] }
 0x25a   : > { %8896 = vmatprep.mubr.msk.bf16.mxu1 %vm11490_vm3, %v11489_v3  ;;  %9628 = vmatprep.mubr.msk.bf16.mxu0 %vm11490_vm3, %v11489_v3  ;;  %v5546_v21 = vpack.c.bf16 %v5539_v34, %v12668_v44  ;;  %v12787_v44 = vld [vmem:[%s11554_s28 + $0x6a] sm:$0xff]  ;;  %v2226_v42 = vld [vmem:[%s11554_s28 + $0x14] sm:$0xff] }
 0x261   : > { %8897 = vmatmul.mubr.msk.bf16.gmra.mrb[8].mxu1 %vm297_vm2, %v1792_v24  ;;  %9629 = vmatmul.mubr.msk.bf16.gmra.mrb[20].mxu0 %vm297_vm2, %v5395_v36  ;;  %v1944_v24 = vpack.c.bf16 %v12771_v29, %v12768_v62  ;;  %v5690_v36 = vpack.c.bf16 %v12473_v14, %v12465_v50  ;;  %v1945_v50 = vpack.c.bf16 %v12787_v44, %v12784_v37 }
 0x262   : > { %8900 = vmatprep.mubr.msk.bf16.mxu1 %vm11490_vm3, %v11489_v3  ;;  %9632 = vmatprep.mubr.msk.bf16.mxu0 %vm11490_vm3, %v11489_v3  ;;  %v5691_v14 = vpack.c.bf16 %v12491_v22, %v12480_v46  ;;  %v2076_v46 = vld [vmem:[%s11554_s28 + $0x13] sm:$0xff]  ;;  %v2077_v22 = vld [vmem:[%s11554_s28 + $0x1b] sm:$0xff] }
 0x269   : > { %8901 = vmatmul.mubr.msk.bf16.gmra.mrb[12].mxu1 %vm297_vm2, %v1793_v45  ;;  %9633 = vmatmul.mubr.msk.bf16.gmra.mrb[24].mxu0 %vm297_vm2, %v5396_v51  ;;  %v1946_v45 = vpack.c.bf16 %v12244_v49, %v12228_v31  ;;  %v5692_v51 = vpack.c.bf16 %v12508_v1, %v12496_v9  ;;  %v7902_v31 = vld [vmem:[%s11549_s25 + $0x1a] sm:$0x3]  ;;  %v2090_v49 = vpack.c.bf16 %v2077_v22, %v2076_v46  ;;  %v12951_v22 = vld [vmem:[%s11554_s28 + $0x3c] sm:$0xff] }
 0x26a   : > { %8904 = vmatprep.mubr.msk.bf16.mxu1 %vm11490_vm3, %v11489_v3  ;;  %9638 = vmatprep.mubr.msk.bf16.mxu0 %vm11490_vm3, %v11489_v3  ;;  %v5693_v9 = vpack.c.bf16 %v12815_v26, %v12515_v8  ;;  %v2271_v1 = vsel %vm319_vm1, %v7902_v31, 0  ;;  %v12944_v46 = vld [vmem:[%s11554_s28 + $0x34] sm:$0xff] }
 0x26b   : > { %v5836_v31 = vld [vmem:[%s11554_s28 + $0x98] sm:$0xff] }
 0x271   : > { %8905 = vmatmul.mubr.msk.bf16.gmra.mrb[16].mxu1 %vm297_vm2, %v1794_v52  ;;  %9639 = vmatmul.mubr.msk.bf16.vlgmr.msra.gmra.mrb[0].mxu0 %vm297_vm2, %v5540_v33  ;;  %v2078_v52 = vld [vmem:[%s11554_s28 + $0x23] sm:$0xff]  ;;  %v2079_v33 = vld [vmem:[%s11554_s28 + $0x2b] sm:$0xff] }
 0x272   : > { %9667 = vmatpush3.bf16.msra.mxu0 %v5721_v15  ;;  %8908 = vmatprep.mubr.msk.bf16.mxu1 %vm11490_vm3, %v11489_v3  ;;  %v12828_v15 = vld [vmem:[%s11554_s28 + $0x87] sm:$0xff]  ;;  %v2091_v8 = vpack.c.bf16 %v2079_v33, %v2078_v52 }
 0x273   : > { %9642 = vmatprep.mubr.msk.bf16.mxu0 %vm11490_vm3, %v11489_v3  ;;  %9696 = vmatprep.subr.bf16.mxu0 %v11489_v3  ;;  %v12960_v52 = vld [vmem:[%s11554_s28 + $0x44] sm:$0xff]  ;;  %v12967_v33 = vld [vmem:[%s11554_s28 + $0x4c] sm:$0xff] }
 0x279   : > { %8909 = vmatmul.mubr.msk.bf16.gmra.mrb[20].mxu1 %vm297_vm2, %v1795_v23  ;;  %9643 = vmatmul.mubr.msk.bf16.gmra.mrb[4].mxu0 %vm297_vm2, %v5541_v30  ;;  %v5685_v23 = vld [vmem:[%s11554_s28 + $0x8f] sm:$0xff] }
 0x27a   : > { %8912 = vmatprep.mubr.msk.bf16.mxu1 %vm11490_vm3, %v11489_v3  ;;  %9646 = vmatprep.mubr.msk.bf16.mxu0 %vm11490_vm3, %v11489_v3  ;;  %v5694_v30 = vpack.c.bf16 %v5685_v23, %v12828_v15  ;;  %v5838_v23 = vld [vmem:[%s11554_s28 + $0xa8] sm:$0xff] }
 0x281   : > { %8913 = vmatmul.mubr.msk.bf16.gmra.mrb[24].mxu1 %vm297_vm2, %v1796_v11  ;;  %9647 = vmatmul.mubr.msk.bf16.gmra.mrb[8].mxu0 %vm297_vm2, %v5542_v40  ;;  %v2080_v11 = vld [vmem:[%s11554_s28 + $0x33] sm:$0xff]  ;;  %v2081_v40 = vld [vmem:[%s11554_s28 + $0x3b] sm:$0xff] }
 0x282   : > { %8918 = vmatprep.mubr.msk.bf16.mxu1 %vm11490_vm3, %v11489_v3  ;;  %9650 = vmatprep.mubr.msk.bf16.mxu0 %vm11490_vm3, %v11489_v3  ;;  %v2092_v2 = vpack.c.bf16 %v2081_v40, %v2080_v11  ;;  %v2234_v40 = vld [vmem:[%s11554_s28 + $0x54] sm:$0xff] }
 0x289   : > { %8919 = vmatmul.mubr.msk.bf16.vlgmr.msra.gmra.mrb[0].mxu1 %vm297_vm2, %v1940_v13  ;;  %9651 = vmatmul.mubr.msk.bf16.gmra.mrb[12].mxu0 %vm297_vm2, %v5543_v7  ;;  %v5695_v13 = vpack.c.bf16 %v5687_v32, %v5686_v55  ;;  %v2082_v7 = vld [vmem:[%s11554_s28 + $0x43] sm:$0xff]  ;;  %v8110_v32 = vld [vmem:[%s11549_s25 + $0x4e] sm:$0x3] }
 0x28a   : > { %8922 = vmatprep.mubr.msk.bf16.mxu1 %vm11490_vm3, %v11489_v3  ;;  %8947 = vmatpush3.bf16.msra.mxu1 %v2121_v17  ;;  %v12853_v17 = vld [vmem:[%s11554_s28 + $0x4b] sm:$0xff]  ;;  %v12981_v55 = vld [vmem:[%s11554_s28 + $0x5c] sm:$0xff] }
 0x28b   : > { %9654 = vmatprep.mubr.msk.bf16.mxu0 %vm11490_vm3, %v11489_v3  ;;  %8976 = vmatprep.subr.bf16.mxu1 %v11489_v3 }
 0x291   : > { %8923 = vmatmul.mubr.msk.bf16.gmra.mrb[4].mxu1 %vm297_vm2, %v1941_v27  ;;  %9655 = vmatmul.mubr.msk.bf16.gmra.mrb[16].mxu0 %vm297_vm2, %v5544_v47  ;;  %v2093_v27 = vpack.c.bf16 %v12853_v17, %v2082_v7  ;;  %v5696_v47 = vpack.c.bf16 %v5689_v48, %v5688_v41  ;;  %v6171_v7 = vsel %vm319_vm1, %v8110_v32, 0  ;;  %v2236_v41 = vld [vmem:[%s11554_s28 + $0x64] sm:$0xff]  ;;  %v12997_v48 = vld [vmem:[%s11554_s28 + $0x6c] sm:$0xff] }
 0x292   : > { %8926 = vmatprep.mubr.msk.bf16.mxu1 %vm11490_vm3, %v11489_v3  ;;  %9658 = vmatprep.mubr.msk.bf16.mxu0 %vm11490_vm3, %v11489_v3 }
 0x299   : > { %8927 = vmatmul.mubr.msk.bf16.gmra.mrb[8].mxu1 %vm297_vm2, %v1942_v53  ;;  %9659 = vmatmul.mubr.msk.bf16.gmra.mrb[20].mxu0 %vm297_vm2, %v5545_v61  ;;  %v8102_v53 = vld [vmem:[%s11549_s25 + $0x4c] sm:$0x3]  ;;  %v2094_v61 = vpack.c.bf16 %v12868_v58, %v12865_v12 }
 0x29a   : > { %8930 = vmatprep.mubr.msk.bf16.mxu1 %vm11490_vm3, %v11489_v3  ;;  %9662 = vmatprep.mubr.msk.bf16.mxu0 %vm11490_vm3, %v11489_v3  ;;  %v6021_v34 = vsel %vm319_vm1, %v8102_v53, 0  ;;  %v13031_v53 = vld [vmem:[%s11554_s28 + $0x81] sm:$0xff] }
 0x2a1   : > { %8931 = vmatmul.mubr.msk.bf16.gmra.mrb[12].mxu1 %vm297_vm2, %v1943_v60  ;;  %9663 = vmatmul.mubr.msk.bf16.gmra.mrb[24].mxu0 %vm297_vm2, %v5546_v21  ;;  %v12881_v60 = vld [vmem:[%s11554_s28 + $0x63] sm:$0xff]  ;;  %v12884_v21 = vld [vmem:[%s11554_s28 + $0x6b] sm:$0xff] }
 0x2a2   : > { %8934 = vmatprep.mubr.msk.bf16.mxu1 %vm11490_vm3, %v11489_v3  ;;  %9668 = vmatprep.mubr.msk.bf16.mxu0 %vm11490_vm3, %v11489_v3  ;;  %v2095_v57 = vpack.c.bf16 %v12884_v21, %v12881_v60 }
 0x2a9   : > { %8935 = vmatmul.mubr.msk.bf16.gmra.mrb[16].mxu1 %vm297_vm2, %v1944_v24  ;;  %9669 = vmatmul.mubr.msk.bf16.vlgmr.msra.gmra.mrb[0].mxu0 %vm297_vm2, %v5690_v36  ;;  %v5842_v24 = vpack.c.bf16 %v12607_v19, %v12592_v25  ;;  %v2240_v25 = vpack.c.bf16 %v12911_v18, %v2226_v42  ;;  %v5843_v19 = vpack.c.bf16 %v12914_v56, %v12610_v4  ;;  %v2421_v36 = vsel %vm319_vm1, %v7910_v39, 0  ;;  %v5835_v4 = vld [vmem:[%s11554_s28 + $0x90] sm:$0xff] }
 0x2aa   : > { %9697 = vmatpush3.bf16.msra.mxu0 %v5871_v38  ;;  %8938 = vmatprep.mubr.msk.bf16.mxu1 %vm11490_vm3, %v11489_v3  ;;  %v12924_v38 = vld [vmem:[%s11554_s28 + $0x24] sm:$0xff]  ;;  %v2392_v42 = vpack.c.bf16 %v12960_v52, %v12951_v22 }
 0x2ab   : > { %9672 = vmatprep.mubr.msk.bf16.mxu0 %vm11490_vm3, %v11489_v3  ;;  %9726 = vmatprep.subr.bf16.mxu0 %v11489_v3  ;;  %v5988_v39 = vld [vmem:[%s11554_s28 + $0xa9] sm:$0xff] }
 0x2b1   : > { %8939 = vmatmul.mubr.msk.bf16.gmra.mrb[20].mxu1 %vm297_vm2, %v1945_v50  ;;  %9673 = vmatmul.mubr.msk.bf16.gmra.mrb[4].mxu0 %vm297_vm2, %v5691_v14  ;;  %v12929_v50 = vld [vmem:[%s11554_s28 + $0x2c] sm:$0xff] }
 0x2b2   : > { %8942 = vmatprep.mubr.msk.bf16.mxu1 %vm11490_vm3, %v11489_v3  ;;  %9676 = vmatprep.mubr.msk.bf16.mxu0 %vm11490_vm3, %v11489_v3  ;;  %v12932_v14 = vld [vmem:[%s11554_s28 + $0x88] sm:$0xff] }
 0x2b9   : > { %8943 = vmatmul.mubr.msk.bf16.gmra.mrb[24].mxu1 %vm297_vm2, %v1946_v45  ;;  %9677 = vmatmul.mubr.msk.bf16.gmra.mrb[8].mxu0 %vm297_vm2, %v5692_v51  ;;  %v2241_v45 = vpack.c.bf16 %v12929_v50, %v12924_v38  ;;  %v5844_v51 = vpack.c.bf16 %v5835_v4, %v12932_v14  ;;  %v6140_v4 = vpack.c.bf16 %v12768_v62, %v12756_v20 }
 0x2ba   : > { %8948 = vmatprep.mubr.msk.bf16.mxu1 %vm11490_vm3, %v11489_v3  ;;  %9680 = vmatprep.mubr.msk.bf16.mxu0 %vm11490_vm3, %v11489_v3  ;;  %v6141_v62 = vpack.c.bf16 %v12784_v37, %v12771_v29 }
 0x2c1   : > { %8949 = vmatmul.mubr.msk.bf16.vlgmr.msra.gmra.mrb[0].mxu1 %vm297_vm2, %v2090_v49  ;;  %9681 = vmatmul.mubr.msk.bf16.gmra.mrb[12].mxu0 %vm297_vm2, %v5693_v9  ;;  %v5837_v49 = vld [vmem:[%s11554_s28 + $0xa0] sm:$0xff]  ;;  %v2242_v9 = vpack.c.bf16 %v12951_v22, %v12944_v46 }
 0x2c2   : > { %8952 = vmatprep.mubr.msk.bf16.mxu1 %vm11490_vm3, %v11489_v3  ;;  %8977 = vmatpush3.bf16.msra.mxu1 %v2271_v1  ;;  %v5845_v1 = vpack.c.bf16 %v5837_v49, %v5836_v31  ;;  %v13116_v22 = vld [vmem:[%s11554_s28 + $0x84] sm:$0xff]  ;;  %v13119_v31 = vld [vmem:[%s11554_s28 + $0x72] sm:$0xff] }
 0x2c3   : > { %9684 = vmatprep.mubr.msk.bf16.mxu0 %vm11490_vm3, %v11489_v3  ;;  %9006 = vmatprep.subr.bf16.mxu1 %v11489_v3  ;;  %v6142_v37 = vpack.c.bf16 %v13119_v31, %v12787_v44  ;;  %v2526_v49 = vld [vmem:[%s11554_s28 + $0x1d] sm:$0xff] }
 0x2c4   : > { %v7926_v44 = vld [vmem:[%s11549_s25 + $0x20] sm:$0x3] }
 0x2c9   : > { %8953 = vmatmul.mubr.msk.bf16.gmra.mrb[4].mxu1 %vm297_vm2, %v2091_v8  ;;  %9685 = vmatmul.mubr.msk.bf16.gmra.mrb[16].mxu0 %vm297_vm2, %v5694_v30  ;;  %v5839_v8 = vld [vmem:[%s11554_s28 + $0xb0] sm:$0xff]  ;;  %v2243_v30 = vpack.c.bf16 %v12967_v33, %v12960_v52  ;;  %v13140_v52 = vld [vmem:[%s11554_s28 + $0x82] sm:$0xff] }
 0x2ca   : > { %8956 = vmatprep.mubr.msk.bf16.mxu1 %vm11490_vm3, %v11489_v3  ;;  %9688 = vmatprep.mubr.msk.bf16.mxu0 %vm11490_vm3, %v11489_v3  ;;  %v5846_v11 = vpack.c.bf16 %v5839_v8, %v5838_v23  ;;  %v2721_v8 = vsel %vm319_vm1, %v7926_v44, 0  ;;  %v7934_v44 = vld [vmem:[%s11549_s25 + $0x22] sm:$0x3] }
 0x2d1   : > { %8957 = vmatmul.mubr.msk.bf16.gmra.mrb[8].mxu1 %vm297_vm2, %v2092_v2  ;;  %9689 = vmatmul.mubr.msk.bf16.gmra.mrb[20].mxu0 %vm297_vm2, %v5695_v13  ;;  %v12985_v2 = vpack.c.bf16 %v12981_v55, %v2234_v40  ;;  %v5990_v13 = vpack.c.bf16 %v12679_v63, %v12664_v35  ;;  %v13003_v35 = vpack.c.bf16 %v12997_v48, %v2236_v41 }
 0x2d2   : > { %8960 = vmatprep.mubr.msk.bf16.mxu1 %vm11490_vm3, %v11489_v3  ;;  %9692 = vmatprep.mubr.msk.bf16.mxu0 %vm11490_vm3, %v11489_v3  ;;  %v5991_v63 = vpack.c.bf16 %v12695_v43, %v12682_v0  ;;  %v13028_v43 = vld [vmem:[%s11554_s28 + $0x79] sm:$0xff] }
 0x2d9   : > { %8961 = vmatmul.mubr.msk.bf16.gmra.mrb[12].mxu1 %vm297_vm2, %v2093_v27  ;;  %9693 = vmatmul.mubr.msk.bf16.gmra.mrb[24].mxu0 %vm297_vm2, %v5696_v47  ;;  %v13015_v27 = vld [vmem:[%s11554_s28 + $0x71] sm:$0xff]  ;;  %v2246_v47 = vpack.c.bf16 %v12440_v28, %v12427_v59  ;;  %v7918_v59 = vld [vmem:[%s11549_s25 + $0x1e] sm:$0x3]  ;;  %v2390_v28 = vpack.c.bf16 %v12924_v38, %v12911_v18 }
 0x2da   : > { %8964 = vmatprep.mubr.msk.bf16.mxu1 %vm11490_vm3, %v11489_v3  ;;  %9698 = vmatprep.mubr.msk.bf16.mxu0 %vm11490_vm3, %v11489_v3  ;;  %v5992_v0 = vpack.c.bf16 %v13015_v27, %v12698_v10  ;;  %v5993_v10 = vpack.c.bf16 %v13031_v53, %v13028_v43  ;;  %v8118_v38 = vld [vmem:[%s11549_s25 + $0x50] sm:$0x3] }
 0x2e1   : > { %8965 = vmatmul.mubr.msk.bf16.gmra.mrb[16].mxu1 %vm297_vm2, %v2094_v61  ;;  %9699 = vmatmul.mubr.msk.bf16.vlgmr.msra.gmra.mrb[0].mxu0 %vm297_vm2, %v5840_v16  ;;  %v2571_v61 = vsel %vm319_vm1, %v7918_v59, 0  ;;  %v13044_v16 = vld [vmem:[%s11554_s28 + $0x89] sm:$0xff] }
 0x2e2   : > { %9727 = vmatpush3.bf16.msra.mxu0 %v6021_v34  ;;  %8968 = vmatprep.mubr.msk.bf16.mxu1 %vm11490_vm3, %v11489_v3  ;;  %v5985_v34 = vld [vmem:[%s11554_s28 + $0x91] sm:$0xff] }
 0x2e3   : > { %9702 = vmatprep.mubr.msk.bf16.mxu0 %vm11490_vm3, %v11489_v3  ;;  %9756 = vmatprep.subr.bf16.mxu0 %v11489_v3  ;;  %v2532_v59 = vld [vmem:[%s11554_s28 + $0x4d] sm:$0xff] }
 0x2e9   : > { %8969 = vmatmul.mubr.msk.bf16.gmra.mrb[20].mxu1 %vm297_vm2, %v2095_v57  ;;  %9703 = vmatmul.mubr.msk.bf16.gmra.mrb[4].mxu0 %vm297_vm2, %v5841_v6  ;;  %v2391_v57 = vpack.c.bf16 %v12944_v46, %v12929_v50  ;;  %v5994_v6 = vpack.c.bf16 %v5985_v34, %v13044_v16  ;;  %v13083_v50 = vpack.c.bf16 %v2236_v41, %v12981_v55  ;;  %v13113_v46 = vld [vmem:[%s11554_s28 + $0x7c] sm:$0xff]  ;;  %v6135_v55 = vld [vmem:[%s11554_s28 + $0x92] sm:$0xff]  ;;  %v2531_v41 = vld [vmem:[%s11554_s28 + $0x45] sm:$0xff] }
 0x2ea   : > { %8972 = vmatprep.mubr.msk.bf16.mxu1 %vm11490_vm3, %v11489_v3  ;;  %9706 = vmatprep.mubr.msk.bf16.mxu0 %vm11490_vm3, %v11489_v3  ;;  %v13123_v29 = vpack.c.bf16 %v13116_v22, %v13113_v46 }
 0x2f1   : > { %8973 = vmatmul.mubr.msk.bf16.gmra.mrb[24].mxu1 %vm297_vm2, %v2096_v54  ;;  %9707 = vmatmul.mubr.msk.bf16.gmra.mrb[8].mxu0 %vm297_vm2, %v5842_v24  ;;  %v5986_v54 = vld [vmem:[%s11554_s28 + $0x99] sm:$0xff]  ;;  %v5987_v24 = vld [vmem:[%s11554_s28 + $0xa1] sm:$0xff] }
 0x2f2   : > { %8978 = vmatprep.mubr.msk.bf16.mxu1 %vm11490_vm3, %v11489_v3  ;;  %9710 = vmatprep.mubr.msk.bf16.mxu0 %vm11490_vm3, %v11489_v3  ;;  %v5995_v18 = vpack.c.bf16 %v5987_v24, %v5986_v54  ;;  %v13193_v54 = vld [vmem:[%s11554_s28 + $0x65] sm:$0xff]  ;;  %v8126_v24 = vld [vmem:[%s11549_s25 + $0x52] sm:$0x3] }
 0x2f9   : > { %8979 = vmatmul.mubr.msk.bf16.vlgmr.msra.gmra.mrb[0].mxu1 %vm297_vm2, %v2240_v25  ;;  %9711 = vmatmul.mubr.msk.bf16.gmra.mrb[12].mxu0 %vm297_vm2, %v5843_v19  ;;  %v5989_v25 = vld [vmem:[%s11554_s28 + $0xb1] sm:$0xff]  ;;  %v13072_v19 = vpack.c.bf16 %v2234_v40, %v12967_v33 }
 0x2fa   : > { %8982 = vmatprep.mubr.msk.bf16.mxu1 %vm11490_vm3, %v11489_v3  ;;  %9007 = vmatpush3.bf16.msra.mxu1 %v2421_v36  ;;  %v5996_v36 = vpack.c.bf16 %v5989_v25, %v5988_v39  ;;  %v13153_v40 = vld [vmem:[%s11554_s28 + $0x8a] sm:$0xff]  ;;  %v6471_v39 = vsel %vm319_vm1, %v8126_v24, 0 }
 0x2fb   : > { %9714 = vmatprep.mubr.msk.bf16.mxu0 %vm11490_vm3, %v11489_v3  ;;  %9036 = vmatprep.subr.bf16.mxu1 %v11489_v3  ;;  %v13206_v25 = vld [vmem:[%s11554_s28 + $0x6d] sm:$0xff] }
 0x301   : > { %8983 = vmatmul.mubr.msk.bf16.gmra.mrb[4].mxu1 %vm297_vm2, %v2241_v45  ;;  %9715 = vmatmul.mubr.msk.bf16.gmra.mrb[16].mxu0 %vm297_vm2, %v5844_v51  ;;  %v6321_v45 = vsel %vm319_vm1, %v8118_v38, 0  ;;  %v13094_v51 = vld [vmem:[%s11554_s28 + $0x74] sm:$0xff]  ;;  %v13225_v38 = vld [vmem:[%s11554_s28 + $0x7d] sm:$0xff] }
 0x302   : > { %8986 = vmatprep.mubr.msk.bf16.mxu1 %vm11490_vm3, %v11489_v3  ;;  %9718 = vmatprep.mubr.msk.bf16.mxu0 %vm11490_vm3, %v11489_v3  ;;  %v13101_v20 = vpack.c.bf16 %v13094_v51, %v12997_v48  ;;  %v6136_v48 = vld [vmem:[%s11554_s28 + $0x9a] sm:$0xff] }
 0x309   : > { %8987 = vmatmul.mubr.msk.bf16.gmra.mrb[8].mxu1 %vm297_vm2, %v2242_v9  ;;  %9719 = vmatmul.mubr.msk.bf16.gmra.mrb[20].mxu0 %vm297_vm2, %v5845_v1  ;;  %v2527_v9 = vld [vmem:[%s11554_s28 + $0x25] sm:$0xff]  ;;  %v13137_v1 = vld [vmem:[%s11554_s28 + $0x7a] sm:$0xff] }
 0x30a   : > { %8990 = vmatprep.mubr.msk.bf16.mxu1 %vm11490_vm3, %v11489_v3  ;;  %9722 = vmatprep.mubr.msk.bf16.mxu0 %vm11490_vm3, %v11489_v3  ;;  %v2540_v33 = vpack.c.bf16 %v2527_v9, %v2526_v49  ;;  %v6143_v23 = vpack.c.bf16 %v13140_v52, %v13137_v1  ;;  %v6282_v49 = vld [vmem:[%s11554_s28 + $0x7b] sm:$0xff]  ;;  %v6283_v9 = vld [vmem:[%s11554_s28 + $0x83] sm:$0xff] }
 0x311   : > { %8991 = vmatmul.mubr.msk.bf16.gmra.mrb[12].mxu1 %vm297_vm2, %v2243_v30  ;;  %9723 = vmatmul.mubr.msk.bf16.gmra.mrb[24].mxu0 %vm297_vm2, %v5846_v11  ;;  %v2528_v30 = vld [vmem:[%s11554_s28 + $0x2d] sm:$0xff]  ;;  %v2529_v11 = vld [vmem:[%s11554_s28 + $0x35] sm:$0xff] }
 0x312   : > { %8994 = vmatprep.mubr.msk.bf16.mxu1 %vm11490_vm3, %v11489_v3  ;;  %9728 = vmatprep.mubr.msk.bf16.mxu0 %vm11490_vm3, %v11489_v3  ;;  %v2541_v32 = vpack.c.bf16 %v2529_v11, %v2528_v30  ;;  %v2679_v30 = vld [vmem:[%s11554_s28 + $0x36] sm:$0xff]  ;;  %v6284_v11 = vld [vmem:[%s11554_s28 + $0x8b] sm:$0xff] }
 0x319   : > { %8995 = vmatmul.mubr.msk.bf16.gmra.mrb[16].mxu1 %vm297_vm2, %v12985_v2  ;;  %9729 = vmatmul.mubr.msk.bf16.vlgmr.msra.gmra.mrb[0].mxu0 %vm297_vm2, %v5990_v13  ;;  %v6144_v13 = vpack.c.bf16 %v6135_v55, %v13153_v40  ;;  %v6285_v55 = vld [vmem:[%s11554_s28 + $0x93] sm:$0xff] }
 0x31a   : > { %9757 = vmatpush3.bf16.msra.mxu0 %v6171_v7  ;;  %8998 = vmatprep.mubr.msk.bf16.mxu1 %vm11490_vm3, %v11489_v3  ;;  %v2530_v7 = vld [vmem:[%s11554_s28 + $0x3d] sm:$0xff] }
 0x31b   : > { %9732 = vmatprep.mubr.msk.bf16.mxu0 %vm11490_vm3, %v11489_v3  ;;  %9786 = vmatprep.subr.bf16.mxu0 %v11489_v3 }
 0x321   : > { %8999 = vmatmul.mubr.msk.bf16.gmra.mrb[20].mxu1 %vm297_vm2, %v13003_v35  ;;  %9733 = vmatmul.mubr.msk.bf16.gmra.mrb[4].mxu0 %vm297_vm2, %v5991_v63  ;;  %v6137_v63 = vld [vmem:[%s11554_s28 + $0xa2] sm:$0xff] }
 0x322   : > { %9002 = vmatprep.mubr.msk.bf16.mxu1 %vm11490_vm3, %v11489_v3  ;;  %9736 = vmatprep.mubr.msk.bf16.mxu0 %vm11490_vm3, %v11489_v3 }
 0x329   : > { %9003 = vmatmul.mubr.msk.bf16.gmra.mrb[24].mxu1 %vm297_vm2, %v2246_v47  ;;  %9737 = vmatmul.mubr.msk.bf16.gmra.mrb[8].mxu0 %vm297_vm2, %v5992_v0  ;;  %v2542_v47 = vpack.c.bf16 %v2531_v41, %v2530_v7  ;;  %v6145_v0 = vpack.c.bf16 %v6137_v63, %v6136_v48  ;;  %v2680_v7 = vld [vmem:[%s11554_s28 + $0x3e] sm:$0xff]  ;;  %v2681_v41 = vld [vmem:[%s11554_s28 + $0x46] sm:$0xff] }
 0x32a   : > { %9008 = vmatprep.mubr.msk.bf16.mxu1 %vm11490_vm3, %v11489_v3  ;;  %9740 = vmatprep.mubr.msk.bf16.mxu0 %vm11490_vm3, %v11489_v3  ;;  %v6286_v48 = vld [vmem:[%s11554_s28 + $0x9b] sm:$0xff]  ;;  %v6287_v63 = vld [vmem:[%s11554_s28 + $0xa3] sm:$0xff] }
 0x331   : > { %9009 = vmatmul.mubr.msk.bf16.vlgmr.msra.gmra.mrb[0].mxu1 %vm297_vm2, %v2390_v28  ;;  %9741 = vmatmul.mubr.msk.bf16.gmra.mrb[12].mxu0 %vm297_vm2, %v5993_v10  ;;  %v13178_v28 = vld [vmem:[%s11554_s28 + $0x55] sm:$0xff]  ;;  %v6138_v10 = vld [vmem:[%s11554_s28 + $0xaa] sm:$0xff] }
 0x332   : > { %9012 = vmatprep.mubr.msk.bf16.mxu1 %vm11490_vm3, %v11489_v3  ;;  %9037 = vmatpush3.bf16.msra.mxu1 %v2571_v61  ;;  %v6139_v61 = vld [vmem:[%s11554_s28 + $0xb2] sm:$0xff]  ;;  %v2543_v34 = vpack.c.bf16 %v13178_v28, %v2532_v59 }
 0x333   : > { %9744 = vmatprep.mubr.msk.bf16.mxu0 %vm11490_vm3, %v11489_v3  ;;  %9066 = vmatprep.subr.bf16.mxu1 %v11489_v3  ;;  %v2682_v59 = vld [vmem:[%s11554_s28 + $0x4e] sm:$0xff] }
 0x339   : > { %9013 = vmatmul.mubr.msk.bf16.gmra.mrb[4].mxu1 %vm297_vm2, %v2391_v57  ;;  %9745 = vmatmul.mubr.msk.bf16.gmra.mrb[16].mxu0 %vm297_vm2, %v5994_v6  ;;  %v6146_v57 = vpack.c.bf16 %v6139_v61, %v6138_v10  ;;  %v13190_v6 = vld [vmem:[%s11554_s28 + $0x5d] sm:$0xff]  ;;  %v6288_v61 = vld [vmem:[%s11554_s28 + $0xab] sm:$0xff] }
 0x33a   : > { %9016 = vmatprep.mubr.msk.bf16.mxu1 %vm11490_vm3, %v11489_v3  ;;  %9748 = vmatprep.mubr.msk.bf16.mxu0 %vm11490_vm3, %v11489_v3  ;;  %v13275_v10 = vld [vmem:[%s11554_s28 + $0x56] sm:$0xff] }
 0x341   : > { %9017 = vmatmul.mubr.msk.bf16.gmra.mrb[8].mxu1 %vm297_vm2, %v2392_v42  ;;  %9749 = vmatmul.mubr.msk.bf16.gmra.mrb[20].mxu0 %vm297_vm2, %v5995_v18  ;;  %v2544_v42 = vpack.c.bf16 %v13193_v54, %v13190_v6  ;;  %v6290_v18 = vpack.c.bf16 %v12865_v12, %v12853_v17  ;;  %v6291_v12 = vpack.c.bf16 %v12881_v60, %v12868_v58 }
 0x342   : > { %9020 = vmatprep.mubr.msk.bf16.mxu1 %vm11490_vm3, %v11489_v3  ;;  %9752 = vmatprep.mubr.msk.bf16.mxu0 %vm11490_vm3, %v11489_v3 }
 0x349   : > { %9021 = vmatmul.mubr.msk.bf16.gmra.mrb[12].mxu1 %vm297_vm2, %v13072_v19  ;;  %9753 = vmatmul.mubr.msk.bf16.gmra.mrb[24].mxu0 %vm297_vm2, %v5996_v36  ;;  %v13209_v36 = vld [vmem:[%s11554_s28 + $0x75] sm:$0xff] }
 0x34a   : > { %9024 = vmatprep.mubr.msk.bf16.mxu1 %vm11490_vm3, %v11489_v3  ;;  %9758 = vmatprep.mubr.msk.bf16.mxu0 %vm11490_vm3, %v11489_v3  ;;  %v2545_v17 = vpack.c.bf16 %v13209_v36, %v13206_v25 }
 0x351   : > { %9025 = vmatmul.mubr.msk.bf16.gmra.mrb[16].mxu1 %vm297_vm2, %v13083_v50  ;;  %9759 = vmatmul.mubr.msk.bf16.vlgmr.msra.gmra.mrb[0].mxu0 %vm297_vm2, %v6140_v4  ;;  %v13228_v4 = vld [vmem:[%s11554_s28 + $0x85] sm:$0xff] }
 0x352   : > { %9787 = vmatpush3.bf16.msra.mxu0 %v6321_v45  ;;  %9028 = vmatprep.mubr.msk.bf16.mxu1 %vm11490_vm3, %v11489_v3  ;;  %v6281_v45 = vld [vmem:[%s11554_s28 + $0x73] sm:$0xff]  ;;  %v2546_v58 = vpack.c.bf16 %v13228_v4, %v13225_v38 }
 0x353   : > { %9762 = vmatprep.mubr.msk.bf16.mxu0 %vm11490_vm3, %v11489_v3  ;;  %9816 = vmatprep.subr.bf16.mxu0 %v11489_v3  ;;  %v6292_v60 = vpack.c.bf16 %v6281_v45, %v12884_v21  ;;  %v6293_v21 = vpack.c.bf16 %v6283_v9, %v6282_v49  ;;  %v13302_v45 = vld [vmem:[%s11554_s28 + $0x6e] sm:$0xff]  ;;  %v7942_v9 = vld [vmem:[%s11549_s25 + $0x24] sm:$0x3] }
 0x354   : > { %v2827_v49 = vld [vmem:[%s11554_s28 + $0x27] sm:$0xff] }
 0x359   : > { %9029 = vmatmul.mubr.msk.bf16.gmra.mrb[20].mxu1 %vm297_vm2, %v13101_v20  ;;  %9763 = vmatmul.mubr.msk.bf16.gmra.mrb[4].mxu0 %vm297_vm2, %v6141_v62  ;;  %v2676_v62 = vld [vmem:[%s11554_s28 + $0x1e] sm:$0xff] }
 0x35a   : > { %9032 = vmatprep.mubr.msk.bf16.mxu1 %vm11490_vm3, %v11489_v3  ;;  %9766 = vmatprep.mubr.msk.bf16.mxu0 %vm11490_vm3, %v11489_v3 }
 0x361   : > { %9033 = vmatmul.mubr.msk.bf16.gmra.mrb[24].mxu1 %vm297_vm2, %v13123_v29  ;;  %9767 = vmatmul.mubr.msk.bf16.gmra.mrb[8].mxu0 %vm297_vm2, %v6142_v37  ;;  %v2677_v37 = vld [vmem:[%s11554_s28 + $0x26] sm:$0xff] }
 0x362   : > { %9038 = vmatprep.mubr.msk.bf16.mxu1 %vm11490_vm3, %v11489_v3  ;;  %9770 = vmatprep.mubr.msk.bf16.mxu0 %vm11490_vm3, %v11489_v3 }
 0x369   : > { %9039 = vmatmul.mubr.msk.bf16.vlgmr.msra.gmra.mrb[0].mxu1 %vm297_vm2, %v2540_v33  ;;  %9771 = vmatmul.mubr.msk.bf16.gmra.mrb[12].mxu0 %vm297_vm2, %v6143_v23  ;;  %v2690_v33 = vpack.c.bf16 %v2677_v37, %v2676_v62  ;;  %v2871_v23 = vsel %vm319_vm1, %v7934_v44, 0  ;;  %v13323_v62 = vld [vmem:[%s11554_s28 + $0x86] sm:$0xff] }
 0x36a   : > { %9042 = vmatprep.mubr.msk.bf16.mxu1 %vm11490_vm3, %v11489_v3  ;;  %9067 = vmatpush3.bf16.msra.mxu1 %v2721_v8  ;;  %v2678_v8 = vld [vmem:[%s11554_s28 + $0x2e] sm:$0xff] }
 0x36b   : > { %9774 = vmatprep.mubr.msk.bf16.mxu0 %vm11490_vm3, %v11489_v3  ;;  %9096 = vmatprep.subr.bf16.mxu1 %v11489_v3 }
 0x371   : > { %9043 = vmatmul.mubr.msk.bf16.gmra.mrb[4].mxu1 %vm297_vm2, %v2541_v32  ;;  %9775 = vmatmul.mubr.msk.bf16.gmra.mrb[16].mxu0 %vm297_vm2, %v6144_v13  ;;  %v2691_v32 = vpack.c.bf16 %v2679_v30, %v2678_v8  ;;  %v6294_v13 = vpack.c.bf16 %v6285_v55, %v6284_v11  ;;  %v13347_v8 = vld [vmem:[%s11554_s28 + $0x94] sm:$0xff]  ;;  %v2830_v11 = vld [vmem:[%s11554_s28 + $0x3f] sm:$0xff]  ;;  %v2831_v55 = vld [vmem:[%s11554_s28 + $0x47] sm:$0xff] }
 0x372   : > { %9046 = vmatprep.mubr.msk.bf16.mxu1 %vm11490_vm3, %v11489_v3  ;;  %9778 = vmatprep.mubr.msk.bf16.mxu0 %vm11490_vm3, %v11489_v3 }
 0x379   : > { %9047 = vmatmul.mubr.msk.bf16.gmra.mrb[8].mxu1 %vm297_vm2, %v2542_v47  ;;  %9779 = vmatmul.mubr.msk.bf16.gmra.mrb[20].mxu0 %vm297_vm2, %v6145_v0  ;;  %v2692_v47 = vpack.c.bf16 %v2681_v41, %v2680_v7  ;;  %v6295_v0 = vpack.c.bf16 %v6287_v63, %v6286_v48  ;;  %v2842_v7 = vpack.c.bf16 %v2831_v55, %v2830_v11  ;;  %v2832_v48 = vld [vmem:[%s11554_s28 + $0x4f] sm:$0xff]  ;;  %v13377_v63 = vld [vmem:[%s11554_s28 + $0x57] sm:$0xff] }
 0x37a   : > { %9050 = vmatprep.mubr.msk.bf16.mxu1 %vm11490_vm3, %v11489_v3  ;;  %9782 = vmatprep.mubr.msk.bf16.mxu0 %vm11490_vm3, %v11489_v3  ;;  %v13466_v11 = vld [vmem:[%s11554_s28 + $0x58] sm:$0xff] }
 0x37b   : > { %v6589_v55 = vld [vmem:[%s11554_s28 + $0xbc] sm:$0xff] }
 0x381   : > { %9051 = vmatmul.mubr.msk.bf16.gmra.mrb[12].mxu1 %vm297_vm2, %v2543_v34  ;;  %9783 = vmatmul.mubr.msk.bf16.gmra.mrb[24].mxu0 %vm297_vm2, %v6146_v57  ;;  %v6289_v34 = vld [vmem:[%s11554_s28 + $0xb3] sm:$0xff]  ;;  %v2693_v57 = vpack.c.bf16 %v13275_v10, %v2682_v59  ;;  %v2843_v59 = vpack.c.bf16 %v13377_v63, %v2832_v48 }
 0x382   : > { %9054 = vmatprep.mubr.msk.bf16.mxu1 %vm11490_vm3, %v11489_v3  ;;  %9788 = vmatprep.mubr.msk.bf16.mxu0 %vm11490_vm3, %v11489_v3  ;;  %v6296_v24 = vpack.c.bf16 %v6289_v34, %v6288_v61  ;;  %v13392_v34 = vld [vmem:[%s11554_s28 + $0x5f] sm:$0xff]  ;;  %v8150_v48 = vld [vmem:[%s11549_s25 + $0x58] sm:$0x3] }
 0x389   : > { %9055 = vmatmul.mubr.msk.bf16.gmra.mrb[16].mxu1 %vm297_vm2, %v2544_v42  ;;  %9789 = vmatmul.mubr.msk.bf16.vlgmr.msra.gmra.mrb[0].mxu0 %vm297_vm2, %v6290_v18  ;;  %v13287_v42 = vld [vmem:[%s11554_s28 + $0x5e] sm:$0xff]  ;;  %v13290_v18 = vld [vmem:[%s11554_s28 + $0x66] sm:$0xff] }
 0x38a   : > { %9817 = vmatpush3.bf16.msra.mxu0 %v6471_v39  ;;  %9058 = vmatprep.mubr.msk.bf16.mxu1 %vm11490_vm3, %v11489_v3  ;;  %v8134_v39 = vld [vmem:[%s11549_s25 + $0x54] sm:$0x3] }
 0x38b   : > { %9792 = vmatprep.mubr.msk.bf16.mxu0 %vm11490_vm3, %v11489_v3  ;;  %9846 = vmatprep.subr.bf16.mxu0 %v11489_v3 }
 0x391   : > { %9059 = vmatmul.mubr.msk.bf16.gmra.mrb[20].mxu1 %vm297_vm2, %v2545_v17  ;;  %9793 = vmatmul.mubr.msk.bf16.gmra.mrb[4].mxu0 %vm297_vm2, %v6291_v12  ;;  %v2694_v17 = vpack.c.bf16 %v13290_v18, %v13287_v42  ;;  %v6621_v12 = vsel %vm319_vm1, %v8134_v39, 0 }
 0x392   : > { %9062 = vmatprep.mubr.msk.bf16.mxu1 %vm11490_vm3, %v11489_v3  ;;  %9796 = vmatprep.mubr.msk.bf16.mxu0 %vm11490_vm3, %v11489_v3 }
 0x399   : > { %9063 = vmatmul.mubr.msk.bf16.gmra.mrb[24].mxu1 %vm297_vm2, %v2546_v58  ;;  %9797 = vmatmul.mubr.msk.bf16.gmra.mrb[8].mxu0 %vm297_vm2, %v6292_v60  ;;  %v13305_v58 = vld [vmem:[%s11554_s28 + $0x76] sm:$0xff] }
 0x39a   : > { %9068 = vmatprep.mubr.msk.bf16.mxu1 %vm11490_vm3, %v11489_v3  ;;  %9800 = vmatprep.mubr.msk.bf16.mxu0 %vm11490_vm3, %v11489_v3  ;;  %v2695_v60 = vpack.c.bf16 %v13305_v58, %v13302_v45 }
 0x3a1   : > { %9069 = vmatmul.mubr.msk.bf16.vlgmr.msra.gmra.mrb[0].mxu1 %vm297_vm2, %v2690_v33  ;;  %9801 = vmatmul.mubr.msk.bf16.gmra.mrb[12].mxu0 %vm297_vm2, %v6293_v21  ;;  %v3021_v33 = vsel %vm319_vm1, %v7942_v9, 0  ;;  %v2829_v21 = vld [vmem:[%s11554_s28 + $0x37] sm:$0xff]  ;;  %v7950_v9 = vld [vmem:[%s11549_s25 + $0x26] sm:$0x3] }
 0x3a2   : > { %9072 = vmatprep.mubr.msk.bf16.mxu1 %vm11490_vm3, %v11489_v3  ;;  %9097 = vmatpush3.bf16.msra.mxu1 %v2871_v23  ;;  %v6434_v23 = vld [vmem:[%s11554_s28 + $0x8c] sm:$0xff] }
 0x3a3   : > { %9804 = vmatprep.mubr.msk.bf16.mxu0 %vm11490_vm3, %v11489_v3  ;;  %9126 = vmatprep.subr.bf16.mxu1 %v11489_v3 }
 0x3a9   : > { %9073 = vmatmul.mubr.msk.bf16.gmra.mrb[4].mxu1 %vm297_vm2, %v2691_v32  ;;  %9805 = vmatmul.mubr.msk.bf16.gmra.mrb[16].mxu0 %vm297_vm2, %v6294_v13  ;;  %v6436_v32 = vld [vmem:[%s11554_s28 + $0x9c] sm:$0xff]  ;;  %v13366_v13 = vld [vmem:[%s11554_s28 + $0xa4] sm:$0xff] }
 0x3aa   : > { %9076 = vmatprep.mubr.msk.bf16.mxu1 %vm11490_vm3, %v11489_v3  ;;  %9808 = vmatprep.mubr.msk.bf16.mxu0 %vm11490_vm3, %v11489_v3  ;;  %v6445_v41 = vpack.c.bf16 %v13366_v13, %v6436_v32 }
 0x3b1   : > { %9077 = vmatmul.mubr.msk.bf16.gmra.mrb[8].mxu1 %vm297_vm2, %v2692_v47  ;;  %9809 = vmatmul.mubr.msk.bf16.gmra.mrb[20].mxu0 %vm297_vm2, %v6295_v0  ;;  %v6438_v47 = vld [vmem:[%s11554_s28 + $0xac] sm:$0xff]  ;;  %v13381_v0 = vld [vmem:[%s11554_s28 + $0xb4] sm:$0xff] }
 0x3b2   : > { %9080 = vmatprep.mubr.msk.bf16.mxu1 %vm11490_vm3, %v11489_v3  ;;  %9812 = vmatprep.mubr.msk.bf16.mxu0 %vm11490_vm3, %v11489_v3  ;;  %v6446_v61 = vpack.c.bf16 %v13381_v0, %v6438_v47 }
 0x3b9   : > { %9081 = vmatmul.mubr.msk.bf16.gmra.mrb[12].mxu1 %vm297_vm2, %v2693_v57  ;;  %9813 = vmatmul.mubr.msk.bf16.gmra.mrb[24].mxu0 %vm297_vm2, %v6296_v24  ;;  %v13395_v57 = vld [vmem:[%s11554_s28 + $0x67] sm:$0xff]  ;;  %v8142_v24 = vld [vmem:[%s11549_s25 + $0x56] sm:$0x3] }
 0x3ba   : > { %9084 = vmatprep.mubr.msk.bf16.mxu1 %vm11490_vm3, %v11489_v3  ;;  %9818 = vmatprep.mubr.msk.bf16.mxu0 %vm11490_vm3, %v11489_v3  ;;  %v2844_v39 = vpack.c.bf16 %v13395_v57, %v13392_v34 }
 0x3c1   : > { %9085 = vmatmul.mubr.msk.bf16.gmra.mrb[16].mxu1 %vm297_vm2, %v2694_v17  ;;  %9819 = vmatmul.mubr.msk.bf16.vlgmr.msra.gmra.mrb[0].mxu0 %vm297_vm2, %v13072_v19  ;;  %v13320_v19 = vld [vmem:[%s11554_s28 + $0x7e] sm:$0xff]  ;;  %v6771_v17 = vsel %vm319_vm1, %v8142_v24, 0 }
 0x3c2   : > { %9847 = vmatpush3.bf16.msra.mxu0 %v6621_v12  ;;  %9088 = vmatprep.mubr.msk.bf16.mxu1 %vm11490_vm3, %v11489_v3  ;;  %v2696_v37 = vpack.c.bf16 %v13323_v62, %v13320_v19  ;;  %v13407_v12 = vld [vmem:[%s11554_s28 + $0x6f] sm:$0xff]  ;;  %v13497_v24 = vld [vmem:[%s11554_s28 + $0x78] sm:$0xff] }
 0x3c3   : > { %9822 = vmatprep.mubr.msk.bf16.mxu0 %vm11490_vm3, %v11489_v3  ;;  %9876 = vmatprep.subr.bf16.mxu0 %v11489_v3 }
 0x3c9   : > { %9089 = vmatmul.mubr.msk.bf16.gmra.mrb[20].mxu1 %vm297_vm2, %v2695_v60  ;;  %9823 = vmatmul.mubr.msk.bf16.gmra.mrb[4].mxu0 %vm297_vm2, %v13083_v50  ;;  %v2826_v50 = vld [vmem:[%s11554_s28 + $0x1f] sm:$0xff]  ;;  %v13410_v60 = vld [vmem:[%s11554_s28 + $0x77] sm:$0xff] }
 0x3ca   : > { %9092 = vmatprep.mubr.msk.bf16.mxu1 %vm11490_vm3, %v11489_v3  ;;  %9826 = vmatprep.mubr.msk.bf16.mxu0 %vm11490_vm3, %v11489_v3  ;;  %v2840_v44 = vpack.c.bf16 %v2827_v49, %v2826_v50  ;;  %v6592_v50 = vpack.c.bf16 %v13113_v46, %v13094_v51  ;;  %v2977_v49 = vld [vmem:[%s11554_s28 + $0x28] sm:$0xff]  ;;  %v2978_v51 = vld [vmem:[%s11554_s28 + $0x30] sm:$0xff]  ;;  %v2979_v46 = vld [vmem:[%s11554_s28 + $0x38] sm:$0xff] }
 0x3d1   : > { %9093 = vmatmul.mubr.msk.bf16.gmra.mrb[24].mxu1 %vm297_vm2, %v2696_v37  ;;  %9827 = vmatmul.mubr.msk.bf16.gmra.mrb[8].mxu0 %vm297_vm2, %v13101_v20  ;;  %v2828_v20 = vld [vmem:[%s11554_s28 + $0x2f] sm:$0xff]  ;;  %v2845_v37 = vpack.c.bf16 %v13410_v60, %v13407_v12 }
 0x3d2   : > { %9098 = vmatprep.mubr.msk.bf16.mxu1 %vm11490_vm3, %v11489_v3  ;;  %9830 = vmatprep.mubr.msk.bf16.mxu0 %vm11490_vm3, %v11489_v3  ;;  %v2841_v30 = vpack.c.bf16 %v2829_v21, %v2828_v20  ;;  %v2980_v20 = vld [vmem:[%s11554_s28 + $0x40] sm:$0xff]  ;;  %v2981_v21 = vld [vmem:[%s11554_s28 + $0x48] sm:$0xff] }
 0x3d9   : > { %9099 = vmatmul.mubr.msk.bf16.vlgmr.msra.gmra.mrb[0].mxu1 %vm297_vm2, %v2840_v44  ;;  %9831 = vmatmul.mubr.msk.bf16.gmra.mrb[12].mxu0 %vm297_vm2, %v13123_v29  ;;  %v13353_v29 = vpack.c.bf16 %v13347_v8, %v6434_v23 }
 0x3da   : > { %9102 = vmatprep.mubr.msk.bf16.mxu1 %vm11490_vm3, %v11489_v3  ;;  %9127 = vmatpush3.bf16.msra.mxu1 %v3021_v33  ;;  %v6594_v33 = vpack.c.bf16 %v6436_v32, %v13347_v8  ;;  %v2982_v8 = vld [vmem:[%s11554_s28 + $0x50] sm:$0xff] }
 0x3db   : > { %9834 = vmatprep.mubr.msk.bf16.mxu0 %vm11490_vm3, %v11489_v3  ;;  %9156 = vmatprep.subr.bf16.mxu1 %v11489_v3  ;;  %v2993_v32 = vpack.c.bf16 %v13466_v11, %v2982_v8 }
 0x3e1   : > { %9103 = vmatmul.mubr.msk.bf16.gmra.mrb[4].mxu1 %vm297_vm2, %v2841_v30  ;;  %9835 = vmatmul.mubr.msk.bf16.gmra.mrb[16].mxu0 %vm297_vm2, %v13353_v29  ;;  %v6595_v30 = vpack.c.bf16 %v6438_v47, %v13366_v13  ;;  %v6596_v13 = vpack.c.bf16 %v6589_v55, %v13381_v0  ;;  %v6740_v0 = vpack.c.bf16 %v13190_v6, %v13178_v28  ;;  %v13575_v55 = vld [vmem:[%s11554_s28 + $0x61] sm:$0xff] }
 0x3e2   : > { %9106 = vmatprep.mubr.msk.bf16.mxu1 %vm11490_vm3, %v11489_v3  ;;  %9838 = vmatprep.mubr.msk.bf16.mxu0 %vm11490_vm3, %v11489_v3  ;;  %v6741_v6 = vpack.c.bf16 %v13206_v25, %v13193_v54  ;;  %v3126_v54 = vld [vmem:[%s11554_s28 + $0x21] sm:$0xff]  ;;  %v3127_v25 = vld [vmem:[%s11554_s28 + $0x29] sm:$0xff] }
 0x3e9   : > { %9107 = vmatmul.mubr.msk.bf16.gmra.mrb[8].mxu1 %vm297_vm2, %v2842_v7  ;;  %9839 = vmatmul.mubr.msk.bf16.gmra.mrb[20].mxu0 %vm297_vm2, %v6445_v41  ;;  %v13478_v7 = vld [vmem:[%s11554_s28 + $0x60] sm:$0xff]  ;;  %v13481_v41 = vld [vmem:[%s11554_s28 + $0x68] sm:$0xff] }
 0x3ea   : > { %9110 = vmatprep.mubr.msk.bf16.mxu1 %vm11490_vm3, %v11489_v3  ;;  %9842 = vmatprep.mubr.msk.bf16.mxu0 %vm11490_vm3, %v11489_v3  ;;  %v2994_v47 = vpack.c.bf16 %v13481_v41, %v13478_v7 }
 0x3f1   : > { %9111 = vmatmul.mubr.msk.bf16.gmra.mrb[12].mxu1 %vm297_vm2, %v2843_v59  ;;  %9843 = vmatmul.mubr.msk.bf16.gmra.mrb[24].mxu0 %vm297_vm2, %v6446_v61  ;;  %v6921_v59 = vsel %vm319_vm1, %v8150_v48, 0  ;;  %v13494_v61 = vld [vmem:[%s11554_s28 + $0x70] sm:$0xff] }
 0x3f2   : > { %9114 = vmatprep.mubr.msk.bf16.mxu1 %vm11490_vm3, %v11489_v3  ;;  %9848 = vmatprep.mubr.msk.bf16.mxu0 %vm11490_vm3, %v11489_v3  ;;  %v2995_v28 = vpack.c.bf16 %v13497_v24, %v13494_v61 }
 0x3f9   : > { %9115 = vmatmul.mubr.msk.bf16.gmra.mrb[16].mxu1 %vm297_vm2, %v2844_v39  ;;  %9849 = vmatmul.mubr.msk.bf16.vlgmr.msra.gmra.mrb[0].mxu0 %vm297_vm2, %v12985_v2  ;;  %v2846_v2 = vpack.c.bf16 %v12828_v15, %v12815_v26  ;;  %v6593_v26 = vpack.c.bf16 %v6434_v23, %v13116_v22  ;;  %v3171_v15 = vsel %vm319_vm1, %v7950_v9, 0  ;;  %v2991_v22 = vpack.c.bf16 %v2979_v46, %v2978_v51  ;;  %v6737_v51 = vld [vmem:[%s11554_s28 + $0xad] sm:$0xff] }
 0x3fa   : > { %9877 = vmatpush3.bf16.msra.mxu0 %v6771_v17  ;;  %9118 = vmatprep.mubr.msk.bf16.mxu1 %vm11490_vm3, %v11489_v3  ;;  %v2992_v23 = vpack.c.bf16 %v2981_v21, %v2980_v20  ;;  %v2996_v39 = vpack.c.bf16 %v12932_v14, %v12914_v56  ;;  %v6742_v17 = vpack.c.bf16 %v13225_v38, %v13209_v36  ;;  %v7958_v56 = vld [vmem:[%s11549_s25 + $0x28] sm:$0x3]  ;;  %v13563_v20 = vld [vmem:[%s11554_s28 + $0x59] sm:$0xff] }
 0x3fb   : > { %9852 = vmatprep.mubr.msk.bf16.mxu0 %vm11490_vm3, %v11489_v3  ;;  %9906 = vmatprep.subr.bf16.mxu0 %v11489_v3  ;;  %v3140_v14 = vpack.c.bf16 %v3127_v25, %v3126_v54  ;;  %v3321_v38 = vsel %vm319_vm1, %v7958_v56, 0  ;;  %v6738_v21 = vld [vmem:[%s11554_s28 + $0xb5] sm:$0xff]  ;;  %v13642_v25 = vld [vmem:[%s11554_s28 + $0x42] sm:$0xff]  ;;  %v13649_v56 = vld [vmem:[%s11554_s28 + $0x4a] sm:$0xff] }
 0x401   : > { %9119 = vmatmul.mubr.msk.bf16.gmra.mrb[20].mxu1 %vm297_vm2, %v2845_v37  ;;  %9853 = vmatmul.mubr.msk.bf16.gmra.mrb[4].mxu0 %vm297_vm2, %v13003_v35  ;;  %v2976_v35 = vld [vmem:[%s11554_s28 + $0x20] sm:$0xff]  ;;  %v13525_v37 = vld [vmem:[%s11554_s28 + $0x8d] sm:$0xff] }
 0x402   : > { %9122 = vmatprep.mubr.msk.bf16.mxu1 %vm11490_vm3, %v11489_v3  ;;  %9856 = vmatprep.mubr.msk.bf16.mxu0 %vm11490_vm3, %v11489_v3  ;;  %v2990_v44 = vpack.c.bf16 %v2977_v49, %v2976_v35  ;;  %v6743_v36 = vpack.c.bf16 %v13525_v37, %v13228_v4  ;;  %v13538_v35 = vld [vmem:[%s11554_s28 + $0x95] sm:$0xff]  ;;  %v6735_v49 = vld [vmem:[%s11554_s28 + $0x9d] sm:$0xff] }
 0x403   : > { %v6744_v9 = vpack.c.bf16 %v6735_v49, %v13538_v35  ;;  %v13663_v49 = vld [vmem:[%s11554_s28 + $0x5a] sm:$0xff] }
 0x409   : > { %9123 = vmatmul.mubr.msk.bf16.gmra.mrb[24].mxu1 %vm297_vm2, %v2846_v2  ;;  %9857 = vmatmul.mubr.msk.bf16.gmra.mrb[8].mxu0 %vm297_vm2, %v6592_v50  ;;  %v3128_v2 = vld [vmem:[%s11554_s28 + $0x31] sm:$0xff]  ;;  %v3129_v50 = vld [vmem:[%s11554_s28 + $0x39] sm:$0xff] }
 0x40a   : > { %9128 = vmatprep.mubr.msk.bf16.mxu1 %vm11490_vm3, %v11489_v3  ;;  %9860 = vmatprep.mubr.msk.bf16.mxu0 %vm11490_vm3, %v11489_v3  ;;  %v3141_v4 = vpack.c.bf16 %v3129_v50, %v3128_v2  ;;  %v3282_v50 = vld [vmem:[%s11554_s28 + $0x52] sm:$0xff] }
 0x411   : > { %9129 = vmatmul.mubr.msk.bf16.vlgmr.msra.gmra.mrb[0].mxu1 %vm297_vm2, %v2990_v44  ;;  %9861 = vmatmul.mubr.msk.bf16.gmra.mrb[12].mxu0 %vm297_vm2, %v6593_v26  ;;  %v3130_v44 = vld [vmem:[%s11554_s28 + $0x41] sm:$0xff]  ;;  %v3131_v26 = vld [vmem:[%s11554_s28 + $0x49] sm:$0xff] }
 0x412   : > { %9132 = vmatprep.mubr.msk.bf16.mxu1 %vm11490_vm3, %v11489_v3  ;;  %9157 = vmatpush3.bf16.msra.mxu1 %v3171_v15  ;;  %v6736_v15 = vld [vmem:[%s11554_s28 + $0xa5] sm:$0xff]  ;;  %v3142_v46 = vpack.c.bf16 %v3131_v26, %v3130_v44  ;;  %v3293_v44 = vpack.c.bf16 %v13663_v49, %v3282_v50 }
 0x413   : > { %9864 = vmatprep.mubr.msk.bf16.mxu0 %vm11490_vm3, %v11489_v3  ;;  %9186 = vmatprep.subr.bf16.mxu1 %v11489_v3 }
 0x419   : > { %9133 = vmatmul.mubr.msk.bf16.gmra.mrb[4].mxu1 %vm297_vm2, %v2991_v22  ;;  %9865 = vmatmul.mubr.msk.bf16.gmra.mrb[16].mxu0 %vm297_vm2, %v6594_v33  ;;  %v6745_v22 = vpack.c.bf16 %v6737_v51, %v6736_v15  ;;  %v3132_v33 = vld [vmem:[%s11554_s28 + $0x51] sm:$0xff]  ;;  %v3284_v15 = vld [vmem:[%s11554_s28 + $0x62] sm:$0xff] }
 0x41a   : > { %9136 = vmatprep.mubr.msk.bf16.mxu1 %vm11490_vm3, %v11489_v3  ;;  %9868 = vmatprep.mubr.msk.bf16.mxu0 %vm11490_vm3, %v11489_v3  ;;  %v3285_v51 = vld [vmem:[%s11554_s28 + $0x6a] sm:$0xff] }
 0x421   : > { %9137 = vmatmul.mubr.msk.bf16.gmra.mrb[8].mxu1 %vm297_vm2, %v2992_v23  ;;  %9869 = vmatmul.mubr.msk.bf16.gmra.mrb[20].mxu0 %vm297_vm2, %v6595_v30  ;;  %v6739_v23 = vld [vmem:[%s11554_s28 + $0xbd] sm:$0xff]  ;;  %v3143_v30 = vpack.c.bf16 %v13563_v20, %v3132_v33  ;;  %v7040_v33 = vpack.c.bf16 %v13392_v34, %v13377_v63  ;;  %v3295_v63 = vpack.c.bf16 %v13137_v1, %v13119_v31  ;;  %v7032_v1 = vld [vmem:[%s11554_s28 + $0x87] sm:$0xff] }
 0x422   : > { %9140 = vmatprep.mubr.msk.bf16.mxu1 %vm11490_vm3, %v11489_v3  ;;  %9872 = vmatprep.mubr.msk.bf16.mxu0 %vm11490_vm3, %v11489_v3  ;;  %v6746_v8 = vpack.c.bf16 %v6739_v23, %v6738_v21  ;;  %v7041_v34 = vpack.c.bf16 %v13407_v12, %v13395_v57  ;;  %v7031_v23 = vld [vmem:[%s11554_s28 + $0x7f] sm:$0xff]  ;;  %v7033_v57 = vld [vmem:[%s11554_s28 + $0x8f] sm:$0xff]  ;;  %v7974_v12 = vld [vmem:[%s11549_s25 + $0x2c] sm:$0x3] }
 0x423   : > { %v7042_v31 = vpack.c.bf16 %v7031_v23, %v13410_v60  ;;  %v3621_v60 = vsel %vm319_vm1, %v7974_v12, 0  ;;  %v3583_v23 = vld [vmem:[%s11554_s28 + $0x63] sm:$0xff]  ;;  %v3584_v12 = vld [vmem:[%s11554_s28 + $0x6b] sm:$0xff] }
 0x429   : > { %9141 = vmatmul.mubr.msk.bf16.gmra.mrb[12].mxu1 %vm297_vm2, %v2993_v32  ;;  %9873 = vmatmul.mubr.msk.bf16.gmra.mrb[24].mxu0 %vm297_vm2, %v6596_v13  ;;  %v13578_v32 = vld [vmem:[%s11554_s28 + $0x69] sm:$0xff]  ;;  %v8158_v13 = vld [vmem:[%s11549_s25 + $0x5a] sm:$0x3] }
 0x42a   : > { %9144 = vmatprep.mubr.msk.bf16.mxu1 %vm11490_vm3, %v11489_v3  ;;  %9878 = vmatprep.mubr.msk.bf16.mxu0 %vm11490_vm3, %v11489_v3  ;;  %v3144_v48 = vpack.c.bf16 %v13578_v32, %v13575_v55 }
 0x431   : > { %9145 = vmatmul.mubr.msk.bf16.gmra.mrb[16].mxu1 %vm297_vm2, %v2994_v47  ;;  %9879 = vmatmul.mubr.msk.bf16.vlgmr.msra.gmra.mrb[0].mxu0 %vm297_vm2, %v6740_v0  ;;  %v6890_v47 = vpack.c.bf16 %v13287_v42, %v13275_v10  ;;  %v7071_v0 = vsel %vm319_vm1, %v8158_v13, 0  ;;  %v3145_v10 = vpack.c.bf16 %v13028_v43, %v13015_v27  ;;  %v6891_v42 = vpack.c.bf16 %v13302_v45, %v13290_v18  ;;  %v3276_v43 = vld [vmem:[%s11554_s28 + $0x22] sm:$0xff]  ;;  %v13615_v18 = vld [vmem:[%s11554_s28 + $0x2a] sm:$0xff] }
 0x432   : > { %9907 = vmatpush3.bf16.msra.mxu0 %v6921_v59  ;;  %9148 = vmatprep.mubr.msk.bf16.mxu1 %vm11490_vm3, %v11489_v3  ;;  %v3146_v59 = vpack.c.bf16 %v13044_v16, %v13031_v53  ;;  %v6892_v27 = vpack.c.bf16 %v13320_v19, %v13305_v58  ;;  %v6883_v53 = vld [vmem:[%s11554_s28 + $0x8e] sm:$0xff]  ;;  %v7966_v16 = vld [vmem:[%s11549_s25 + $0x2a] sm:$0x3]  ;;  %v3290_v45 = vpack.c.bf16 %v13615_v18, %v3276_v43  ;;  %v7035_v13 = vld [vmem:[%s11554_s28 + $0x9f] sm:$0xff] }
 0x433   : > { %9882 = vmatprep.mubr.msk.bf16.mxu0 %vm11490_vm3, %v11489_v3  ;;  %9936 = vmatprep.subr.bf16.mxu0 %v11489_v3  ;;  %v6893_v58 = vpack.c.bf16 %v6883_v53, %v13323_v62  ;;  %v3471_v19 = vsel %vm319_vm1, %v7966_v16, 0  ;;  %v6885_v62 = vld [vmem:[%s11554_s28 + $0x9e] sm:$0xff]  ;;  %v3435_v16 = vld [vmem:[%s11554_s28 + $0x72] sm:$0xff] }
 0x434   : > { %v7039_v43 = vld [vmem:[%s11554_s28 + $0xbf] sm:$0xff] }
 0x439   : > { %9149 = vmatmul.mubr.msk.bf16.gmra.mrb[20].mxu1 %vm297_vm2, %v2995_v28  ;;  %9883 = vmatmul.mubr.msk.bf16.gmra.mrb[4].mxu0 %vm297_vm2, %v6741_v6  ;;  %v13625_v28 = vld [vmem:[%s11554_s28 + $0x32] sm:$0xff]  ;;  %v13630_v6 = vld [vmem:[%s11554_s28 + $0x3a] sm:$0xff] }
 0x43a   : > { %9152 = vmatprep.mubr.msk.bf16.mxu1 %vm11490_vm3, %v11489_v3  ;;  %9886 = vmatprep.mubr.msk.bf16.mxu0 %vm11490_vm3, %v11489_v3 }
 0x441   : > { %9153 = vmatmul.mubr.msk.bf16.gmra.mrb[24].mxu1 %vm297_vm2, %v2996_v39  ;;  %9887 = vmatmul.mubr.msk.bf16.gmra.mrb[8].mxu0 %vm297_vm2, %v6742_v17  ;;  %v6884_v39 = vld [vmem:[%s11554_s28 + $0x96] sm:$0xff]  ;;  %v3291_v17 = vpack.c.bf16 %v13630_v6, %v13625_v28 }
 0x442   : > { %9158 = vmatprep.mubr.msk.bf16.mxu1 %vm11490_vm3, %v11489_v3  ;;  %9890 = vmatprep.mubr.msk.bf16.mxu0 %vm11490_vm3, %v11489_v3  ;;  %v6894_v54 = vpack.c.bf16 %v6885_v62, %v6884_v39  ;;  %v3437_v39 = vld [vmem:[%s11554_s28 + $0x82] sm:$0xff]  ;;  %v3438_v62 = vld [vmem:[%s11554_s28 + $0x8a] sm:$0xff] }
 0x449   : > { %9159 = vmatmul.mubr.msk.bf16.vlgmr.msra.gmra.mrb[0].mxu1 %vm297_vm2, %v3140_v14  ;;  %9891 = vmatmul.mubr.msk.bf16.gmra.mrb[12].mxu0 %vm297_vm2, %v6743_v36  ;;  %v6886_v14 = vld [vmem:[%s11554_s28 + $0xa6] sm:$0xff]  ;;  %v6887_v36 = vld [vmem:[%s11554_s28 + $0xae] sm:$0xff] }
 0x44a   : > { %9162 = vmatprep.mubr.msk.bf16.mxu1 %vm11490_vm3, %v11489_v3  ;;  %9187 = vmatpush3.bf16.msra.mxu1 %v3321_v38  ;;  %v3292_v38 = vpack.c.bf16 %v13649_v56, %v13642_v25  ;;  %v6895_v2 = vpack.c.bf16 %v6887_v36, %v6886_v14  ;;  %v7182_v14 = vld [vmem:[%s11554_s28 + $0x88] sm:$0xff]  ;;  %v7183_v36 = vld [vmem:[%s11554_s28 + $0x90] sm:$0xff] }
 0x44b   : > { %9894 = vmatprep.mubr.msk.bf16.mxu0 %vm11490_vm3, %v11489_v3  ;;  %9216 = vmatprep.subr.bf16.mxu1 %v11489_v3 }
 0x451   : > { %9163 = vmatmul.mubr.msk.bf16.gmra.mrb[4].mxu1 %vm297_vm2, %v3141_v4  ;;  %9895 = vmatmul.mubr.msk.bf16.gmra.mrb[16].mxu0 %vm297_vm2, %v6744_v9  ;;  %v6888_v4 = vld [vmem:[%s11554_s28 + $0xb6] sm:$0xff]  ;;  %v6889_v9 = vld [vmem:[%s11554_s28 + $0xbe] sm:$0xff] }
 0x452   : > { %9166 = vmatprep.mubr.msk.bf16.mxu1 %vm11490_vm3, %v11489_v3  ;;  %9898 = vmatprep.mubr.msk.bf16.mxu0 %vm11490_vm3, %v11489_v3  ;;  %v6896_v26 = vpack.c.bf16 %v6889_v9, %v6888_v4  ;;  %v3579_v4 = vld [vmem:[%s11554_s28 + $0x43] sm:$0xff]  ;;  %v7184_v9 = vld [vmem:[%s11554_s28 + $0x98] sm:$0xff] }
 0x459   : > { %9167 = vmatmul.mubr.msk.bf16.gmra.mrb[8].mxu1 %vm297_vm2, %v3142_v46  ;;  %9899 = vmatmul.mubr.msk.bf16.gmra.mrb[20].mxu0 %vm297_vm2, %v6745_v22  ;;  %v8166_v46 = vld [vmem:[%s11549_s25 + $0x5c] sm:$0x3]  ;;  %v3294_v22 = vpack.c.bf16 %v3285_v51, %v3284_v15 }
 0x45a   : > { %9170 = vmatprep.mubr.msk.bf16.mxu1 %vm11490_vm3, %v11489_v3  ;;  %9902 = vmatprep.mubr.msk.bf16.mxu0 %vm11490_vm3, %v11489_v3  ;;  %v7221_v21 = vsel %vm319_vm1, %v8166_v46, 0  ;;  %v3581_v46 = vld [vmem:[%s11554_s28 + $0x53] sm:$0xff] }
 0x461   : > { %9171 = vmatmul.mubr.msk.bf16.gmra.mrb[12].mxu1 %vm297_vm2, %v3143_v30  ;;  %9903 = vmatmul.mubr.msk.bf16.gmra.mrb[24].mxu0 %vm297_vm2, %v6746_v8  ;;  %v3296_v30 = vpack.c.bf16 %v13153_v40, %v13140_v52  ;;  %v3440_v52 = vpack.c.bf16 %v13625_v28, %v13615_v18  ;;  %v7043_v40 = vpack.c.bf16 %v7033_v57, %v7032_v1  ;;  %v7034_v8 = vld [vmem:[%s11554_s28 + $0x97] sm:$0xff] }
 0x462   : > { %9174 = vmatprep.mubr.msk.bf16.mxu1 %vm11490_vm3, %v11489_v3  ;;  %9908 = vmatprep.mubr.msk.bf16.mxu0 %vm11490_vm3, %v11489_v3  ;;  %v13742_v18 = vpack.c.bf16 %v3284_v15, %v13663_v49  ;;  %v3578_v49 = vld [vmem:[%s11554_s28 + $0x3b] sm:$0xff] }
 0x469   : > { %9175 = vmatmul.mubr.msk.bf16.gmra.mrb[16].mxu1 %vm297_vm2, %v3144_v48  ;;  %9909 = vmatmul.mubr.msk.bf16.vlgmr.msra.gmra.mrb[0].mxu0 %vm297_vm2, %v6890_v47  ;;  %v3441_v48 = vpack.c.bf16 %v13642_v25, %v13630_v6  ;;  %v7044_v47 = vpack.c.bf16 %v7035_v13, %v7034_v8  ;;  %v3436_v6 = vld [vmem:[%s11554_s28 + $0x7a] sm:$0xff]  ;;  %v7340_v8 = vpack.c.bf16 %v13575_v55, %v13563_v20 }
 0x46a   : > { %9937 = vmatpush3.bf16.msra.mxu0 %v7071_v0  ;;  %9178 = vmatprep.mubr.msk.bf16.mxu1 %vm11490_vm3, %v11489_v3  ;;  %v7036_v0 = vld [vmem:[%s11554_s28 + $0xa7] sm:$0xff] }
 0x46b   : > { %9912 = vmatprep.mubr.msk.bf16.mxu0 %vm11490_vm3, %v11489_v3  ;;  %9966 = vmatprep.subr.bf16.mxu0 %v11489_v3 }
 0x471   : > { %9179 = vmatmul.mubr.msk.bf16.gmra.mrb[20].mxu1 %vm297_vm2, %v3145_v10  ;;  %9913 = vmatmul.mubr.msk.bf16.gmra.mrb[4].mxu0 %vm297_vm2, %v6891_v42  ;;  %v7037_v10 = vld [vmem:[%s11554_s28 + $0xaf] sm:$0xff]  ;;  %v3442_v42 = vpack.c.bf16 %v3282_v50, %v13649_v56 }
 0x472   : > { %9182 = vmatprep.mubr.msk.bf16.mxu1 %vm11490_vm3, %v11489_v3  ;;  %9916 = vmatprep.mubr.msk.bf16.mxu0 %vm11490_vm3, %v11489_v3  ;;  %v3577_v56 = vld [vmem:[%s11554_s28 + $0x33] sm:$0xff] }
 0x479   : > { %9183 = vmatmul.mubr.msk.bf16.gmra.mrb[24].mxu1 %vm297_vm2, %v3146_v59  ;;  %9917 = vmatmul.mubr.msk.bf16.gmra.mrb[8].mxu0 %vm297_vm2, %v6892_v27  ;;  %v7045_v59 = vpack.c.bf16 %v7037_v10, %v7036_v0  ;;  %v7038_v27 = vld [vmem:[%s11554_s28 + $0xb7] sm:$0xff]  ;;  %v3588_v10 = vld [vmem:[%s11554_s28 + $0x8b] sm:$0xff] }
 0x47a   : > { %9188 = vmatprep.mubr.msk.bf16.mxu1 %vm11490_vm3, %v11489_v3  ;;  %9920 = vmatprep.mubr.msk.bf16.mxu0 %vm11490_vm3, %v11489_v3  ;;  %v7046_v53 = vpack.c.bf16 %v7039_v43, %v7038_v27  ;;  %v7329_v0 = vld [vmem:[%s11554_s28 + $0x71] sm:$0xff]  ;;  %v7331_v27 = vld [vmem:[%s11554_s28 + $0x81] sm:$0xff] }
 0x47b   : > { %v7341_v55 = vpack.c.bf16 %v7329_v0, %v13578_v32 }
 0x481   : > { %9189 = vmatmul.mubr.msk.bf16.vlgmr.msra.gmra.mrb[0].mxu1 %vm297_vm2, %v3290_v45  ;;  %9921 = vmatmul.mubr.msk.bf16.gmra.mrb[12].mxu0 %vm297_vm2, %v6893_v58  ;;  %v8174_v45 = vld [vmem:[%s11549_s25 + $0x5e] sm:$0x3]  ;;  %v13753_v58 = vpack.c.bf16 %v3435_v16, %v3285_v51  ;;  %v3580_v51 = vld [vmem:[%s11554_s28 + $0x4b] sm:$0xff]  ;;  %v3727_v16 = vld [vmem:[%s11554_s28 + $0x34] sm:$0xff] }
 0x482   : > { %9192 = vmatprep.mubr.msk.bf16.mxu1 %vm11490_vm3, %v11489_v3  ;;  %9217 = vmatpush3.bf16.msra.mxu1 %v3471_v19  ;;  %v7190_v19 = vpack.c.bf16 %v13478_v7, %v13466_v11  ;;  %v7371_v28 = vsel %vm319_vm1, %v8174_v45, 0  ;;  %v13768_v11 = vpack.c.bf16 %v3437_v39, %v3436_v6  ;;  %v7191_v7 = vpack.c.bf16 %v13494_v61, %v13481_v41  ;;  %v3576_v61 = vld [vmem:[%s11554_s28 + $0x2b] sm:$0xff]  ;;  %v3728_v39 = vld [vmem:[%s11554_s28 + $0x3c] sm:$0xff] }
 0x483   : > { %9924 = vmatprep.mubr.msk.bf16.mxu0 %vm11490_vm3, %v11489_v3  ;;  %9246 = vmatprep.subr.bf16.mxu1 %v11489_v3  ;;  %v7332_v45 = vld [vmem:[%s11554_s28 + $0x89] sm:$0xff] }
 0x489   : > { %9193 = vmatmul.mubr.msk.bf16.gmra.mrb[4].mxu1 %vm297_vm2, %v3291_v17  ;;  %9925 = vmatmul.mubr.msk.bf16.gmra.mrb[16].mxu0 %vm297_vm2, %v6894_v54  ;;  %v3439_v17 = vld [vmem:[%s11554_s28 + $0x92] sm:$0xff]  ;;  %v7181_v54 = vld [vmem:[%s11554_s28 + $0x80] sm:$0xff] }
 0x48a   : > { %9196 = vmatprep.mubr.msk.bf16.mxu1 %vm11490_vm3, %v11489_v3  ;;  %9928 = vmatprep.mubr.msk.bf16.mxu0 %vm11490_vm3, %v11489_v3  ;;  %v13782_v25 = vpack.c.bf16 %v3439_v17, %v3438_v62  ;;  %v7192_v41 = vpack.c.bf16 %v7181_v54, %v13497_v24  ;;  %v3590_v24 = vpack.c.bf16 %v3577_v56, %v3576_v61  ;;  %v7334_v62 = vld [vmem:[%s11554_s28 + $0x99] sm:$0xff]  ;;  %v7335_v17 = vld [vmem:[%s11554_s28 + $0xa1] sm:$0xff]  ;;  %v3730_v61 = vld [vmem:[%s11554_s28 + $0x4c] sm:$0xff] }
 0x48b   : > { %v7336_v56 = vld [vmem:[%s11554_s28 + $0xa9] sm:$0xff] }
 0x491   : > { %9197 = vmatmul.mubr.msk.bf16.gmra.mrb[8].mxu1 %vm297_vm2, %v3292_v38  ;;  %9929 = vmatmul.mubr.msk.bf16.gmra.mrb[20].mxu0 %vm297_vm2, %v6895_v2  ;;  %v7982_v38 = vld [vmem:[%s11549_s25 + $0x2e] sm:$0x3]  ;;  %v7193_v2 = vpack.c.bf16 %v7183_v36, %v7182_v14  ;;  %v7337_v14 = vld [vmem:[%s11554_s28 + $0xb1] sm:$0xff] }
 0x492   : > { %9200 = vmatprep.mubr.msk.bf16.mxu1 %vm11490_vm3, %v11489_v3  ;;  %9932 = vmatprep.mubr.msk.bf16.mxu0 %vm11490_vm3, %v11489_v3  ;;  %v3771_v50 = vsel %vm319_vm1, %v7982_v38, 0  ;;  %v7345_v38 = vpack.c.bf16 %v7337_v14, %v7336_v56 }
 0x499   : > { %9201 = vmatmul.mubr.msk.bf16.gmra.mrb[12].mxu1 %vm297_vm2, %v3293_v44  ;;  %9933 = vmatmul.mubr.msk.bf16.gmra.mrb[24].mxu0 %vm297_vm2, %v6896_v26  ;;  %v7185_v44 = vld [vmem:[%s11554_s28 + $0xa0] sm:$0xff]  ;;  %v3591_v26 = vpack.c.bf16 %v3579_v4, %v3578_v49 }
 0x49a   : > { %9204 = vmatprep.mubr.msk.bf16.mxu1 %vm11490_vm3, %v11489_v3  ;;  %9938 = vmatprep.mubr.msk.bf16.mxu0 %vm11490_vm3, %v11489_v3  ;;  %v7194_v15 = vpack.c.bf16 %v7185_v44, %v7184_v9  ;;  %v7339_v49 = vld [vmem:[%s11554_s28 + $0xc1] sm:$0xff]  ;;  %v3734_v44 = vld [vmem:[%s11554_s28 + $0x6c] sm:$0xff] }
 0x4a1   : > { %9205 = vmatmul.mubr.msk.bf16.gmra.mrb[16].mxu1 %vm297_vm2, %v3294_v22  ;;  %9939 = vmatmul.mubr.msk.bf16.vlgmr.msra.gmra.mrb[0].mxu0 %vm297_vm2, %v7040_v33  ;;  %v7186_v22 = vld [vmem:[%s11554_s28 + $0xa8] sm:$0xff]  ;;  %v7187_v33 = vld [vmem:[%s11554_s28 + $0xb0] sm:$0xff] }
 0x4a2   : > { %9967 = vmatpush3.bf16.msra.mxu0 %v7221_v21  ;;  %9208 = vmatprep.mubr.msk.bf16.mxu1 %vm11490_vm3, %v11489_v3  ;;  %v3592_v21 = vpack.c.bf16 %v3581_v46, %v3580_v51  ;;  %v3736_v51 = vld [vmem:[%s11554_s28 + $0x7c] sm:$0xff]  ;;  %v3737_v46 = vld [vmem:[%s11554_s28 + $0x84] sm:$0xff] }
 0x4a3   : > { %9942 = vmatprep.mubr.msk.bf16.mxu0 %vm11490_vm3, %v11489_v3  ;;  %9996 = vmatprep.subr.bf16.mxu0 %v11489_v3 }
 0x4a9   : > { %9209 = vmatmul.mubr.msk.bf16.gmra.mrb[20].mxu1 %vm297_vm2, %v3295_v63  ;;  %9943 = vmatmul.mubr.msk.bf16.gmra.mrb[4].mxu0 %vm297_vm2, %v7041_v34  ;;  %v7195_v63 = vpack.c.bf16 %v7187_v33, %v7186_v22  ;;  %v3582_v34 = vld [vmem:[%s11554_s28 + $0x5b] sm:$0xff]  ;;  %v3745_v22 = vpack.c.bf16 %v3737_v46, %v3736_v51  ;;  %v267_v46 = vld [vmem:[#allocation2 + $0x30] sm:$0xff] }
 0x4aa   : > { %9212 = vmatprep.mubr.msk.bf16.mxu1 %vm11490_vm3, %v11489_v3  ;;  %9946 = vmatprep.mubr.msk.bf16.mxu0 %vm11490_vm3, %v11489_v3  ;;  %v3593_v1 = vpack.c.bf16 %v3583_v23, %v3582_v34 }
 0x4b1   : > { %9213 = vmatmul.mubr.msk.bf16.gmra.mrb[24].mxu1 %vm297_vm2, %v3296_v30  ;;  %9947 = vmatmul.mubr.msk.bf16.gmra.mrb[8].mxu0 %vm297_vm2, %v7042_v31  ;;  %v7188_v30 = vld [vmem:[%s11554_s28 + $0xb8] sm:$0xff]  ;;  %v7189_v31 = vld [vmem:[%s11554_s28 + $0xc0] sm:$0xff] }
 0x4b2   : > { %9218 = vmatprep.mubr.msk.bf16.mxu1 %vm11490_vm3, %v11489_v3  ;;  %9950 = vmatprep.mubr.msk.bf16.mxu0 %vm11490_vm3, %v11489_v3  ;;  %v7196_v57 = vpack.c.bf16 %v7189_v31, %v7188_v30  ;;  %v7487_v30 = vld [vmem:[%s11554_s28 + $0xb2] sm:$0xff]  ;;  %v3896_v31 = vpack.c.bf16 %v13538_v35, %v13525_v37 }
 0x4b9   : > { %9219 = vmatmul.mubr.msk.bf16.vlgmr.msra.gmra.mrb[0].mxu1 %vm297_vm2, %v3440_v52  ;;  %9951 = vmatmul.mubr.msk.bf16.gmra.mrb[12].mxu0 %vm297_vm2, %v7043_v40  ;;  %v3585_v52 = vld [vmem:[%s11554_s28 + $0x73] sm:$0xff]  ;;  %v8182_v40 = vld [vmem:[%s11549_s25 + $0x60] sm:$0x3] }
 0x4ba   : > { %9222 = vmatprep.mubr.msk.bf16.mxu1 %vm11490_vm3, %v11489_v3  ;;  %9247 = vmatpush3.bf16.msra.mxu1 %v3621_v60  ;;  %v3594_v60 = vpack.c.bf16 %v3585_v52, %v3584_v12  ;;  %v7521_v13 = vsel %vm319_vm1, %v8182_v40, 0  ;;  %v7489_v12 = vld [vmem:[%s11554_s28 + $0xc2] sm:$0xff] }
 0x4bb   : > { %9954 = vmatprep.mubr.msk.bf16.mxu0 %vm11490_vm3, %v11489_v3  ;;  %9276 = vmatprep.subr.bf16.mxu1 %v11489_v3 }
 0x4c1   : > { %9223 = vmatmul.mubr.msk.bf16.gmra.mrb[4].mxu1 %vm297_vm2, %v3441_v48  ;;  %9955 = vmatmul.mubr.msk.bf16.gmra.mrb[16].mxu0 %vm297_vm2, %v7044_v47  ;;  %v3586_v48 = vld [vmem:[%s11554_s28 + $0x7b] sm:$0xff]  ;;  %v3587_v47 = vld [vmem:[%s11554_s28 + $0x83] sm:$0xff] }
 0x4c2   : > { %9226 = vmatprep.mubr.msk.bf16.mxu1 %vm11490_vm3, %v11489_v3  ;;  %9958 = vmatprep.mubr.msk.bf16.mxu0 %vm11490_vm3, %v11489_v3  ;;  %v3595_v20 = vpack.c.bf16 %v3587_v47, %v3586_v48 }
 0x4c9   : > { %9227 = vmatmul.mubr.msk.bf16.gmra.mrb[8].mxu1 %vm297_vm2, %v3442_v42  ;;  %9959 = vmatmul.mubr.msk.bf16.gmra.mrb[20].mxu0 %vm297_vm2, %v7045_v59  ;;  %v3589_v42 = vld [vmem:[%s11554_s28 + $0x93] sm:$0xff] }
 0x4ca   : > { %9230 = vmatprep.mubr.msk.bf16.mxu1 %vm11490_vm3, %v11489_v3  ;;  %9962 = vmatprep.mubr.msk.bf16.mxu0 %vm11490_vm3, %v11489_v3  ;;  %v7330_v59 = vld [vmem:[%s11554_s28 + $0x79] sm:$0xff]  ;;  %v3596_v43 = vpack.c.bf16 %v3589_v42, %v3588_v10 }
 0x4cb   : > { %v7342_v32 = vpack.c.bf16 %v7331_v27, %v7330_v59 }
 0x4d1   : > { %9231 = vmatmul.mubr.msk.bf16.gmra.mrb[12].mxu1 %vm297_vm2, %v13742_v18  ;;  %9963 = vmatmul.mubr.msk.bf16.gmra.mrb[24].mxu0 %vm297_vm2, %v7046_v53  ;;  %v3726_v53 = vld [vmem:[%s11554_s28 + $0x2c] sm:$0xff] }
 0x4d2   : > { %9234 = vmatprep.mubr.msk.bf16.mxu1 %vm11490_vm3, %v11489_v3  ;;  %9968 = vmatprep.mubr.msk.bf16.mxu0 %vm11490_vm3, %v11489_v3 }
 0x4d9   : > { %9235 = vmatmul.mubr.msk.bf16.gmra.mrb[16].mxu1 %vm297_vm2, %v13753_v58  ;;  %9969 = vmatmul.mubr.msk.bf16.vlgmr.msra.gmra.mrb[0].mxu0 %vm297_vm2, %v7190_v19  ;;  %v7333_v19 = vld [vmem:[%s11554_s28 + $0x91] sm:$0xff] }
 0x4da   : > { %9997 = vmatpush3.bf16.msra.mxu0 %v7371_v28  ;;  %9238 = vmatprep.mubr.msk.bf16.mxu1 %vm11490_vm3, %v11489_v3  ;;  %v3740_v28 = vpack.c.bf16 %v3727_v16, %v3726_v53  ;;  %v7343_v6 = vpack.c.bf16 %v7333_v19, %v7332_v45 }
 0x4db   : > { %9972 = vmatprep.mubr.msk.bf16.mxu0 %vm11490_vm3, %v11489_v3  ;;  %10026 = vmatprep.subr.bf16.mxu0 %v11489_v3 }
 0x4e1   : > { %9239 = vmatmul.mubr.msk.bf16.gmra.mrb[20].mxu1 %vm297_vm2, %v13768_v11  ;;  %9973 = vmatmul.mubr.msk.bf16.gmra.mrb[4].mxu0 %vm297_vm2, %v7191_v7  ;;  %v3729_v7 = vld [vmem:[%s11554_s28 + $0x44] sm:$0xff] }
 0x4e2   : > { %9242 = vmatprep.mubr.msk.bf16.mxu1 %vm11490_vm3, %v11489_v3  ;;  %9976 = vmatprep.mubr.msk.bf16.mxu0 %vm11490_vm3, %v11489_v3  ;;  %v3741_v54 = vpack.c.bf16 %v3729_v7, %v3728_v39 }
 0x4e9   : > { %9243 = vmatmul.mubr.msk.bf16.gmra.mrb[24].mxu1 %vm297_vm2, %v13782_v25  ;;  %9977 = vmatmul.mubr.msk.bf16.gmra.mrb[8].mxu0 %vm297_vm2, %v7192_v41  ;;  %v7344_v41 = vpack.c.bf16 %v7335_v17, %v7334_v62  ;;  %v263_v62 = vld [vmem:[#allocation2 + $0x10] sm:$0xff]  ;;  %v264_v17 = vld [vmem:[#allocation2 + $0x18] sm:$0xff] }
 0x4ea   : > { %9248 = vmatprep.mubr.msk.bf16.mxu1 %vm11490_vm3, %v11489_v3  ;;  %9980 = vmatprep.mubr.msk.bf16.mxu0 %vm11490_vm3, %v11489_v3 }
 0x4f1   : > { %9249 = vmatmul.mubr.msk.bf16.vlgmr.msra.gmra.mrb[0].mxu1 %vm297_vm2, %v3590_v24  ;;  %9981 = vmatmul.mubr.msk.bf16.gmra.mrb[12].mxu0 %vm297_vm2, %v7193_v2  ;;  %v3732_v24 = vld [vmem:[%s11554_s28 + $0x5c] sm:$0xff]  ;;  %v3733_v2 = vld [vmem:[%s11554_s28 + $0x64] sm:$0xff] }
 0x4f2   : > { %9252 = vmatprep.mubr.msk.bf16.mxu1 %vm11490_vm3, %v11489_v3  ;;  %9277 = vmatpush3.bf16.msra.mxu1 %v3771_v50  ;;  %v7338_v50 = vld [vmem:[%s11554_s28 + $0xb9] sm:$0xff]  ;;  %v3743_v4 = vpack.c.bf16 %v3733_v2, %v3732_v24  ;;  %v266_v2 = vld [vmem:[#allocation2 + $0x28] sm:$0xff] }
 0x4f3   : > { %9984 = vmatprep.mubr.msk.bf16.mxu0 %vm11490_vm3, %v11489_v3  ;;  %10056 = vmatprep.subr.bf16.mxu1 %v11489_v3  ;;  %v7346_v9 = vpack.c.bf16 %v7339_v49, %v7338_v50  ;;  %v265_v24 = vld [vmem:[#allocation2 + $0x20] sm:$0xff] }
 0x4f9   : > { %9253 = vmatmul.mubr.msk.bf16.gmra.mrb[4].mxu1 %vm297_vm2, %v3591_v26  ;;  %9985 = vmatmul.mubr.msk.bf16.gmra.mrb[16].mxu0 %vm297_vm2, %v7194_v15  ;;  %v3735_v26 = vld [vmem:[%s11554_s28 + $0x74] sm:$0xff] }
 0x4fa   : > { %9256 = vmatprep.mubr.msk.bf16.mxu1 %vm11490_vm3, %v11489_v3  ;;  %9988 = vmatprep.mubr.msk.bf16.mxu0 %vm11490_vm3, %v11489_v3  ;;  %v3744_v15 = vpack.c.bf16 %v3735_v26, %v3734_v44 }
 0x501   : > { %9257 = vmatmul.mubr.msk.bf16.gmra.mrb[8].mxu1 %vm297_vm2, %v3592_v21  ;;  %9989 = vmatmul.mubr.msk.bf16.gmra.mrb[20].mxu0 %vm297_vm2, %v7195_v63  ;;  %v7484_v21 = vld [vmem:[%s11554_s28 + $0x9a] sm:$0xff]  ;;  %v7485_v63 = vld [vmem:[%s11554_s28 + $0xa2] sm:$0xff] }
 0x502   : > { %9260 = vmatprep.mubr.msk.bf16.mxu1 %vm11490_vm3, %v11489_v3  ;;  %9992 = vmatprep.mubr.msk.bf16.mxu0 %vm11490_vm3, %v11489_v3  ;;  %v7494_v23 = vpack.c.bf16 %v7485_v63, %v7484_v21 }
 0x509   : > { %9261 = vmatmul.mubr.msk.bf16.gmra.mrb[12].mxu1 %vm297_vm2, %v3593_v1  ;;  %9993 = vmatmul.mubr.msk.bf16.gmra.mrb[24].mxu0 %vm297_vm2, %v7196_v57  ;;  %v7488_v57 = vld [vmem:[%s11554_s28 + $0xba] sm:$0xff] }
 0x50a   : > { %9264 = vmatprep.mubr.msk.bf16.mxu1 %vm11490_vm3, %v11489_v3  ;;  %9998 = vmatprep.mubr.msk.bf16.mxu0 %vm11490_vm3, %v11489_v3  ;;  %v7496_v52 = vpack.c.bf16 %v7489_v12, %v7488_v57  ;;  %v270_v57 = vld [vmem:[#allocation2 + $0x48] sm:$0xff] }
 0x511   : > { %9265 = vmatmul.mubr.msk.bf16.gmra.mrb[16].mxu1 %vm297_vm2, %v3594_v60  ;;  %9999 = vmatmul.mubr.msk.bf16.vlgmr.msra.gmra.mrb[0].mxu0 %vm297_vm2, %v7340_v8 }
 0x512   : > { %10027 = vmatpush3.bf16.msra.mxu0 %v7521_v13  ;;  %9268 = vmatprep.mubr.msk.bf16.mxu1 %vm11490_vm3, %v11489_v3 }
 0x513   : > { %10002 = vmatprep.mubr.msk.bf16.mxu0 %vm11490_vm3, %v11489_v3 }
 0x519   : > { %9269 = vmatmul.mubr.msk.bf16.gmra.mrb[20].mxu1 %vm297_vm2, %v3595_v20  ;;  %10003 = vmatmul.mubr.msk.bf16.gmra.mrb[4].mxu0 %vm297_vm2, %v7341_v55 }
 0x51a   : > { %9272 = vmatprep.mubr.msk.bf16.mxu1 %vm11490_vm3, %v11489_v3  ;;  %10006 = vmatprep.mubr.msk.bf16.mxu0 %vm11490_vm3, %v11489_v3 }
 0x521   : > { %9273 = vmatmul.mubr.msk.bf16.gmra.mrb[24].mxu1 %vm297_vm2, %v3596_v43  ;;  %10007 = vmatmul.mubr.msk.bf16.gmra.mrb[8].mxu0 %vm297_vm2, %v7342_v32  ;;  %v261_v43 = vld [vmem:[#allocation2] sm:$0xff]  ;;  %v262_v32 = vld [vmem:[#allocation2 + $0x8] sm:$0xff] }
 0x522   : > { %9278 = vmatprep.mubr.msk.bf16.mxu1 %vm11490_vm3, %v11489_v3  ;;  %10010 = vmatprep.mubr.msk.bf16.mxu0 %vm11490_vm3, %v11489_v3 }
 0x529   : > { %9279 = vmatmul.mubr.msk.bf16.vlgmr.msra.gmra.mrb[0].mxu1 %vm297_vm2, %v3740_v28  ;;  %10011 = vmatmul.mubr.msk.bf16.gmra.mrb[12].mxu0 %vm297_vm2, %v7343_v6 }
 0x52a   : > { %9282 = vmatprep.mubr.msk.bf16.mxu1 %vm11490_vm3, %v11489_v3  ;;  %10057 = vmatpush3.bf16.msra.mxu1 %v11568_v5  ;;  %v3731_v5 = vld [vmem:[%s11554_s28 + $0x54] sm:$0xff] }
 0x52b   : > { %10014 = vmatprep.mubr.msk.bf16.mxu0 %vm11490_vm3, %v11489_v3  ;;  %v3742_v36 = vpack.c.bf16 %v3731_v5, %v3730_v61 }
 0x531   : > { %9283 = vmatmul.mubr.msk.bf16.gmra.mrb[4].mxu1 %vm297_vm2, %v3741_v54  ;;  %10015 = vmatmul.mubr.msk.bf16.gmra.mrb[16].mxu0 %vm297_vm2, %v7344_v41 }
 0x532   : > { %9286 = vmatprep.mubr.msk.bf16.mxu1 %vm11490_vm3, %v11489_v3  ;;  %10018 = vmatprep.mubr.msk.bf16.mxu0 %vm11490_vm3, %v11489_v3 }
 0x539   : > { %9287 = vmatmul.mubr.msk.bf16.gmra.mrb[8].mxu1 %vm297_vm2, %v3742_v36  ;;  %10019 = vmatmul.mubr.msk.bf16.gmra.mrb[20].mxu0 %vm297_vm2, %v7345_v38 }
 0x53a   : > { %9290 = vmatprep.mubr.msk.bf16.mxu1 %vm11490_vm3, %v11489_v3  ;;  %10022 = vmatprep.mubr.msk.bf16.mxu0 %vm11490_vm3, %v11489_v3 }
 0x541   : > { %9291 = vmatmul.mubr.msk.bf16.gmra.mrb[12].mxu1 %vm297_vm2, %v3743_v4  ;;  %10023 = vmatmul.mubr.msk.bf16.gmra.mrb[24].mxu0 %vm297_vm2, %v7346_v9 }
 0x542   : > { %9294 = vmatprep.mubr.msk.bf16.mxu1 %vm11490_vm3, %v11489_v3  ;;  %10028 = vmatprep.mubr.msk.bf16.mxu0 %vm11490_vm3, %v11489_v3 }
 0x549   : > { %9295 = vmatmul.mubr.msk.bf16.gmra.mrb[16].mxu1 %vm297_vm2, %v3744_v15  ;;  %10029 = vmatmul.mubr.msk.bf16.vlgmr.msra.gmra.mrb[0].mxu0 %vm297_vm2, %v13742_v18  ;;  %v3884_v18 = vld [vmem:[%s11554_s28 + $0x6d] sm:$0xff] }
 0x54a   : > { %9298 = vmatprep.mubr.msk.bf16.mxu1 %vm11490_vm3, %v11489_v3  ;;  %10032 = vmatprep.mubr.msk.bf16.mxu0 %vm11490_vm3, %v11489_v3 }
 0x551   : > { %9299 = vmatmul.mubr.msk.bf16.gmra.mrb[20].mxu1 %vm297_vm2, %v3745_v22  ;;  %10033 = vmatmul.mubr.msk.bf16.gmra.mrb[4].mxu0 %vm297_vm2, %v13753_v58  ;;  %v3885_v58 = vld [vmem:[%s11554_s28 + $0x75] sm:$0xff] }
 0x552   : > { %9302 = vmatprep.mubr.msk.bf16.mxu1 %vm11490_vm3, %v11489_v3  ;;  %10036 = vmatprep.mubr.msk.bf16.mxu0 %vm11490_vm3, %v11489_v3  ;;  %v3894_v33 = vpack.c.bf16 %v3885_v58, %v3884_v18  ;;  %v268_v22 = vld [vmem:[#allocation2 + $0x38] sm:$0xff] }
 0x559   : > { %9303 = vmatmul.mubr.msk.bf16.gmra.mrb[24].mxu1 %vm297_vm2, %v13353_v29  ;;  %10037 = vmatmul.mubr.msk.bf16.gmra.mrb[8].mxu0 %vm297_vm2, %v13768_v11  ;;  %v3886_v29 = vld [vmem:[%s11554_s28 + $0x7d] sm:$0xff]  ;;  %v3887_v11 = vld [vmem:[%s11554_s28 + $0x85] sm:$0xff] }
 0x55a   : > { %9324 = vmatprep.mubr.msk.bf16.mxu1 %vm11490_vm3, %v11489_v3  ;;  %10040 = vmatprep.mubr.msk.bf16.mxu0 %vm11490_vm3, %v11489_v3  ;;  %v3895_v34 = vpack.c.bf16 %v3887_v11, %v3886_v29 }
 0x561   : > { %9325 = vmatmul.mubr.msk.bf16.vlgmr.msra.gmra.mrb[16].mxu1 %vm297_vm2, %v3894_v33  ;;  %10041 = vmatmul.mubr.msk.bf16.gmra.mrb[12].mxu0 %vm297_vm2, %v13782_v25  ;;  %v7486_v25 = vld [vmem:[%s11554_s28 + $0xaa] sm:$0xff] }
 0x562   : > { %9328 = vmatprep.mubr.msk.bf16.mxu1 %vm11490_vm3, %v11489_v3  ;;  %10044 = vmatprep.mubr.msk.bf16.mxu0 %vm11490_vm3, %v11489_v3  ;;  %v7495_v1 = vpack.c.bf16 %v7487_v30, %v7486_v25 }
 0x569   : > { %9329 = vmatmul.mubr.msk.bf16.gmra.mrb[20].mxu1 %vm297_vm2, %v3895_v34  ;;  %10045 = vmatmul.mubr.msk.bf16.gmra.mrb[16].mxu0 %vm297_vm2, %v7494_v23 }
 0x56a   : > { %9332 = vmatprep.mubr.msk.bf16.mxu1 %vm11490_vm3, %v11489_v3  ;;  %10048 = vmatprep.mubr.msk.bf16.mxu0 %vm11490_vm3, %v11489_v3 }
 0x571   : > { %9333 = vmatmul.mubr.msk.bf16.gmra.mrb[24].mxu1 %vm297_vm2, %v3896_v31  ;;  %10049 = vmatmul.mubr.msk.bf16.gmra.mrb[20].mxu0 %vm297_vm2, %v7495_v1  ;;  %v269_v1 = vld [vmem:[#allocation2 + $0x40] sm:$0xff] }
 0x572   : > { %10052 = vmatprep.mubr.msk.bf16.mxu0 %vm11490_vm3, %v11489_v3 }
 0x579   : > { %10053 = vmatmul.mubr.msk.bf16.gmra.mrb[24].mxu0 %vm297_vm2, %v7496_v52 }
 0x5fc   : > { %v3807_v40 = vpop.f32.mrb[0].mxu1 }
 0x5fd   : > { %v9280_v60 = vpop.f32.mrb[1].mxu1  ;;  %v10058_v53 = vadd.f32 %v3807_v40, %v261_v43 }
 0x5fe   : > { %v3810_v8 = vpop.f32.mrb[2].mxu1 }
 0x5ff   : > { %v9281_v13 = vpop.f32.mrb[3].mxu1  ;;  %v10060_v45 = vadd.f32 %v3810_v8, %v262_v32 }
 0x604   : > { %v3815_v48 = vpop.f32.mrb[4].mxu1 }
 0x605   : > { %v9284_v47 = vpop.f32.mrb[5].mxu1  ;;  %v10062_v54 = vadd.f32 %v3815_v48, %v263_v62  ;;  %v273_v62 = vld [vmem:[#allocation2 + $0x60] sm:$0xff] }
 0x606   : > { %v3818_v37 = vpop.f32.mrb[6].mxu1 }
 0x607   : > { %v9285_v35 = vpop.f32.mrb[7].mxu1  ;;  %v10064_v61 = vadd.f32 %v3818_v37, %v264_v17  ;;  %v274_v17 = vld [vmem:[#allocation2 + $0x68] sm:$0xff] }
 0x60c   : > { %v3823_v0 = vpop.f32.mrb[8].mxu1 }
 0x60d   : > { %v9288_v20 = vpop.f32.mrb[9].mxu1  ;;  %v10066_v50 = vadd.f32 %v3823_v0, %v265_v24 }
 0x60e   : > { %v3826_v55 = vpop.f32.mrb[10].mxu1 }
 0x60f   : > { %v9289_v10 = vpop.f32.mrb[11].mxu1  ;;  %v10068_v4 = vadd.f32 %v3826_v55, %v266_v2  ;;  %v271_v55 = vld [vmem:[#allocation2 + $0x50] sm:$0xff] }
 0x610   : > { %v272_v10 = vld [vmem:[#allocation2 + $0x58] sm:$0xff] }
 0x614   : > { %v3831_v42 = vpop.f32.mrb[12].mxu1 }
 0x615   : > { %v9292_v59 = vpop.f32.mrb[13].mxu1  ;;  %v10070_v18 = vadd.f32 %v3831_v42, %v267_v46 }
 0x616   : > { %v3834_v3 = vpop.f32.mrb[14].mxu1 }
 0x617   : > { %v9293_v27 = vpop.f32.mrb[15].mxu1  ;;  %v10072_v29 = vadd.f32 %v3834_v3, %v268_v22 }
 0x61c   : > { %v7557_v16 = vpop.f32.mrb[0].mxu0 }
 0x61d   : > { %v13964_v19 = vadd.f32 %v10058_v53, %v7557_v16  ;;  %v10030_v28 = vpop.f32.mrb[1].mxu0 }
 0x61e   : > { %v7560_v6 = vpop.f32.mrb[2].mxu0 }
 0x61f   : > { %7627 = vst.msk [vmem:[#allocation2] sm:$0xff] %vm7626_vm4, %v13964_v19  ;;  %v13968_v39 = vadd.f32 %v10060_v45, %v7560_v6  ;;  %v10031_v7 = vpop.f32.mrb[3].mxu0 }
 0x621   : > { %7628 = vst.msk [vmem:[#allocation2 + $0x8] sm:$0xff] %vm7626_vm4, %v13968_v39 }
 0x624   : > { %v7565_v41 = vpop.f32.mrb[4].mxu0 }
 0x625   : > { %v13972_v5 = vadd.f32 %v10062_v54, %v7565_v41  ;;  %v10034_v56 = vpop.f32.mrb[5].mxu0 }
 0x626   : > { %v7568_v14 = vpop.f32.mrb[6].mxu0 }
 0x627   : > { %7629 = vst.msk [vmem:[#allocation2 + $0x10] sm:$0xff] %vm7626_vm4, %v13972_v5  ;;  %v13976_v36 = vadd.f32 %v10064_v61, %v7568_v14  ;;  %v10035_v38 = vpop.f32.mrb[7].mxu0 }
 0x629   : > { %7630 = vst.msk [vmem:[#allocation2 + $0x18] sm:$0xff] %vm7626_vm4, %v13976_v36 }
 0x62c   : > { %v7573_v49 = vpop.f32.mrb[8].mxu0 }
 0x62d   : > { %v13980_v9 = vadd.f32 %v10066_v50, %v7573_v49  ;;  %v10038_v44 = vpop.f32.mrb[9].mxu0  ;;  %v8191_v50 = vld [vmem:[%s14055_s2] ss:$0 sm:$0xff] (!%p8190_p9) }
 0x62e   : > { %v7576_v26 = vpop.f32.mrb[10].mxu0  ;;  %v7652_v49 = vadd.f32 (!%p8190_p9), %v13964_v19, %v8191_v50  ;;  %v7654_v44 = vadd.f32 (!%p8190_p9), %v13972_v5, %v8191_v50 }
 0x62f   : > { %7631 = vst.msk [vmem:[#allocation2 + $0x20] sm:$0xff] %vm7626_vm4, %v13980_v9  ;;  %v13984_v15 = vadd.f32 %v10068_v4, %v7576_v26  ;;  %v10039_v51 = vpop.f32.mrb[11].mxu0  ;;  %v7653_v4 = vadd.f32 (!%p8190_p9), %v13968_v39, %v8191_v50  ;;  %v7655_v26 = vadd.f32 (!%p8190_p9), %v13976_v36, %v8191_v50 }
 0x630   : > { %v7656_v51 = vadd.f32 (!%p8190_p9), %v13980_v9, %v8191_v50  ;;  %7666 = vst.msk [vmem:[%s11559_s5] sm:$0xff] (!%p8190_p9), %vm7626_vm4, %v7652_v49  ;;  %7668 = vst.msk [vmem:[%s11559_s5 + $0x10] sm:$0xff] (!%p8190_p9), %vm7626_vm4, %v7654_v44 }
 0x631   : > { %7632 = vst.msk [vmem:[#allocation2 + $0x28] sm:$0xff] %vm7626_vm4, %v13984_v15  ;;  %v7657_v46 = vadd.f32 (!%p8190_p9), %v13984_v15, %v8191_v50  ;;  %7667 = vst.msk [vmem:[%s11559_s5 + $0x8] sm:$0xff] (!%p8190_p9), %vm7626_vm4, %v7653_v4 }
 0x632   : > { %7669 = vst.msk [vmem:[%s11559_s5 + $0x18] sm:$0xff] (!%p8190_p9), %vm7626_vm4, %v7655_v26  ;;  %7670 = vst.msk [vmem:[%s11559_s5 + $0x20] sm:$0xff] (!%p8190_p9), %vm7626_vm4, %v7656_v51 }
 0x633   : > { %7671 = vst.msk [vmem:[%s11559_s5 + $0x28] sm:$0xff] (!%p8190_p9), %vm7626_vm4, %v7657_v46 }
 0x634   : > { %v3989_v58 = vpop.f32.mrb[16].mxu1  ;;  %v7581_v33 = vpop.f32.mrb[12].mxu0 }
 0x635   : > { %v13988_v11 = vadd.f32 %v10070_v18, %v7581_v33  ;;  %v9326_v21 = vpop.f32.mrb[17].mxu1  ;;  %v10042_v63 = vpop.f32.mrb[13].mxu0  ;;  %v10074_v12 = vadd.f32 %v3989_v58, %v269_v1 }
 0x636   : > { %v3992_v34 = vpop.f32.mrb[18].mxu1  ;;  %v7584_v23 = vpop.f32.mrb[14].mxu0 }
 0x637   : > { %7633 = vst.msk [vmem:[#allocation2 + $0x30] sm:$0xff] %vm7626_vm4, %v13988_v11  ;;  %v10073_v25 = vadd.f32 %v10072_v29, %v7584_v23  ;;  %v9327_v30 = vpop.f32.mrb[19].mxu1  ;;  %v10043_v31 = vpop.f32.mrb[15].mxu0  ;;  %v10076_v60 = vadd.f32 %v3992_v34, %v270_v57  ;;  %v7658_v22 = vadd.f32 (!%p8190_p9), %v13988_v11, %v8191_v50 }
 0x639   : > { %7634 = vst.msk [vmem:[#allocation2 + $0x38] sm:$0xff] %vm7626_vm4, %v10073_v25  ;;  %v7659_v18 = vadd.f32 (!%p8190_p9), %v10073_v25, %v8191_v50  ;;  %7672 = vst.msk [vmem:[%s11559_s5 + $0x30] sm:$0xff] (!%p8190_p9), %vm7626_vm4, %v7658_v22 }
 0x63b   : > { %7673 = vst.msk [vmem:[%s11559_s5 + $0x38] sm:$0xff] (!%p8190_p9), %vm7626_vm4, %v7659_v18 }
 0x63c   : > { %v3997_v52 = vpop.f32.mrb[20].mxu1  ;;  %v7589_v40 = vpop.f32.mrb[16].mxu0 }
 0x63d   : > { %v10075_v8 = vadd.f32 %v10074_v12, %v7589_v40  ;;  %v9330_v13 = vpop.f32.mrb[21].mxu1  ;;  %v10046_v48 = vpop.f32.mrb[17].mxu0  ;;  %v10078_v42 = vadd.f32 %v3997_v52, %v271_v55 }
 0x63e   : > { %v4000_v47 = vpop.f32.mrb[22].mxu1  ;;  %v7592_v37 = vpop.f32.mrb[18].mxu0 }
 0x63f   : > { %7635 = vst.msk [vmem:[#allocation2 + $0x40] sm:$0xff] %vm7626_vm4, %v10075_v8  ;;  %v10077_v35 = vadd.f32 %v10076_v60, %v7592_v37  ;;  %v9331_v0 = vpop.f32.mrb[23].mxu1  ;;  %v10047_v20 = vpop.f32.mrb[19].mxu0  ;;  %v10080_v27 = vadd.f32 %v4000_v47, %v272_v10  ;;  %v7660_v19 = vadd.f32 (!%p8190_p9), %v10075_v8, %v8191_v50 }
 0x641   : > { %7636 = vst.msk [vmem:[#allocation2 + $0x48] sm:$0xff] %vm7626_vm4, %v10077_v35  ;;  %v7661_v39 = vadd.f32 (!%p8190_p9), %v10077_v35, %v8191_v50  ;;  %7674 = vst.msk [vmem:[%s11559_s5 + $0x40] sm:$0xff] (!%p8190_p9), %vm7626_vm4, %v7660_v19 }
 0x643   : > { %7675 = vst.msk [vmem:[%s11559_s5 + $0x48] sm:$0xff] (!%p8190_p9), %vm7626_vm4, %v7661_v39 }
 0x644   : > { %v4005_v59 = vpop.f32.mrb[24].mxu1  ;;  %v7597_v3 = vpop.f32.mrb[20].mxu0 }
 0x645   : > { %v10079_v43 = vadd.f32 %v10078_v42, %v7597_v3  ;;  %v9334_v32 = vpop.f32.mrb[25].mxu1  ;;  %v10050_v53 = vpop.f32.mrb[21].mxu0  ;;  %v10082_v54 = vadd.f32 %v4005_v59, %v273_v62 }
 0x646   : > { %v4008_v16 = vpop.f32.mrb[26].mxu1  ;;  %v7600_v45 = vpop.f32.mrb[22].mxu0 }
 0x647   : > { %7637 = vst.msk [vmem:[#allocation2 + $0x50] sm:$0xff] %vm7626_vm4, %v10079_v43  ;;  %v10081_v28 = vadd.f32 %v10080_v27, %v7600_v45  ;;  %v9335_v6 = vpop.f32.mrb[27].mxu1  ;;  %v10051_v7 = vpop.f32.mrb[23].mxu0  ;;  %v10084_v61 = vadd.f32 %v4008_v16, %v274_v17  ;;  %v7662_v5 = vadd.f32 (!%p8190_p9), %v10079_v43, %v8191_v50 }
 0x649   : > { %7638 = vst.msk [vmem:[#allocation2 + $0x58] sm:$0xff] %vm7626_vm4, %v10081_v28  ;;  %v7663_v36 = vadd.f32 (!%p8190_p9), %v10081_v28, %v8191_v50  ;;  %7676 = vst.msk [vmem:[%s11559_s5 + $0x50] sm:$0xff] (!%p8190_p9), %vm7626_vm4, %v7662_v5 }
 0x64b   : > { %7644 = sbr.rel (%p8190_p9) target bundleno = 1620 (0x654), region = 40  ;;  %7677 = vst.msk [vmem:[%s11559_s5 + $0x58] sm:$0xff] (!%p8190_p9), %vm7626_vm4, %v7663_v36 }
 0x64c   : > { %v7605_v41 = vpop.f32.mrb[24].mxu0 }
 0x64d   : > { %v10083_v56 = vadd.f32 %v10082_v54, %v7605_v41  ;;  %v10054_v14 = vpop.f32.mrb[25].mxu0 }
 0x64e   : > { %v7608_v38 = vpop.f32.mrb[26].mxu0 }
 0x64f   : > { %7639 = vst.msk [vmem:[#allocation2 + $0x60] sm:$0xff] %vm7626_vm4, %v10083_v56  ;;  %v10085_v24 = vadd.f32 %v10084_v61, %v7608_v38  ;;  %v10055_v2 = vpop.f32.mrb[27].mxu0  ;;  %v7664_v9 = vadd.f32 (!%p8190_p9), %v10083_v56, %v8191_v50 }
 0x651   : > { %7640 = vst.msk [vmem:[#allocation2 + $0x68] sm:$0xff] %vm7626_vm4, %v10085_v24  ;;  %v7665_v15 = vadd.f32 (!%p8190_p9), %v10085_v24, %v8191_v50  ;;  %7678 = vst.msk [vmem:[%s11559_s5 + $0x60] sm:$0xff] (!%p8190_p9), %vm7626_vm4, %v7664_v9 }
 0x653   : > { %7679 = vst.msk [vmem:[%s11559_s5 + $0x68] sm:$0xff] %vm7626_vm4, %v7665_v15 }
 0x654 PF: > { %s13_s16 = sadd.s32 1, %s11486_s16   ;;  %s14057_s12 = smov %s11478_s14 }
 0x655   : > { %p10_p10 = scmp.ge.s32.totalorder %s13_s16, 58   ;;  %s14058_s13 = smov %s11482_s15 }
 0x656   : > { %s14059_s14 = smov %s14062_s17  ;;  %s14060_s15 = smov %s14066_s18 }
 0x657   :  { %12 = sbr.rel (!%p10_p10) target bundleno = 3 (0x3), region = 121 }

</bundles_post_ra>
